<compile_context>
chip_gen: v7x
topology: tpu7x:2x2x1
jax: 0.10.0
libtpu: 0.0.40
codegen_flags: <defaults>
</compile_context>

<pallas_src>
import functools

import jax
import jax.numpy as jnp
from jax import lax
from jax.experimental import pallas as pl
from jax.experimental.pallas import tpu as pltpu

dropout = 0.15          # identity in eval mode
n_embd = 128
block_size = 64
n_head = 4
head_size = n_embd // n_head
_LN_EPS = 1e-5          # PyTorch nn.LayerNorm default


def _layer_norm(z, g, b):
    mu = jnp.mean(z, axis=-1, keepdims=True)
    zc = z - mu
    var = jnp.mean(zc * zc, axis=-1, keepdims=True)
    return zc * lax.rsqrt(var + _LN_EPS) * g + b


def _block_kernel(x_ref, ln1g_ref, ln1b_ref, wqkv_ref, wproj_ref, bproj_ref,
                  ln2g_ref, ln2b_ref, w1_ref, b1_ref, w2_ref, b2_ref, o_ref,
                  *, n_heads, h_size):
    Bblk, T, C = x_ref.shape
    HH = n_heads * h_size                      # == C here

    x = x_ref[...]                             # (Bblk, T, C), native dtype
    x2 = x.reshape(Bblk * T, C)

    # ---- ln1 (f32 math, cast back to operand dtype for the MXU) ----
    ln1 = _layer_norm(x2.astype(jnp.float32), ln1g_ref[...], ln1b_ref[...])

    # ---- fused Q/K/V projection for all heads: one (Bblk*T,C)x(C,3C) matmul ----
    qkv = jnp.dot(ln1.astype(wqkv_ref.dtype), wqkv_ref[...],
                  preferred_element_type=jnp.float32)       # (Bblk*T, 3*HH)
    qkv = qkv.reshape(Bblk, T, 3 * HH)
    scale = 1.0 / (h_size ** 0.5)
    q_all = qkv[:, :, 0 * HH:1 * HH] * scale   # fold 1/sqrt(H) into q
    k_all = qkv[:, :, 1 * HH:2 * HH]
    v_all = qkv[:, :, 2 * HH:3 * HH]

    # ---- causal additive bias, built once, reused across batches/heads ----
    row = lax.broadcasted_iota(jnp.int32, (T, T), 0)
    col = lax.broadcasted_iota(jnp.int32, (T, T), 1)
    causal_bias = jnp.where(row >= col, 0.0, -1e30).astype(jnp.float32)[None]

    # ---- attention: batched over Bblk, heads statically unrolled ----
    acc = jnp.zeros((Bblk, T, C), jnp.float32)
    for h in range(n_heads):
        c0 = h * h_size
        qh = q_all[:, :, c0:c0 + h_size]       # (Bblk, T, hs)
        kh = k_all[:, :, c0:c0 + h_size]
        vh = v_all[:, :, c0:c0 + h_size]
        # scores: q @ k^T with batch dim, no materialized transpose
        s = jnp.einsum('bqd,bkd->bqk', qh, kh,
                       preferred_element_type=jnp.float32)  # (Bblk, T, T)
        s = s + causal_bias
        s = s - jnp.max(s, axis=-1, keepdims=True)
        p = jnp.exp(s)
        # exact reciprocal keeps numerics tight vs. the reference; approx=True
        # (EUP) is a further option when bit-tightness is not needed.
        p = p * pl.reciprocal(jnp.sum(p, axis=-1, keepdims=True), approx=False)
        # attention dropout == identity (eval mode)
        oh = jnp.einsum('bqk,bkd->bqd', p.astype(vh.dtype), vh,
                        preferred_element_type=jnp.float32)  # (Bblk, T, hs)
        # concat(heads) @ Wproj  ==  sum_h head_h @ Wproj[h*hs:(h+1)*hs, :]
        acc = acc + jnp.einsum('bqd,dc->bqc', oh.astype(wproj_ref.dtype),
                               wproj_ref[c0:c0 + h_size, :],
                               preferred_element_type=jnp.float32)
    sa = acc.reshape(Bblk * T, C) + bproj_ref[...]           # (Bblk*T, C)

    # ---- first residual ----
    x_res = x2.astype(jnp.float32) + sa

    # ---- ln2 + feed-forward (Linear -> SiLU -> Linear) + second residual ----
    ln2 = _layer_norm(x_res, ln2g_ref[...], ln2b_ref[...])
    h1 = jnp.dot(ln2.astype(w1_ref.dtype), w1_ref[...],
                 preferred_element_type=jnp.float32) + b1_ref[...]  # (Bblk*T, 4C)
    h1 = h1 * jax.nn.sigmoid(h1)                                    # SiLU
    ffn = jnp.dot(h1.astype(w2_ref.dtype), w2_ref[...],
                  preferred_element_type=jnp.float32) + b2_ref[...]
    # FFN dropout == identity (eval mode)
    out = x_res + ffn                                               # (Bblk*T, C)

    o_ref[...] = out.reshape(Bblk, T, C).astype(o_ref.dtype)        # lane-dense C=128


def _pick_bblk(B, cap=8):
    """Largest divisor of B (<= cap) that still leaves >= 2 grid steps, so
    dual-TensorCore chips get work on both cores; falls back to 1."""
    best = 1
    for c in range(2, min(B // 2, cap) + 1):
        if B % c == 0:
            best = c
    return best


def block_forward(x, params, *, bblk=None):
    """x: (B, T, C).  Linear weights are stored pre-transposed (in, out)."""
    B, T, C = x.shape
    assert C == n_embd and T <= block_size
    if bblk is None:
        bblk = _pick_bblk(B)
    assert B % bblk == 0

    # Fuse the 3*n_head projection matrices into one (C, 3C) operand:
    # columns [0:C) = all-head Q, [C:2C) = all-head K, [2C:3C) = all-head V.
    w_qkv = jnp.concatenate([params["w_q"], params["w_k"], params["w_v"]],
                            axis=1)

    kernel = functools.partial(_block_kernel, n_heads=n_head, h_size=head_size)

    inputs = (
        x,
        params["ln1_g"].reshape(1, C), params["ln1_b"].reshape(1, C),
        w_qkv,
        params["w_proj"], params["b_proj"].reshape(1, C),
        params["ln2_g"].reshape(1, C), params["ln2_b"].reshape(1, C),
        params["w1"], params["b1"].reshape(1, 4 * C),
        params["w2"], params["b2"].reshape(1, C),
    )

    def _const_spec(a):
        # weights/biases: full array, same block every grid step (stays in VMEM)
        return pl.BlockSpec(a.shape, lambda b: (0, 0))

    in_specs = [pl.BlockSpec((bblk, T, C), lambda b: (b, 0, 0))]
    in_specs += [_const_spec(a) for a in inputs[1:]]

    return pl.pallas_call(
        kernel,
        out_shape=jax.ShapeDtypeStruct((B, T, C), x.dtype),
        grid_spec=pltpu.PrefetchScalarGridSpec(
            num_scalar_prefetch=0,
            grid=(B // bblk,),
            in_specs=in_specs,
            out_specs=pl.BlockSpec((bblk, T, C), lambda b: (b, 0, 0)),
        ),
        compiler_params=pltpu.CompilerParams(
            dimension_semantics=("parallel",),
            vmem_limit_bytes=32 * 1024 * 1024,   # safe on v5e/v6e/v7x
        ),
    )(*inputs)


def block_reference(x, params):
    """Pure-JAX reference mirroring the PyTorch Block forward (eval mode)."""
    B, T, C = x.shape

    def ln(z, g, b):
        mu = jnp.mean(z, axis=-1, keepdims=True)
        var = jnp.mean((z - mu) ** 2, axis=-1, keepdims=True)
        return (z - mu) / jnp.sqrt(var + _LN_EPS) * g + b

    h = ln(x, params["ln1_g"], params["ln1_b"])
    mask = jnp.tril(jnp.ones((T, T), dtype=bool))
    heads = []
    for i in range(n_head):
        sl = slice(i * head_size, (i + 1) * head_size)
        q = h @ params["w_q"][:, sl]
        k = h @ params["w_k"][:, sl]
        v = h @ params["w_v"][:, sl]
        wei = (q @ jnp.swapaxes(k, -2, -1)) * (head_size ** -0.5)
        wei = jnp.where(mask[None], wei, -jnp.inf)
        wei = jax.nn.softmax(wei, axis=-1)
        heads.append(wei @ v)
    sa = jnp.concatenate(heads, axis=-1) @ params["w_proj"] + params["b_proj"]
    x = x + sa
    h2 = ln(x, params["ln2_g"], params["ln2_b"])
    f = h2 @ params["w1"] + params["b1"]
    f = f * jax.nn.sigmoid(f)
    f = f @ params["w2"] + params["b2"]
    return x + f


if __name__ == "__main__":
    B, T = 2, block_size   # (2, 64, 128)

    key = jax.random.PRNGKey(0)
    ks = jax.random.split(key, 10)

    def lin_w(k, fan_in, fan_out):
        bound = 1.0 / (fan_in ** 0.5)
        return jax.random.uniform(k, (fan_in, fan_out), jnp.float32, -bound, bound)

    def lin_b(k, fan_in, fan_out):
        bound = 1.0 / (fan_in ** 0.5)
        return jax.random.uniform(k, (fan_out,), jnp.float32, -bound, bound)

    x = jax.random.normal(ks[0], (B, T, n_embd), dtype=jnp.float32)

    params = dict(
        ln1_g=jnp.ones((n_embd,), jnp.float32),
        ln1_b=jnp.zeros((n_embd,), jnp.float32),
        # per-head weights stored as contiguous column blocks of (C, n_embd)
        w_q=lin_w(ks[1], n_embd, n_embd),
        w_k=lin_w(ks[2], n_embd, n_embd),
        w_v=lin_w(ks[3], n_embd, n_embd),
        w_proj=lin_w(ks[4], n_embd, n_embd),
        b_proj=lin_b(ks[5], n_embd, n_embd),
        ln2_g=jnp.ones((n_embd,), jnp.float32),
        ln2_b=jnp.zeros((n_embd,), jnp.float32),
        w1=lin_w(ks[6], n_embd, 4 * n_embd),
        b1=lin_b(ks[7], n_embd, 4 * n_embd),
        w2=lin_w(ks[8], 4 * n_embd, n_embd),
        b2=lin_b(ks[9], 4 * n_embd, n_embd),
    )

    out = jax.block_until_ready(block_forward(x, params))
    ref = block_reference(x, params)

    assert out.shape == (B, T, n_embd)
    max_err = float(jnp.max(jnp.abs(out - ref)))
    assert jnp.allclose(out, ref, atol=1e-3, rtol=1e-3), (
        f"mismatch vs reference (max abs err {max_err})")

    print("KERNEL_OK")
</pallas_src>

<mosaic_0001>
module attributes {stable_mosaic.version = 11 : i64} {
  func.func @_block_kernel(%arg0: i32, %arg1: memref<1x64x128xf32, #tpu.memory_space<vmem>>, %arg2: memref<1x128xf32, #tpu.memory_space<vmem>>, %arg3: memref<1x128xf32, #tpu.memory_space<vmem>>, %arg4: memref<128x384xf32, #tpu.memory_space<vmem>>, %arg5: memref<128x128xf32, #tpu.memory_space<vmem>>, %arg6: memref<1x128xf32, #tpu.memory_space<vmem>>, %arg7: memref<1x128xf32, #tpu.memory_space<vmem>>, %arg8: memref<1x128xf32, #tpu.memory_space<vmem>>, %arg9: memref<128x512xf32, #tpu.memory_space<vmem>>, %arg10: memref<1x512xf32, #tpu.memory_space<vmem>>, %arg11: memref<512x128xf32, #tpu.memory_space<vmem>>, %arg12: memref<1x128xf32, #tpu.memory_space<vmem>>, %arg13: memref<1x64x128xf32, #tpu.memory_space<vmem>>) attributes {dimension_semantics = [#tpu.dimension_semantics<parallel>], iteration_bounds = array<i64: 2>, scalar_prefetch = 0 : i64, scratch_operands = 0 : i64, tpu.core_type = #tpu.core_type<tc>, window_params = [{transform_indices = @transform_0, window_bounds = array<i64: 1, 64, 128>}, {pipeline_mode = #tpu.pipeline_mode<synchronous>, transform_indices = @transform_1, window_bounds = array<i64: 1, 128>}, {pipeline_mode = #tpu.pipeline_mode<synchronous>, transform_indices = @transform_2, window_bounds = array<i64: 1, 128>}, {pipeline_mode = #tpu.pipeline_mode<synchronous>, transform_indices = @transform_3, window_bounds = array<i64: 128, 384>}, {pipeline_mode = #tpu.pipeline_mode<synchronous>, transform_indices = @transform_4, window_bounds = array<i64: 128, 128>}, {pipeline_mode = #tpu.pipeline_mode<synchronous>, transform_indices = @transform_5, window_bounds = array<i64: 1, 128>}, {pipeline_mode = #tpu.pipeline_mode<synchronous>, transform_indices = @transform_6, window_bounds = array<i64: 1, 128>}, {pipeline_mode = #tpu.pipeline_mode<synchronous>, transform_indices = @transform_7, window_bounds = array<i64: 1, 128>}, {pipeline_mode = #tpu.pipeline_mode<synchronous>, transform_indices = @transform_8, window_bounds = array<i64: 128, 512>}, {pipeline_mode = #tpu.pipeline_mode<synchronous>, transform_indices = @transform_9, window_bounds = array<i64: 1, 512>}, {pipeline_mode = #tpu.pipeline_mode<synchronous>, transform_indices = @transform_10, window_bounds = array<i64: 512, 128>}, {pipeline_mode = #tpu.pipeline_mode<synchronous>, transform_indices = @transform_11, window_bounds = array<i64: 1, 128>}, {transform_indices = @transform_12, window_bounds = array<i64: 1, 64, 128>}]} {
    %c0 = arith.constant 0 : index
    %c0_0 = arith.constant 0 : index
    %c0_1 = arith.constant 0 : index
    %0 = vector.load %arg1[%c0, %c0_0, %c0_1] : memref<1x64x128xf32, #tpu.memory_space<vmem>>, vector<1x64x128xf32>
    %1 = vector.shape_cast %0 : vector<1x64x128xf32> to vector<64x128xf32>
    %c0_2 = arith.constant 0 : index
    %c0_3 = arith.constant 0 : index
    %2 = vector.load %arg2[%c0_2, %c0_3] : memref<1x128xf32, #tpu.memory_space<vmem>>, vector<1x128xf32>
    %c0_4 = arith.constant 0 : index
    %c0_5 = arith.constant 0 : index
    %3 = vector.load %arg3[%c0_4, %c0_5] : memref<1x128xf32, #tpu.memory_space<vmem>>, vector<1x128xf32>
    %cst = arith.constant dense<0.000000e+00> : vector<64xf32>
    %4 = vector.multi_reduction <add>, %1, %cst [1] : vector<64x128xf32> to vector<64xf32>
    %5 = vector.shape_cast %4 : vector<64xf32> to vector<64x1xf32>
    %cst_6 = arith.constant 1.280000e+02 : f32
    %6 = vector.broadcast %cst_6 : f32 to vector<64x1xf32>
    %7 = arith.divf %5, %6 : vector<64x1xf32>
    %8 = vector.broadcast %7 : vector<64x1xf32> to vector<64x128xf32>
    %9 = arith.subf %1, %8 : vector<64x128xf32>
    %10 = arith.mulf %9, %9 : vector<64x128xf32>
    %cst_7 = arith.constant dense<0.000000e+00> : vector<64xf32>
    %11 = vector.multi_reduction <add>, %10, %cst_7 [1] : vector<64x128xf32> to vector<64xf32>
    %12 = vector.shape_cast %11 : vector<64xf32> to vector<64x1xf32>
    %cst_8 = arith.constant 1.280000e+02 : f32
    %13 = vector.broadcast %cst_8 : f32 to vector<64x1xf32>
    %14 = arith.divf %12, %13 : vector<64x1xf32>
    %cst_9 = arith.constant 9.99999974E-6 : f32
    %15 = vector.broadcast %cst_9 : f32 to vector<64x1xf32>
    %16 = arith.addf %14, %15 : vector<64x1xf32>
    %17 = math.rsqrt %16 : vector<64x1xf32>
    %18 = vector.broadcast %17 : vector<64x1xf32> to vector<64x128xf32>
    %19 = arith.mulf %9, %18 : vector<64x128xf32>
    %20 = vector.broadcast %2 : vector<1x128xf32> to vector<64x128xf32>
    %21 = arith.mulf %19, %20 : vector<64x128xf32>
    %22 = vector.broadcast %3 : vector<1x128xf32> to vector<64x128xf32>
    %23 = arith.addf %21, %22 : vector<64x128xf32>
    %c0_10 = arith.constant 0 : index
    %c0_11 = arith.constant 0 : index
    %24 = vector.load %arg4[%c0_10, %c0_11] : memref<128x384xf32, #tpu.memory_space<vmem>>, vector<128x384xf32>
    %cst_12 = arith.constant dense<0.000000e+00> : vector<64x384xf32>
    %25 = tpu.matmul %23, %24, %cst_12 {dimension_numbers = #tpu.dot_dimension_numbers<[1], [0], [0], [1], [0, 0, 1, 1], [], []>} : vector<64x128xf32>, vector<128x384xf32>, vector<64x384xf32> -> vector<64x384xf32>
    %26 = vector.shape_cast %25 : vector<64x384xf32> to vector<1x64x384xf32>
    %27 = vector.extract_strided_slice %26 {offsets = [0, 0, 0], sizes = [1, 64, 128], strides = [1, 1, 1]} : vector<1x64x384xf32> to vector<1x64x128xf32>
    %cst_13 = arith.constant 0.176776692 : f32
    %28 = vector.broadcast %cst_13 : f32 to vector<1x64x128xf32>
    %29 = arith.mulf %27, %28 : vector<1x64x128xf32>
    %30 = vector.extract_strided_slice %26 {offsets = [0, 0, 128], sizes = [1, 64, 128], strides = [1, 1, 1]} : vector<1x64x384xf32> to vector<1x64x128xf32>
    %31 = vector.extract_strided_slice %26 {offsets = [0, 0, 256], sizes = [1, 64, 128], strides = [1, 1, 1]} : vector<1x64x384xf32> to vector<1x64x128xf32>
    %32 = tpu.iota {dimensions = array<i32: 0>} : vector<64x64xi32>
    %33 = tpu.iota {dimensions = array<i32: 1>} : vector<64x64xi32>
    %34 = arith.cmpi sge, %32, %33 : vector<64x64xi32>
    %cst_14 = arith.constant 0.000000e+00 : f32
    %cst_15 = arith.constant -1.000000e+30 : f32
    %35 = vector.broadcast %cst_14 : f32 to vector<64x64xf32>
    %36 = vector.broadcast %cst_15 : f32 to vector<64x64xf32>
    %37 = arith.select %34, %35, %36 : vector<64x64xi1>, vector<64x64xf32>
    %38 = vector.shape_cast %37 : vector<64x64xf32> to vector<1x64x64xf32>
    %cst_16 = arith.constant 0.000000e+00 : f32
    %39 = vector.broadcast %cst_16 : f32 to vector<1x64x128xf32>
    %40 = vector.extract_strided_slice %29 {offsets = [0, 0, 0], sizes = [1, 64, 32], strides = [1, 1, 1]} : vector<1x64x128xf32> to vector<1x64x32xf32>
    %41 = vector.extract_strided_slice %30 {offsets = [0, 0, 0], sizes = [1, 64, 32], strides = [1, 1, 1]} : vector<1x64x128xf32> to vector<1x64x32xf32>
    %42 = vector.extract_strided_slice %31 {offsets = [0, 0, 0], sizes = [1, 64, 32], strides = [1, 1, 1]} : vector<1x64x128xf32> to vector<1x64x32xf32>
    "tpu.trace_start"() <{level = 10 : i32, message = "bqd,bkd->bqk"}> : () -> ()
    %cst_17 = arith.constant dense<0.000000e+00> : vector<1x64x64xf32>
    %43 = tpu.matmul %40, %41, %cst_17 {dimension_numbers = #tpu.dot_dimension_numbers<[2], [2], [1], [1], [0, 0, 0, 1, 1, 1], [0], [0]>} : vector<1x64x32xf32>, vector<1x64x32xf32>, vector<1x64x64xf32> -> vector<1x64x64xf32>
    "tpu.trace_stop"() : () -> ()
    %44 = arith.addf %43, %38 : vector<1x64x64xf32>
    %cst_18 = arith.constant dense<0xFF800000> : vector<1x64xf32>
    %45 = vector.multi_reduction <maximumf>, %44, %cst_18 [2] : vector<1x64x64xf32> to vector<1x64xf32>
    %46 = vector.shape_cast %45 : vector<1x64xf32> to vector<1x64x1xf32>
    %47 = vector.broadcast %46 : vector<1x64x1xf32> to vector<1x64x64xf32>
    %48 = arith.subf %44, %47 : vector<1x64x64xf32>
    %49 = math.exp %48 : vector<1x64x64xf32>
    %cst_19 = arith.constant dense<0.000000e+00> : vector<1x64xf32>
    %50 = vector.multi_reduction <add>, %49, %cst_19 [2] : vector<1x64x64xf32> to vector<1x64xf32>
    %51 = vector.shape_cast %50 : vector<1x64xf32> to vector<1x64x1xf32>
    %52 = tpu.reciprocal %51 : vector<1x64x1xf32> -> vector<1x64x1xf32>
    %53 = vector.broadcast %52 : vector<1x64x1xf32> to vector<1x64x64xf32>
    %54 = arith.mulf %49, %53 : vector<1x64x64xf32>
    "tpu.trace_start"() <{level = 10 : i32, message = "bqk,bkd->bqd"}> : () -> ()
    %cst_20 = arith.constant dense<0.000000e+00> : vector<1x64x32xf32>
    %55 = tpu.matmul %54, %42, %cst_20 {dimension_numbers = #tpu.dot_dimension_numbers<[2], [1], [1], [2], [0, 0, 0, 1, 1, 2], [0], [0]>} : vector<1x64x64xf32>, vector<1x64x32xf32>, vector<1x64x32xf32> -> vector<1x64x32xf32>
    "tpu.trace_stop"() : () -> ()
    %c0_21 = arith.constant 0 : index
    %c0_22 = arith.constant 0 : index
    %56 = vector.load %arg5[%c0_21, %c0_22] : memref<128x128xf32, #tpu.memory_space<vmem>>, vector<32x128xf32>
    "tpu.trace_start"() <{level = 10 : i32, message = "bqd,dc->bqc"}> : () -> ()
    %cst_23 = arith.constant dense<0.000000e+00> : vector<1x64x128xf32>
    %57 = tpu.matmul %55, %56, %cst_23 {dimension_numbers = #tpu.dot_dimension_numbers<[2], [0], [0, 1], [1], [0, 0, 0, 1, 1, 1], [], []>} : vector<1x64x32xf32>, vector<32x128xf32>, vector<1x64x128xf32> -> vector<1x64x128xf32>
    "tpu.trace_stop"() : () -> ()
    %58 = arith.addf %39, %57 : vector<1x64x128xf32>
    %59 = vector.extract_strided_slice %29 {offsets = [0, 0, 32], sizes = [1, 64, 32], strides = [1, 1, 1]} : vector<1x64x128xf32> to vector<1x64x32xf32>
    %60 = vector.extract_strided_slice %30 {offsets = [0, 0, 32], sizes = [1, 64, 32], strides = [1, 1, 1]} : vector<1x64x128xf32> to vector<1x64x32xf32>
    %61 = vector.extract_strided_slice %31 {offsets = [0, 0, 32], sizes = [1, 64, 32], strides = [1, 1, 1]} : vector<1x64x128xf32> to vector<1x64x32xf32>
    "tpu.trace_start"() <{level = 10 : i32, message = "bqd,bkd->bqk"}> : () -> ()
    %cst_24 = arith.constant dense<0.000000e+00> : vector<1x64x64xf32>
    %62 = tpu.matmul %59, %60, %cst_24 {dimension_numbers = #tpu.dot_dimension_numbers<[2], [2], [1], [1], [0, 0, 0, 1, 1, 1], [0], [0]>} : vector<1x64x32xf32>, vector<1x64x32xf32>, vector<1x64x64xf32> -> vector<1x64x64xf32>
    "tpu.trace_stop"() : () -> ()
    %63 = arith.addf %62, %38 : vector<1x64x64xf32>
    %cst_25 = arith.constant dense<0xFF800000> : vector<1x64xf32>
    %64 = vector.multi_reduction <maximumf>, %63, %cst_25 [2] : vector<1x64x64xf32> to vector<1x64xf32>
    %65 = vector.shape_cast %64 : vector<1x64xf32> to vector<1x64x1xf32>
    %66 = vector.broadcast %65 : vector<1x64x1xf32> to vector<1x64x64xf32>
    %67 = arith.subf %63, %66 : vector<1x64x64xf32>
    %68 = math.exp %67 : vector<1x64x64xf32>
    %cst_26 = arith.constant dense<0.000000e+00> : vector<1x64xf32>
    %69 = vector.multi_reduction <add>, %68, %cst_26 [2] : vector<1x64x64xf32> to vector<1x64xf32>
    %70 = vector.shape_cast %69 : vector<1x64xf32> to vector<1x64x1xf32>
    %71 = tpu.reciprocal %70 : vector<1x64x1xf32> -> vector<1x64x1xf32>
    %72 = vector.broadcast %71 : vector<1x64x1xf32> to vector<1x64x64xf32>
    %73 = arith.mulf %68, %72 : vector<1x64x64xf32>
    "tpu.trace_start"() <{level = 10 : i32, message = "bqk,bkd->bqd"}> : () -> ()
    %cst_27 = arith.constant dense<0.000000e+00> : vector<1x64x32xf32>
    %74 = tpu.matmul %73, %61, %cst_27 {dimension_numbers = #tpu.dot_dimension_numbers<[2], [1], [1], [2], [0, 0, 0, 1, 1, 2], [0], [0]>} : vector<1x64x64xf32>, vector<1x64x32xf32>, vector<1x64x32xf32> -> vector<1x64x32xf32>
    "tpu.trace_stop"() : () -> ()
    %c32 = arith.constant 32 : index
    %c0_28 = arith.constant 0 : index
    %75 = vector.load %arg5[%c32, %c0_28] : memref<128x128xf32, #tpu.memory_space<vmem>>, vector<32x128xf32>
    "tpu.trace_start"() <{level = 10 : i32, message = "bqd,dc->bqc"}> : () -> ()
    %cst_29 = arith.constant dense<0.000000e+00> : vector<1x64x128xf32>
    %76 = tpu.matmul %74, %75, %cst_29 {dimension_numbers = #tpu.dot_dimension_numbers<[2], [0], [0, 1], [1], [0, 0, 0, 1, 1, 1], [], []>} : vector<1x64x32xf32>, vector<32x128xf32>, vector<1x64x128xf32> -> vector<1x64x128xf32>
    "tpu.trace_stop"() : () -> ()
    %77 = arith.addf %58, %76 : vector<1x64x128xf32>
    %78 = vector.extract_strided_slice %29 {offsets = [0, 0, 64], sizes = [1, 64, 32], strides = [1, 1, 1]} : vector<1x64x128xf32> to vector<1x64x32xf32>
    %79 = vector.extract_strided_slice %30 {offsets = [0, 0, 64], sizes = [1, 64, 32], strides = [1, 1, 1]} : vector<1x64x128xf32> to vector<1x64x32xf32>
    %80 = vector.extract_strided_slice %31 {offsets = [0, 0, 64], sizes = [1, 64, 32], strides = [1, 1, 1]} : vector<1x64x128xf32> to vector<1x64x32xf32>
    "tpu.trace_start"() <{level = 10 : i32, message = "bqd,bkd->bqk"}> : () -> ()
    %cst_30 = arith.constant dense<0.000000e+00> : vector<1x64x64xf32>
    %81 = tpu.matmul %78, %79, %cst_30 {dimension_numbers = #tpu.dot_dimension_numbers<[2], [2], [1], [1], [0, 0, 0, 1, 1, 1], [0], [0]>} : vector<1x64x32xf32>, vector<1x64x32xf32>, vector<1x64x64xf32> -> vector<1x64x64xf32>
    "tpu.trace_stop"() : () -> ()
    %82 = arith.addf %81, %38 : vector<1x64x64xf32>
    %cst_31 = arith.constant dense<0xFF800000> : vector<1x64xf32>
    %83 = vector.multi_reduction <maximumf>, %82, %cst_31 [2] : vector<1x64x64xf32> to vector<1x64xf32>
    %84 = vector.shape_cast %83 : vector<1x64xf32> to vector<1x64x1xf32>
    %85 = vector.broadcast %84 : vector<1x64x1xf32> to vector<1x64x64xf32>
    %86 = arith.subf %82, %85 : vector<1x64x64xf32>
    %87 = math.exp %86 : vector<1x64x64xf32>
    %cst_32 = arith.constant dense<0.000000e+00> : vector<1x64xf32>
    %88 = vector.multi_reduction <add>, %87, %cst_32 [2] : vector<1x64x64xf32> to vector<1x64xf32>
    %89 = vector.shape_cast %88 : vector<1x64xf32> to vector<1x64x1xf32>
    %90 = tpu.reciprocal %89 : vector<1x64x1xf32> -> vector<1x64x1xf32>
    %91 = vector.broadcast %90 : vector<1x64x1xf32> to vector<1x64x64xf32>
    %92 = arith.mulf %87, %91 : vector<1x64x64xf32>
    "tpu.trace_start"() <{level = 10 : i32, message = "bqk,bkd->bqd"}> : () -> ()
    %cst_33 = arith.constant dense<0.000000e+00> : vector<1x64x32xf32>
    %93 = tpu.matmul %92, %80, %cst_33 {dimension_numbers = #tpu.dot_dimension_numbers<[2], [1], [1], [2], [0, 0, 0, 1, 1, 2], [0], [0]>} : vector<1x64x64xf32>, vector<1x64x32xf32>, vector<1x64x32xf32> -> vector<1x64x32xf32>
    "tpu.trace_stop"() : () -> ()
    %c64 = arith.constant 64 : index
    %c0_34 = arith.constant 0 : index
    %94 = vector.load %arg5[%c64, %c0_34] : memref<128x128xf32, #tpu.memory_space<vmem>>, vector<32x128xf32>
    "tpu.trace_start"() <{level = 10 : i32, message = "bqd,dc->bqc"}> : () -> ()
    %cst_35 = arith.constant dense<0.000000e+00> : vector<1x64x128xf32>
    %95 = tpu.matmul %93, %94, %cst_35 {dimension_numbers = #tpu.dot_dimension_numbers<[2], [0], [0, 1], [1], [0, 0, 0, 1, 1, 1], [], []>} : vector<1x64x32xf32>, vector<32x128xf32>, vector<1x64x128xf32> -> vector<1x64x128xf32>
    "tpu.trace_stop"() : () -> ()
    %96 = arith.addf %77, %95 : vector<1x64x128xf32>
    %97 = vector.extract_strided_slice %29 {offsets = [0, 0, 96], sizes = [1, 64, 32], strides = [1, 1, 1]} : vector<1x64x128xf32> to vector<1x64x32xf32>
    %98 = vector.extract_strided_slice %30 {offsets = [0, 0, 96], sizes = [1, 64, 32], strides = [1, 1, 1]} : vector<1x64x128xf32> to vector<1x64x32xf32>
    %99 = vector.extract_strided_slice %31 {offsets = [0, 0, 96], sizes = [1, 64, 32], strides = [1, 1, 1]} : vector<1x64x128xf32> to vector<1x64x32xf32>
    "tpu.trace_start"() <{level = 10 : i32, message = "bqd,bkd->bqk"}> : () -> ()
    %cst_36 = arith.constant dense<0.000000e+00> : vector<1x64x64xf32>
    %100 = tpu.matmul %97, %98, %cst_36 {dimension_numbers = #tpu.dot_dimension_numbers<[2], [2], [1], [1], [0, 0, 0, 1, 1, 1], [0], [0]>} : vector<1x64x32xf32>, vector<1x64x32xf32>, vector<1x64x64xf32> -> vector<1x64x64xf32>
    "tpu.trace_stop"() : () -> ()
    %101 = arith.addf %100, %38 : vector<1x64x64xf32>
    %cst_37 = arith.constant dense<0xFF800000> : vector<1x64xf32>
    %102 = vector.multi_reduction <maximumf>, %101, %cst_37 [2] : vector<1x64x64xf32> to vector<1x64xf32>
    %103 = vector.shape_cast %102 : vector<1x64xf32> to vector<1x64x1xf32>
    %104 = vector.broadcast %103 : vector<1x64x1xf32> to vector<1x64x64xf32>
    %105 = arith.subf %101, %104 : vector<1x64x64xf32>
    %106 = math.exp %105 : vector<1x64x64xf32>
    %cst_38 = arith.constant dense<0.000000e+00> : vector<1x64xf32>
    %107 = vector.multi_reduction <add>, %106, %cst_38 [2] : vector<1x64x64xf32> to vector<1x64xf32>
    %108 = vector.shape_cast %107 : vector<1x64xf32> to vector<1x64x1xf32>
    %109 = tpu.reciprocal %108 : vector<1x64x1xf32> -> vector<1x64x1xf32>
    %110 = vector.broadcast %109 : vector<1x64x1xf32> to vector<1x64x64xf32>
    %111 = arith.mulf %106, %110 : vector<1x64x64xf32>
    "tpu.trace_start"() <{level = 10 : i32, message = "bqk,bkd->bqd"}> : () -> ()
    %cst_39 = arith.constant dense<0.000000e+00> : vector<1x64x32xf32>
    %112 = tpu.matmul %111, %99, %cst_39 {dimension_numbers = #tpu.dot_dimension_numbers<[2], [1], [1], [2], [0, 0, 0, 1, 1, 2], [0], [0]>} : vector<1x64x64xf32>, vector<1x64x32xf32>, vector<1x64x32xf32> -> vector<1x64x32xf32>
    "tpu.trace_stop"() : () -> ()
    %c96 = arith.constant 96 : index
    %c0_40 = arith.constant 0 : index
    %113 = vector.load %arg5[%c96, %c0_40] : memref<128x128xf32, #tpu.memory_space<vmem>>, vector<32x128xf32>
    "tpu.trace_start"() <{level = 10 : i32, message = "bqd,dc->bqc"}> : () -> ()
    %cst_41 = arith.constant dense<0.000000e+00> : vector<1x64x128xf32>
    %114 = tpu.matmul %112, %113, %cst_41 {dimension_numbers = #tpu.dot_dimension_numbers<[2], [0], [0, 1], [1], [0, 0, 0, 1, 1, 1], [], []>} : vector<1x64x32xf32>, vector<32x128xf32>, vector<1x64x128xf32> -> vector<1x64x128xf32>
    "tpu.trace_stop"() : () -> ()
    %115 = arith.addf %96, %114 : vector<1x64x128xf32>
    %116 = vector.shape_cast %115 : vector<1x64x128xf32> to vector<64x128xf32>
    %c0_42 = arith.constant 0 : index
    %c0_43 = arith.constant 0 : index
    %117 = vector.load %arg6[%c0_42, %c0_43] : memref<1x128xf32, #tpu.memory_space<vmem>>, vector<1x128xf32>
    %118 = vector.broadcast %117 : vector<1x128xf32> to vector<64x128xf32>
    %119 = arith.addf %116, %118 : vector<64x128xf32>
    %120 = arith.addf %1, %119 : vector<64x128xf32>
    %c0_44 = arith.constant 0 : index
    %c0_45 = arith.constant 0 : index
    %121 = vector.load %arg7[%c0_44, %c0_45] : memref<1x128xf32, #tpu.memory_space<vmem>>, vector<1x128xf32>
    %c0_46 = arith.constant 0 : index
    %c0_47 = arith.constant 0 : index
    %122 = vector.load %arg8[%c0_46, %c0_47] : memref<1x128xf32, #tpu.memory_space<vmem>>, vector<1x128xf32>
    %cst_48 = arith.constant dense<0.000000e+00> : vector<64xf32>
    %123 = vector.multi_reduction <add>, %120, %cst_48 [1] : vector<64x128xf32> to vector<64xf32>
    %124 = vector.shape_cast %123 : vector<64xf32> to vector<64x1xf32>
    %cst_49 = arith.constant 1.280000e+02 : f32
    %125 = vector.broadcast %cst_49 : f32 to vector<64x1xf32>
    %126 = arith.divf %124, %125 : vector<64x1xf32>
    %127 = vector.broadcast %126 : vector<64x1xf32> to vector<64x128xf32>
    %128 = arith.subf %120, %127 : vector<64x128xf32>
    %129 = arith.mulf %128, %128 : vector<64x128xf32>
    %cst_50 = arith.constant dense<0.000000e+00> : vector<64xf32>
    %130 = vector.multi_reduction <add>, %129, %cst_50 [1] : vector<64x128xf32> to vector<64xf32>
    %131 = vector.shape_cast %130 : vector<64xf32> to vector<64x1xf32>
    %cst_51 = arith.constant 1.280000e+02 : f32
    %132 = vector.broadcast %cst_51 : f32 to vector<64x1xf32>
    %133 = arith.divf %131, %132 : vector<64x1xf32>
    %cst_52 = arith.constant 9.99999974E-6 : f32
    %134 = vector.broadcast %cst_52 : f32 to vector<64x1xf32>
    %135 = arith.addf %133, %134 : vector<64x1xf32>
    %136 = math.rsqrt %135 : vector<64x1xf32>
    %137 = vector.broadcast %136 : vector<64x1xf32> to vector<64x128xf32>
    %138 = arith.mulf %128, %137 : vector<64x128xf32>
    %139 = vector.broadcast %121 : vector<1x128xf32> to vector<64x128xf32>
    %140 = arith.mulf %138, %139 : vector<64x128xf32>
    %141 = vector.broadcast %122 : vector<1x128xf32> to vector<64x128xf32>
    %142 = arith.addf %140, %141 : vector<64x128xf32>
    %c0_53 = arith.constant 0 : index
    %c0_54 = arith.constant 0 : index
    %143 = vector.load %arg9[%c0_53, %c0_54] : memref<128x512xf32, #tpu.memory_space<vmem>>, vector<128x512xf32>
    %cst_55 = arith.constant dense<0.000000e+00> : vector<64x512xf32>
    %144 = tpu.matmul %142, %143, %cst_55 {dimension_numbers = #tpu.dot_dimension_numbers<[1], [0], [0], [1], [0, 0, 1, 1], [], []>} : vector<64x128xf32>, vector<128x512xf32>, vector<64x512xf32> -> vector<64x512xf32>
    %c0_56 = arith.constant 0 : index
    %c0_57 = arith.constant 0 : index
    %145 = vector.load %arg10[%c0_56, %c0_57] : memref<1x512xf32, #tpu.memory_space<vmem>>, vector<1x512xf32>
    %146 = vector.broadcast %145 : vector<1x512xf32> to vector<64x512xf32>
    %147 = arith.addf %144, %146 : vector<64x512xf32>
    %148 = arith.negf %147 : vector<64x512xf32>
    %149 = math.exp %148 : vector<64x512xf32>
    %cst_58 = arith.constant 1.000000e+00 : f32
    %150 = vector.broadcast %cst_58 : f32 to vector<64x512xf32>
    %151 = arith.addf %150, %149 : vector<64x512xf32>
    %152 = arith.divf %150, %151 : vector<64x512xf32>
    %153 = arith.mulf %147, %152 : vector<64x512xf32>
    %c0_59 = arith.constant 0 : index
    %c0_60 = arith.constant 0 : index
    %154 = vector.load %arg11[%c0_59, %c0_60] : memref<512x128xf32, #tpu.memory_space<vmem>>, vector<512x128xf32>
    %cst_61 = arith.constant dense<0.000000e+00> : vector<64x128xf32>
    %155 = tpu.matmul %153, %154, %cst_61 {dimension_numbers = #tpu.dot_dimension_numbers<[1], [0], [0], [1], [0, 0, 1, 1], [], []>} : vector<64x512xf32>, vector<512x128xf32>, vector<64x128xf32> -> vector<64x128xf32>
    %c0_62 = arith.constant 0 : index
    %c0_63 = arith.constant 0 : index
    %156 = vector.load %arg12[%c0_62, %c0_63] : memref<1x128xf32, #tpu.memory_space<vmem>>, vector<1x128xf32>
    %157 = vector.broadcast %156 : vector<1x128xf32> to vector<64x128xf32>
    %158 = arith.addf %155, %157 : vector<64x128xf32>
    %159 = arith.addf %120, %158 : vector<64x128xf32>
    %160 = vector.shape_cast %159 : vector<64x128xf32> to vector<1x64x128xf32>
    %c0_64 = arith.constant 0 : index
    %c0_65 = arith.constant 0 : index
    %c0_66 = arith.constant 0 : index
    %161 = vector.load %arg13[%c0_64, %c0_65, %c0_66] : memref<1x64x128xf32, #tpu.memory_space<vmem>>, vector<1x64x128xf32>
    tpu.vector_store %arg13[%c0_64, %c0_65, %c0_66], %160 {strides = array<i32>} : memref<1x64x128xf32, #tpu.memory_space<vmem>>, vector<1x64x128xf32>,
    return
  }
  func.func @transform_0(%arg0: i32) -> (i32, i32, i32) {
    %c0_i32 = arith.constant 0 : i32
    %c0_i32_0 = arith.constant 0 : i32
    %c0_i32_1 = arith.constant 0 : i32
    return %arg0, %c0_i32, %c0_i32_0 : i32, i32, i32
  }
  func.func @transform_1(%arg0: i32) -> (i32, i32) {
    %c0_i32 = arith.constant 0 : i32
    %c0_i32_0 = arith.constant 0 : i32
    %c0_i32_1 = arith.constant 0 : i32
    return %c0_i32, %c0_i32_0 : i32, i32
  }
  func.func @transform_2(%arg0: i32) -> (i32, i32) {
    %c0_i32 = arith.constant 0 : i32
    %c0_i32_0 = arith.constant 0 : i32
    %c0_i32_1 = arith.constant 0 : i32
    return %c0_i32, %c0_i32_0 : i32, i32
  }
  func.func @transform_3(%arg0: i32) -> (i32, i32) {
    %c0_i32 = arith.constant 0 : i32
    %c0_i32_0 = arith.constant 0 : i32
    %c0_i32_1 = arith.constant 0 : i32
    return %c0_i32, %c0_i32_0 : i32, i32
  }
  func.func @transform_4(%arg0: i32) -> (i32, i32) {
    %c0_i32 = arith.constant 0 : i32
    %c0_i32_0 = arith.constant 0 : i32
    %c0_i32_1 = arith.constant 0 : i32
    return %c0_i32, %c0_i32_0 : i32, i32
  }
  func.func @transform_5(%arg0: i32) -> (i32, i32) {
    %c0_i32 = arith.constant 0 : i32
    %c0_i32_0 = arith.constant 0 : i32
    %c0_i32_1 = arith.constant 0 : i32
    return %c0_i32, %c0_i32_0 : i32, i32
  }
  func.func @transform_6(%arg0: i32) -> (i32, i32) {
    %c0_i32 = arith.constant 0 : i32
    %c0_i32_0 = arith.constant 0 : i32
    %c0_i32_1 = arith.constant 0 : i32
    return %c0_i32, %c0_i32_0 : i32, i32
  }
  func.func @transform_7(%arg0: i32) -> (i32, i32) {
    %c0_i32 = arith.constant 0 : i32
    %c0_i32_0 = arith.constant 0 : i32
    %c0_i32_1 = arith.constant 0 : i32
    return %c0_i32, %c0_i32_0 : i32, i32
  }
  func.func @transform_8(%arg0: i32) -> (i32, i32) {
    %c0_i32 = arith.constant 0 : i32
    %c0_i32_0 = arith.constant 0 : i32
    %c0_i32_1 = arith.constant 0 : i32
    return %c0_i32, %c0_i32_0 : i32, i32
  }
  func.func @transform_9(%arg0: i32) -> (i32, i32) {
    %c0_i32 = arith.constant 0 : i32
    %c0_i32_0 = arith.constant 0 : i32
    %c0_i32_1 = arith.constant 0 : i32
    return %c0_i32, %c0_i32_0 : i32, i32
  }
  func.func @transform_10(%arg0: i32) -> (i32, i32) {
    %c0_i32 = arith.constant 0 : i32
    %c0_i32_0 = arith.constant 0 : i32
    %c0_i32_1 = arith.constant 0 : i32
    return %c0_i32, %c0_i32_0 : i32, i32
  }
  func.func @transform_11(%arg0: i32) -> (i32, i32) {
    %c0_i32 = arith.constant 0 : i32
    %c0_i32_0 = arith.constant 0 : i32
    %c0_i32_1 = arith.constant 0 : i32
    return %c0_i32, %c0_i32_0 : i32, i32
  }
  func.func @transform_12(%arg0: i32) -> (i32, i32, i32) {
    %c0_i32 = arith.constant 0 : i32
    %c0_i32_0 = arith.constant 0 : i32
    %c0_i32_1 = arith.constant 0 : i32
    return %arg0, %c0_i32, %c0_i32_0 : i32, i32, i32
  }
}

</mosaic_0001>

<bundles_post_ra>
// kernel: tpu_custom_call.1
= control target key start
LH: loop header
LB: loop body
LE: loop exit
PB: predicated region body
PF: predicated region fallthrough
CT: control target
= control target key end

     0   :  { %s7594_s0 = inlined_call_operand.hbm [shape: f32[2,64,128], index: 0, kind: input, shape index: {}]   ;;  %s7595_s1 = inlined_call_operand.vmem [shape: f32[1,128], index: 1, kind: input, shape index: {}]   ;;  %s7596_s2 = inlined_call_operand.vmem [shape: f32[1,128], index: 2, kind: input, shape index: {}]   ;;  %s7597_s3 = inlined_call_operand.hbm [shape: f32[128,384], index: 3, kind: input, shape index: {}]   ;;  %s7598_s4 = inlined_call_operand.hbm [shape: f32[128,128], index: 4, kind: input, shape index: {}]   ;;  %s7599_s5 = inlined_call_operand.vmem [shape: f32[1,128], index: 5, kind: input, shape index: {}]   ;;  %s7600_s6 = inlined_call_operand.vmem [shape: f32[1,128], index: 6, kind: input, shape index: {}]   ;;  %s7601_s7 = inlined_call_operand.vmem [shape: f32[1,128], index: 7, kind: input, shape index: {}]   ;;  %s7602_s8 = inlined_call_operand.hbm [shape: f32[128,512], index: 8, kind: input, shape index: {}]   ;;  %s7603_s9 = inlined_call_operand.vmem [shape: f32[1,512], index: 9, kind: input, shape index: {}]   ;;  %s7604_s10 = inlined_call_operand.hbm [shape: f32[512,128], index: 10, kind: input, shape index: {}]   ;;  %s7605_s11 = inlined_call_operand.vmem [shape: f32[1,128], index: 11, kind: input, shape index: {}]   ;;  %s7606_s12 = inlined_call_operand.hbm [shape: f32[2,64,128], index: 12, kind: output, shape index: {}]  }
   0x1   :  { %7613 = sst [smem:[#allocation18_spill]] %s7597_s3 }
   0x2   :  { %7614 = sst [smem:[#allocation19_spill]] %s7603_s9 }
   0x3   :  { %7615 = sst [smem:[#allocation20_spill]] %s7605_s11 }
   0x4   :  { %7616 = sst [smem:[#allocation21_spill]] %s7606_s12 }
   0x5   :  { %17 = vsyncpa [#allocation3], 0 }
   0x6   :  { %19 = vsyncpa [#allocation3 + $0x1], 0 }
   0x7   :  { %20 = vsyncpa [#allocation6], 0 }
   0x8   :  { %21 = vsyncpa [#allocation9], 0 }
   0x9   :  { %22 = vsyncpa [#allocation4], 0 }
   0xa   :  { %24 = vsyncpa [#allocation4 + $0x1], 0  ;;  %s6251_s21 = smov 0   ;;  %s6253_s22 = smov 0  }
   0xb   :  { %s6255_s23 = smov 0   ;;  %s6257_s24 = smov 0  }
   0xc LB: > { %7617 = sst [smem:[#allocation16_spill]] %s6153_s21  ;;  %s6272_s25 = sadd.s32 4294967295, %s6165_s24   ;;  %s6165_s24 = sphi %s6257_s24, %s7646_s24   ;;  %s6161_s23 = sphi %s6255_s23, %s7645_s23   ;;  %s6157_s22 = sphi %s6253_s22, %s7644_s22   ;;  %s6153_s21 = sphi %s6251_s21, %s7643_s21  }
   0xd   : > { %s4175_s26 = sadd.s32 4294967294, %s6165_s24   ;;  %p50_p0 = scmp.ne.s32.totalorder %s6157_s22, %s6153_s21 }
   0xe   : > { %p7608_p1 = scmp.eq.s32.totalorder %s6272_s25, 0  ;;  %p311_p3 = scmp.eq.s32.totalorder %s4175_s26, 1 }
   0xf   : > { %p4176_p5 = scmp.ge.s32.totalorder %s6165_s24, 1  ;;  %p318_p7 = scmp.lt.s32.totalorder %s6165_s24, 3 }
  0x10   : > { %p6281_p4 = por %p7608_p1, %p50_p0  ;;  %p6286_p6 = por %p311_p3, %p50_p0 }
  0x11   : > { %p6291_p8 = pnand %p4176_p5, %p318_p7  ;;  %s6167_s30 = smov [#allocation5]  }
  0x12   : > { %s7618_s27 = scalar_select %p6281_p4, 1, 0 }
  0x13   : > { %s7619_s28 = scalar_select %p6286_p6, 1, 0 }
  0x14   : > { %s7621_s29 = scalar_select %p6291_p8, 1, 0 }
  0x15   : > { %7620 = sst [smem:[#allocation17_spill]] %s7619_s28  ;;  %s336_s13 = sshll.u32 %s6167_s30, 4  ;;  %s6295_s13 = int_to_ptr.vmem [resolvable:$true] %s336_s13 }
  0x16   : > { %p5453_p9 = pneg %p6291_p8  ;;  %s6168_s15 = smov [#allocation8]  }
  0x17   : > { %s371_s16 = sshll.u32 %s6168_s15, 4  ;;  %s7623_s3 = sld [smem:[#allocation18_spill]]  ;;  %s6306_s16 = int_to_ptr.vmem [resolvable:$true] %s371_s16 }
  0x18   : > { %p6302_p11 = pnand %p5453_p9, %p7608_p1 }
  0x1a   : > { %p6316_p13 = pneg %p6302_p11 }
  0x1d   : > { %s5949_s19 = scalar_lea.hbm %s7623_s3, 6144 }
  0x1e   : > { %p5950_p12 = scmp.ne.s32.totalorder %s7623_s3, %s5949_s19  ;;  %p5956_p5 = scmp.lt.u32.totalorder %s5949_s19, %s7623_s3 }
  0x20   : > { %p5952_p0 = pnand %p6316_p13, %p5950_p12 }
  0x22   : > { %p5953_p3 = pneg %p5952_p0 }
  0x24   : > { %p5958_p7 = pnand %p5956_p5, %p5953_p3 }
  0x26   : > { %5961 = shalt.err (!%p5958_p7)
}
  0x27   : > { %s5962_s17 = scalar_lea.vmem %s6295_s13, 6144  ;;  %p5970_p2 = scmp.lt.s32.totalorder %s6295_s13, %s6295_s13 }
  0x28   : > { %p5963_p9 = scmp.ne.s32.totalorder %s6295_s13, %s5962_s17  ;;  %p5971_p6 = scmp.lt.s32.totalorder %s5962_s17, %s5962_s17 }
  0x2a   : > { %p5965_p10 = pnand %p5963_p9, %p6316_p13  ;;  %p5972_p12 = por %p5971_p6, %p5970_p2 }
  0x2c   : > { %p5966_p1 = pneg %p5965_p10 }
  0x2e   : > { %p5973_p0 = pnand %p5972_p12, %p5966_p1 }
  0x30   : > { %5976 = shalt.err (!%p5973_p0)
}
  0x31   : > { %s6169_s18 = smov 384   ;;  %s6170_s28 = smov 24  }
  0x32   : > { %5456 = dma.hbm_to_vmem [thread:$0]  (!%p6302_p11), %s7623_s3, 6144, %s6295_s13, [#allocation6], %s6169_s18, %s6169_s18, %s6170_s28  }
  0x33   : > { %s5977_s21 = scalar_lea.hbm %s7602_s8, 8192 }
  0x34   : > { %p5978_p2 = scmp.ne.s32.totalorder %s7602_s8, %s5977_s21  ;;  %p5984_p10 = scmp.lt.u32.totalorder %s5977_s21, %s7602_s8 }
  0x36   : > { %p5980_p1 = pnand %p5978_p2, %p6316_p13 }
  0x38   : > { %p5981_p6 = pneg %p5980_p1 }
  0x3a   : > { %p5986_p3 = pnand %p5984_p10, %p5981_p6 }
  0x3c   : > { %5989 = shalt.err (!%p5986_p3)
}
  0x3d   : > { %s5990_s13 = scalar_lea.vmem %s6306_s16, 8192  ;;  %p5998_p12 = scmp.lt.s32.totalorder %s6306_s16, %s6306_s16 }
  0x3e   : > { %p5991_p5 = scmp.ne.s32.totalorder %s6306_s16, %s5990_s13  ;;  %p5999_p0 = scmp.lt.s32.totalorder %s5990_s13, %s5990_s13 }
  0x40   : > { %p5993_p7 = pnand %p5991_p5, %p6316_p13  ;;  %p6000_p2 = por %p5999_p0, %p5998_p12 }
  0x42   : > { %p5994_p9 = pneg %p5993_p7 }
  0x44   : > { %p6001_p1 = pnand %p6000_p2, %p5994_p9 }
  0x46   : > { %6004 = shalt.err (!%p6001_p1)
}
  0x47   : > { %s6171_s11 = smov 512   ;;  %s6172_s9 = smov 32  }
  0x48   : > { %5462 = dma.hbm_to_vmem [thread:$0]  (!%p6302_p11), %s7602_s8, 8192, %s6306_s16, [#allocation9], %s6171_s11, %s6171_s11, %s6172_s9  }
  0x49   : > { %s6173_s18 = smov [#allocation7]   ;;  %s6005_s26 = scalar_lea.hbm %s7598_s4, 2048 }
  0x4a   : > { %s349_s28 = sshll.u32 %s6173_s18, 4  ;;  %p6006_p6 = scmp.ne.s32.totalorder %s7598_s4, %s6005_s26  ;;  %s350_s28 = int_to_ptr.vmem [resolvable:$true] %s349_s28 }
  0x4b   : > { %p6012_p5 = scmp.lt.u32.totalorder %s6005_s26, %s7598_s4 }
  0x4c   : > { %p6008_p10 = pnand %p6006_p6, %p6316_p13 }
  0x4e   : > { %p6009_p3 = pneg %p6008_p10 }
  0x50   : > { %p6014_p7 = pnand %p6012_p5, %p6009_p3 }
  0x52   : > { %6017 = shalt.err (!%p6014_p7)
}
  0x53   : > { %s6018_s16 = scalar_lea.vmem %s350_s28, 2048  ;;  %p6026_p2 = scmp.lt.s32.totalorder %s350_s28, %s350_s28 }
  0x54   : > { %p6019_p9 = scmp.ne.s32.totalorder %s350_s28, %s6018_s16  ;;  %p6027_p1 = scmp.lt.s32.totalorder %s6018_s16, %s6018_s16 }
  0x56   : > { %p6021_p12 = pnand %p6019_p9, %p6316_p13  ;;  %p6028_p4 = por %p6027_p1, %p6026_p2 }
  0x58   : > { %p6022_p0 = pneg %p6021_p12 }
  0x5a   : > { %p6029_p8 = pnand %p6028_p4, %p6022_p0 }
  0x5c   : > { %6032 = shalt.err (!%p6029_p8)
}
  0x5d   : > { %s6174_s11 = smov 128   ;;  %s6175_s9 = smov 8  }
  0x5e   : > { %5459 = dma.hbm_to_vmem [thread:$0]  (!%p6302_p11), %s7598_s4, 2048, %s350_s28, [#allocation6], %s6174_s11, %s6174_s11, %s6175_s9  }
  0x5f   : > { %s6176_s21 = smov [#allocation10]   ;;  %s6033_s26 = scalar_lea.hbm %s7604_s10, 8192 }
  0x60   : > { %s387_s18 = sshll.u32 %s6176_s21, 4  ;;  %p6034_p4 = scmp.ne.s32.totalorder %s7604_s10, %s6033_s26  ;;  %s388_s18 = int_to_ptr.vmem [resolvable:$true] %s387_s18 }
  0x61   : > { %p6040_p10 = scmp.lt.u32.totalorder %s6033_s26, %s7604_s10 }
  0x62   : > { %p6036_p8 = pnand %p6034_p4, %p6316_p13 }
  0x64   : > { %p6037_p6 = pneg %p6036_p8 }
  0x66   : > { %p6042_p3 = pnand %p6040_p10, %p6037_p6 }
  0x68   : > { %6045 = shalt.err (!%p6042_p3)
}
  0x69   : > { %s6046_s28 = scalar_lea.vmem %s388_s18, 8192  ;;  %p6054_p12 = scmp.lt.s32.totalorder %s388_s18, %s388_s18 }
  0x6a   : > { %p6047_p5 = scmp.ne.s32.totalorder %s388_s18, %s6046_s28  ;;  %p6055_p0 = scmp.lt.s32.totalorder %s6046_s28, %s6046_s28 }
  0x6c   : > { %p6049_p7 = pnand %p6047_p5, %p6316_p13  ;;  %p6056_p2 = por %p6055_p0, %p6054_p12 }
  0x6e   : > { %p6050_p9 = pneg %p6049_p7 }
  0x70   : > { %p6057_p1 = pnand %p6056_p2, %p6050_p9 }
  0x72   : > { %6060 = shalt.err (!%p6057_p1)
}
  0x73   : > { %5465 = dma.hbm_to_vmem [thread:$0]  (!%p6302_p11), %s7604_s10, 8192, %s388_s18, [#allocation9], %s6174_s11, %s6174_s11, %s6175_s9  }
  0x74   : > { %s6403_s30 = sadd.s32 1, %s6165_s24   ;;  %s37_s14 = sadd.s32 1, %s6161_s23 }
  0x75   : > { %s34_s21 = ssub.s32 %s6165_s24, %s6403_s30  ;;  %p44_p13 = scmp.ne.s32.totalorder %s6161_s23, %s6157_s22 }
  0x76   : > { %p35_p4 = scmp.eq.s32.totalorder %s34_s21, 0  ;;  %p45_p8 = scmp.eq.s32.totalorder %s6165_s24, 0 }
  0x77   : > { %p7625_p6 = scmp.eq.s32.totalorder %s6272_s25, 1  ;;  %p5478_p3 = scmp.lt.s32.totalorder %s6165_s24, 2 }
  0x78   : > { %s6419_s20 = scalar_select %p35_p4, %s6161_s23, %s37_s14  }
  0x79   : > { %p6413_p10 = por %p7625_p6, %p44_p13  ;;  %p46_p5 = por %p45_p8, %p44_p13 }
  0x7a   : > { %s404_s26 = sand.u32 1, %s6161_s23   ;;  %s4363_s18 = sshll.u32 %s6165_s24, 10 }
  0x7b   : > { %s4182_s15 = sshll.u32 %s404_s26, 6  ;;  %s6426_s16 = scalar_lea.hbm %s7594_s0, %s4363_s18 }
  0x7c   : > { %s408_s28 = scalar_lea.vmem [#allocation2], %s4182_s15  ;;  %p6430_p11 = pnand %p5478_p3, %p46_p5 }
  0x7d   : > { %s415_s3 = sshll.u32 %s408_s28, 4  ;;  %s6434_s14 = scalar_lea.sflag [#allocation3], %s404_s26  ;;  %s6428_s3 = int_to_ptr.vmem [resolvable:$true] %s415_s3 }
  0x7e   : > { %s6061_s21 = scalar_lea.hbm %s6426_s16, 1024  ;;  %p6063_p9 = pneg %p6430_p11 }
  0x7f   : > { %p6062_p7 = scmp.ne.s32.totalorder %s6426_s16, %s6061_s21  ;;  %s6066_s17 = scalar_lea.hbm %s7594_s0, 2048 }
  0x80   : > { %p6067_p2 = scmp.lt.u32.totalorder %s6426_s16, %s7594_s0  ;;  %p6068_p1 = scmp.lt.u32.totalorder %s6066_s17, %s6061_s21 }
  0x81   : > { %p6064_p12 = pnand %p6063_p9, %p6062_p7  ;;  %p6070_p4 = scmp.lt.u32.totalorder %s6061_s21, %s6426_s16 }
  0x82   : > { %p6069_p13 = por %p6068_p1, %p6067_p2 }
  0x83   : > { %p6065_p0 = pneg %p6064_p12 }
  0x84   : > { %p6071_p8 = por %p6070_p4, %p6069_p13 }
  0x86   : > { %p6072_p6 = pnand %p6071_p8, %p6065_p0 }
  0x88   : > { %6075 = shalt.err (!%p6072_p6)
}
  0x89   : > { %s6076_s26 = scalar_lea.vmem %s6428_s3, 1024  ;;  %s6177_s15 = smov [#allocation2]  }
  0x8a   : > { %p6077_p3 = scmp.ne.s32.totalorder %s6428_s3, %s6076_s26  ;;  %s6081_s18 = sshll.u32 %s6177_s15, 4  ;;  %s6082_s18 = int_to_ptr.vmem [resolvable:$false] %s6081_s18 }
  0x8b   : > { %s6083_s13 = scalar_lea.vmem %s6082_s18, 2048  ;;  %p6084_p12 = scmp.lt.s32.totalorder %s6428_s3, %s6082_s18 }
  0x8c   : > { %p6079_p5 = pnand %p6077_p3, %p6063_p9  ;;  %p6085_p2 = scmp.lt.s32.totalorder %s6083_s13, %s6076_s26 }
  0x8e   : > { %p6080_p7 = pneg %p6079_p5  ;;  %p6086_p1 = por %p6085_p2, %p6084_p12 }
  0x90   : > { %p6087_p13 = pnand %p6086_p1, %p6080_p7 }
  0x92   : > { %6090 = shalt.err (!%p6087_p13)
}
  0x93   : > { %5469 = dma.hbm_to_vmem [thread:$0]  (!%p6430_p11), %s6426_s16, 1024, %s6428_s3, %s6434_s14, %s6174_s11, %s6174_s11, %s6175_s9  }
  0x94   : > { %p7628_p9 = scmp.ne.s32.totalorder %s7621_s29, 0 }
  0x95   : > { %s6468_s21 = sand.u32 (!%p7628_p9), 1, %s6157_s22   ;;  %p7629_p0 = scmp.ne.s32.totalorder (!%p7628_p9), %s7618_s27, 0 }
  0x96   : > { %427 = sbr.rel (%p7628_p9) target bundleno = 4025 (0xfb9), region = 68  ;;  %s4186_s17 = sshll.u32 (!%p7628_p9), %s6468_s21, 6 }
  0x97   : > { %s430_s28 = scalar_lea.sflag (!%p7628_p9), [#allocation3], %s6468_s21  ;;  %s6474_s12 = scalar_lea.vmem (!%p7628_p9), [#allocation2], %s4186_s17 }
  0x9d   : > { %6136 = dma.done.wait (%p7629_p0), %s430_s28, 1024  }
  0x9e   : > { %6138 = vsyncadd (%p7629_p0), %s430_s28, 4294966272  ;;  %p7630_p11 = scmp.eq.s32.totalorder %s6272_s25, 0 }
  0xa0   : > { %6140 = dma.done.wait (%p7630_p11), [#allocation6], 8192   ;;  %p7631_p4 = pmov %p7630_p11 }
  0xa2   : > { %6142 = vsyncadd (%p7631_p4), [#allocation6], 4294959104  ;;  %p7632_p8 = pmov %p7631_p4 }
  0xa3   : > { %p7633_p6 = pmov %p7631_p4 }
  0xa4   : > { %6144 = dma.done.wait (%p7632_p8), [#allocation9], 16384  }
  0xa5   : > { %6146 = vsyncadd (%p7633_p6), [#allocation9], 4294950912  ;;  %v490_v0 = vld [vmem:[%s6474_s12] sm:$0xff]  ;;  %v492_v1 = vld [vmem:[%s6474_s12 + $0x10] sm:$0xff]  ;;  %vm918_vm0 = vcmask 261120   ;;  %vm1072_vm5 = vcmask 523264  }
  0xa6   : > { %500 = vadd.xlane.f32.xlu0 %v490_v0  ;;  %504 = vadd.xlane.f32.xlu1 %v492_v1  ;;  %v491_v2 = vld [vmem:[%s6474_s12 + $0x8] sm:$0xff]  ;;  %v493_v3 = vld [vmem:[%s6474_s12 + $0x18] sm:$0xff]  ;;  %v6493_v4 = vld [vmem:[%s6474_s12 + $0x20] sm:$0xff]  ;;  %s6180_s16 = smov 96   ;;  %s6181_s3 = smov 64  }
  0xa7   : > { %v6496_v5 = vld [vmem:[%s6474_s12 + $0x28] sm:$0xff]  ;;  %v6501_v6 = vld [vmem:[%s6474_s12 + $0x30] sm:$0xff]  ;;  %v6504_v7 = vld [vmem:[%s6474_s12 + $0x38] sm:$0xff]  ;;  %s6182_s14 = smov 32   ;;  %s7636_s11 = sld [smem:[#allocation19_spill]] }
  0xa8   : > { %v618_v8 = vld [vmem:[#allocation5 + $0x8] sm:$0xff]  ;;  %v621_v9 = vld [vmem:[#allocation5 + $0x20] sm:$0xff]  ;;  %v620_v12 = vld [vmem:[#allocation5 + $0x18] sm:$0xff]  ;;  %s7638_s13 = sld [smem:[#allocation21_spill]] }
  0xa9   : > { %v617_v10 = vld [vmem:[#allocation5] sm:$0xff]  ;;  %v5025_v11 = vpack.c.bf16 %v621_v9, %v618_v8  ;;  %v624_v13 = vld [vmem:[#allocation5 + $0x38] sm:$0xff]  ;;  %v627_v14 = vld [vmem:[#allocation5 + $0x50] sm:$0xff] }
  0xaa   : > { %502 = vadd.xlane.f32.xlu0 %v491_v2  ;;  %506 = vadd.xlane.f32.xlu1 %v493_v3  ;;  %v5027_v15 = vpack.c.bf16 %v620_v12, %v617_v10  ;;  %v5029_v16 = vpack.c.bf16 %v627_v14, %v624_v13  ;;  %v619_v17 = vld [vmem:[#allocation5 + $0x10] sm:$0xff]  ;;  %v622_v18 = vld [vmem:[#allocation5 + $0x28] sm:$0xff]  ;;  %v633_v23 = vld [vmem:[#allocation5 + $0x80] sm:$0xff] }
  0xab   : > { %v623_v19 = vld [vmem:[#allocation5 + $0x30] sm:$0xff]  ;;  %5026 = vmatprep.subr.bf16.mxu0 %v5025_v11  ;;  %v5057_v20 = vpack.c.bf16 %v622_v18, %v619_v17  ;;  %v626_v21 = vld [vmem:[#allocation5 + $0x48] sm:$0xff]  ;;  %v625_v25 = vld [vmem:[#allocation5 + $0x40] sm:$0xff] }
  0xac   : > { %v630_v22 = vld [vmem:[#allocation5 + $0x68] sm:$0xff]  ;;  %5028 = vmatpush1.bf16.msra.mxu0 %v5027_v15  ;;  %v5031_v24 = vpack.c.bf16 %v626_v21, %v623_v19  ;;  %v628_v26 = vld [vmem:[#allocation5 + $0x58] sm:$0xff]  ;;  %v629_v29 = vld [vmem:[#allocation5 + $0x60] sm:$0xff] }
  0xad   : > { %5030 = vmatprep.subr.bf16.mxu0 %v5029_v16  ;;  %5058 = vmatprep.subr.bf16.mxu1 %v5057_v20  ;;  %v5033_v27 = vpack.c.bf16 %v633_v23, %v630_v22  ;;  %v5061_v28 = vpack.c.bf16 %v628_v26, %v625_v25  ;;  %v632_v30 = vld [vmem:[#allocation5 + $0x78] sm:$0xff]  ;;  %v638_v8 = vld [vmem:[#allocation5 + $0xa8] sm:$0xff]  ;;  %v645_v10 = vld [vmem:[#allocation5 + $0xe0] sm:$0xff] }
  0xae   : > { %508 = vadd.xlane.f32.xlu0 %v6493_v4  ;;  %510 = vadd.xlane.f32.xlu1 %v6496_v5  ;;  %v5035_v31 = vpack.c.bf16 %v632_v30, %v629_v29  ;;  %v637_v11 = vld [vmem:[#allocation5 + $0xa0] sm:$0xff]  ;;  %v640_v13 = vld [vmem:[#allocation5 + $0xb8] sm:$0xff]  ;;  %v651_v19 = vld [vmem:[#allocation5 + $0x110] sm:$0xff] }
  0xaf   : > { %5060 = vmatpush3.bf16.msra.mxu1 %v5057_v20  ;;  %v641_v14 = vld [vmem:[#allocation5 + $0xc0] sm:$0xff]  ;;  %v644_v15 = vld [vmem:[#allocation5 + $0xd8] sm:$0xff]  ;;  %v5069_v16 = vpack.c.bf16 %v640_v13, %v637_v11  ;;  %v643_v20 = vld [vmem:[#allocation5 + $0xd0] sm:$0xff] }
  0xb0   : > { %5062 = vmatprep.subr.bf16.mxu1 %v5061_v28  ;;  %5032 = vmatpush1.bf16.msra.mxu0 %v5031_v24  ;;  %v5043_v17 = vpack.c.bf16 %v644_v15, %v641_v14  ;;  %v648_v18 = vld [vmem:[#allocation5 + $0xf8] sm:$0xff]  ;;  %v646_v22 = vld [vmem:[#allocation5 + $0xe8] sm:$0xff]  ;;  %v647_v23 = vld [vmem:[#allocation5 + $0xf0] sm:$0xff] }
  0xb1   : > { %5034 = vmatprep.subr.bf16.mxu0 %v5033_v27  ;;  %v5045_v21 = vpack.c.bf16 %v651_v19, %v648_v18  ;;  %v650_v24 = vld [vmem:[#allocation5 + $0x108] sm:$0xff]  ;;  %v5073_v25 = vpack.c.bf16 %v646_v22, %v643_v20  ;;  %v649_v29 = vld [vmem:[#allocation5 + $0x100] sm:$0xff]  ;;  %vm6572_vm1 = vmpackc.low %vm918_vm0, %vm918_vm0 }
  0xb2   : > { %512 = vadd.xlane.f32.xlu0 %v6501_v6  ;;  %514 = vadd.xlane.f32.xlu1 %v6504_v7  ;;  %v5047_v26 = vpack.c.bf16 %v650_v24, %v647_v23  ;;  %v654_v27 = vld [vmem:[#allocation5 + $0x128] sm:$0xff]  ;;  %v4192_v15 = vld [vmem:[%s7595_s1] ss:$0 sm:$0xff] }
  0xb3   : > { %5064 = vmatpush3.bf16.msra.mxu1 %v5061_v28  ;;  %v657_v28 = vld [vmem:[#allocation5 + $0x140] sm:$0xff] }
  0xb4   : > { %5036 = vmatpush1.bf16.msra.mxu0 %v5035_v31  ;;  %v5049_v30 = vpack.c.bf16 %v657_v28, %v654_v27  ;;  %v652_v31 = vld [vmem:[#allocation5 + $0x118] sm:$0xff]  ;;  %v4193_v19 = vld [vmem:[%s7596_s2] ss:$0 sm:$0xff] }
 0x133   : > { %v501_v32 = vpop.xlane.xlu0 %500  ;;  %v505_v33 = vpop.xlane.xlu1 %504 }
 0x134   : > { %v517_v34 = vmul.f32 0.0078125, %v501_v32  ;;  %v519_v35 = vmul.f32 0.0078125, %v505_v33  ;;  %v653_v32 = vld [vmem:[#allocation5 + $0x120] sm:$0xff]  ;;  %v656_v33 = vld [vmem:[#allocation5 + $0x138] sm:$0xff] }
 0x136   : > { %v6508_v36 = vsub.f32 %v490_v0, %v517_v34  ;;  %v6510_v37 = vsub.f32 %v492_v1, %v519_v35  ;;  %v636_v0 = vld [vmem:[#allocation5 + $0x98] sm:$0xff]  ;;  %v639_v1 = vld [vmem:[#allocation5 + $0xb0] sm:$0xff]  ;;  %v5077_v34 = vpack.c.bf16 %v652_v31, %v649_v29  ;;  %v5051_v35 = vpack.c.bf16 %v656_v33, %v653_v32 }
 0x137   : > { %v503_v38 = vpop.xlane.xlu0 %502  ;;  %v507_v39 = vpop.xlane.xlu1 %506 }
 0x138   : > { %v518_v40 = vmul.f32 0.0078125, %v503_v38  ;;  %v533_v41 = vmul.f32 %v6508_v36, %v6508_v36  ;;  %v520_v42 = vmul.f32 0.0078125, %v507_v39  ;;  %v535_v43 = vmul.f32 %v6510_v37, %v6510_v37  ;;  %v660_v38 = vld [vmem:[#allocation5 + $0x158] sm:$0xff]  ;;  %v663_v39 = vld [vmem:[#allocation5 + $0x170] sm:$0xff] }
 0x13a   : > { %541 = vadd.xlane.f32.xlu0 %v533_v41  ;;  %v6516_v44 = vsub.f32 %v491_v2, %v518_v40  ;;  %v6518_v45 = vsub.f32 %v493_v3, %v520_v42  ;;  %v631_v2 = vld [vmem:[#allocation5 + $0x70] sm:$0xff]  ;;  %v5037_v3 = vpack.c.bf16 %v639_v1, %v636_v0  ;;  %v5053_v41 = vpack.c.bf16 %v663_v39, %v660_v38  ;;  %v658_v42 = vld [vmem:[#allocation5 + $0x148] sm:$0xff] }
 0x13b   : > { %v509_v46 = vpop.xlane.xlu0 %508  ;;  %v511_v47 = vpop.xlane.xlu1 %510  ;;  %v655_v40 = vld [vmem:[#allocation5 + $0x130] sm:$0xff] }
 0x13c   : > { %v521_v48 = vmul.f32 0.0078125, %v509_v46  ;;  %v534_v49 = vmul.f32 %v6516_v44, %v6516_v44  ;;  %v522_v50 = vmul.f32 0.0078125, %v511_v47  ;;  %v536_v51 = vmul.f32 %v6518_v45, %v6518_v45  ;;  %5038 = vmatprep.subr.bf16.mxu0 %v5037_v3  ;;  %v662_v46 = vld [vmem:[#allocation5 + $0x168] sm:$0xff] }
 0x13d   : > { %v5081_v47 = vpack.c.bf16 %v658_v42, %v655_v40 }
 0x13e   : > { %545 = vadd.xlane.f32.xlu0 %v535_v43  ;;  %543 = vadd.xlane.f32.xlu1 %v534_v49  ;;  %v6525_v52 = vsub.f32 %v6493_v4, %v521_v48  ;;  %v6528_v53 = vsub.f32 %v6496_v5, %v522_v50  ;;  %v634_v4 = vld [vmem:[#allocation5 + $0x88] sm:$0xff]  ;;  %v635_v5 = vld [vmem:[#allocation5 + $0x90] sm:$0xff]  ;;  %v661_v49 = vld [vmem:[#allocation5 + $0x160] sm:$0xff] }
 0x13f   : > { %v513_v54 = vpop.xlane.xlu0 %512  ;;  %v515_v55 = vpop.xlane.xlu1 %514  ;;  %v5039_v9 = vpack.c.bf16 %v638_v8, %v635_v5  ;;  %v659_v43 = vld [vmem:[#allocation5 + $0x150] sm:$0xff]  ;;  %v664_v50 = vld [vmem:[#allocation5 + $0x178] sm:$0xff] }
 0x140   : > { %v523_v56 = vmul.f32 0.0078125, %v513_v54  ;;  %v537_v57 = vmul.f32 %v6525_v52, %v6525_v52  ;;  %v524_v58 = vmul.f32 0.0078125, %v515_v55  ;;  %v538_v59 = vmul.f32 %v6528_v53, %v6528_v53 }
 0x141   : > { %5040 = vmatpush1.bf16.msra.mxu0 %v5039_v9  ;;  %v5055_v48 = vpack.c.bf16 %v662_v46, %v659_v43  ;;  %v6178_v54 = vmov 0.0  }
 0x142   : > { %547 = vadd.xlane.f32.xlu1 %v536_v51  ;;  %549 = vadd.xlane.f32.xlu0 %v537_v57  ;;  %v6535_v60 = vsub.f32 %v6501_v6, %v523_v56  ;;  %v6538_v61 = vsub.f32 %v6504_v7, %v524_v58  ;;  %v5065_v6 = vpack.c.bf16 %v634_v4, %v631_v2  ;;  %v642_v7 = vld [vmem:[#allocation5 + $0xc8] sm:$0xff] }
 0x143   : > { %v5041_v12 = vpack.c.bf16 %v645_v10, %v642_v7  ;;  %v5085_v51 = vpack.c.bf16 %v664_v50, %v661_v49  ;;  %729 = vmatprep.mubr.f32.mxu0 %v6178_v54 }
 0x144   : > { %v539_v62 = vmul.f32 %v6535_v60, %v6535_v60  ;;  %v540_v63 = vmul.f32 %v6538_v61, %v6538_v61  ;;  %5066 = vmatprep.subr.bf16.mxu1 %v5065_v6 }
 0x145   : > { %5068 = vmatpush3.bf16.msra.mxu1 %v5065_v6  ;;  %5042 = vmatprep.subr.bf16.mxu0 %v5041_v12 }
 0x146   : > { %551 = vadd.xlane.f32.xlu1 %v538_v59  ;;  %553 = vadd.xlane.f32.xlu0 %v539_v62 }
 0x147   : > { %5070 = vmatprep.subr.bf16.mxu1 %v5069_v16  ;;  %5044 = vmatpush1.bf16.msra.mxu0 %v5043_v17 }
 0x148   : > { %5046 = vmatprep.subr.bf16.mxu0 %v5045_v21 }
 0x149   : > { %5072 = vmatpush3.bf16.msra.mxu1 %v5069_v16 }
 0x14a   : > { %555 = vadd.xlane.f32.xlu1 %v540_v63  ;;  %5074 = vmatprep.subr.bf16.mxu1 %v5073_v25 }
 0x14b   : > { %5048 = vmatpush1.bf16.msra.mxu0 %v5047_v26 }
 0x14c   : > { %5050 = vmatprep.subr.bf16.mxu0 %v5049_v30 }
 0x14d   : > { %5076 = vmatpush3.bf16.msra.mxu1 %v5073_v25 }
 0x14e   : > { %5078 = vmatprep.subr.bf16.mxu1 %v5077_v34 }
 0x14f   : > { %5052 = vmatpush1.bf16.msra.mxu0 %v5051_v35 }
 0x150   : > { %5054 = vmatprep.subr.bf16.mxu0 %v5053_v41 }
 0x151   : > { %5080 = vmatpush3.bf16.msra.mxu1 %v5077_v34 }
 0x152   : > { %5082 = vmatprep.subr.bf16.mxu1 %v5081_v47 }
 0x153   : > { %5056 = vmatpush1.bf16.msra.mxu0 %v5055_v48 }
 0x155   : > { %5084 = vmatpush3.bf16.msra.mxu1 %v5081_v47 }
 0x156   : > { %5086 = vmatprep.subr.bf16.mxu1 %v5085_v51 }
 0x159   : > { %5088 = vmatpush3.bf16.msra.mxu1 %v5085_v51 }
 0x1c7   : > { %v542_v55 = vpop.xlane.xlu0 %541 }
 0x1c8   : > { %v557_v56 = vmul.f32 0.0078125, %v542_v55 }
 0x1ca   : > { %v565_v57 = vadd.f32 1e-05, %v557_v56 }
 0x1cb   : > { %v544_v58 = vpop.xlane.xlu1 %543  ;;  %v546_v59 = vpop.xlane.xlu0 %545 }
 0x1cc   : > { %5653 = vrsqrt.f32 %v565_v57  ;;  %v558_v62 = vmul.f32 0.0078125, %v544_v58  ;;  %v559_v63 = vmul.f32 0.0078125, %v546_v59 }
 0x1ce   : > { %v566_v0 = vadd.f32 1e-05, %v558_v62  ;;  %v567_v1 = vadd.f32 1e-05, %v559_v63 }
 0x1cf   : > { %v548_v2 = vpop.xlane.xlu1 %547  ;;  %v550_v3 = vpop.xlane.xlu0 %549 }
 0x1d0   : > { %5655 = vrsqrt.f32 %v566_v0  ;;  %v560_v4 = vmul.f32 0.0078125, %v548_v2  ;;  %v561_v5 = vmul.f32 0.0078125, %v550_v3 }
 0x1d1   : > { %5657 = vrsqrt.f32 %v567_v1 }
 0x1d2   : > { %v568_v8 = vadd.f32 1e-05, %v560_v4  ;;  %v569_v6 = vadd.f32 1e-05, %v561_v5 }
 0x1d3   : > { %v552_v9 = vpop.xlane.xlu1 %551  ;;  %v554_v7 = vpop.xlane.xlu0 %553 }
 0x1d4   : > { %5659 = vrsqrt.f32 %v568_v8  ;;  %v562_v10 = vmul.f32 0.0078125, %v552_v9  ;;  %v563_v11 = vmul.f32 0.0078125, %v554_v7 }
 0x1d5   : > { %5661 = vrsqrt.f32 %v569_v6 }
 0x1d6   : > { %v5654_v12 = vpop.eup %5653  ;;  %v570_v13 = vadd.f32 1e-05, %v562_v10  ;;  %v571_v14 = vadd.f32 1e-05, %v563_v11 }
 0x1d7   : > { %v556_v16 = vpop.xlane.xlu1 %555  ;;  %v581_v17 = vmul.f32 %v5654_v12, %v6508_v36 }
 0x1d8   : > { %5663 = vrsqrt.f32 %v570_v13  ;;  %v564_v18 = vmul.f32 0.0078125, %v556_v16 }
 0x1d9   : > { %5665 = vrsqrt.f32 %v571_v14  ;;  %v595_v20 = vmul.f32 %v4192_v15, %v581_v17 }
 0x1da   : > { %v5656_v21 = vpop.eup %5655  ;;  %v572_v22 = vadd.f32 1e-05, %v564_v18 }
 0x1db   : > { %v5658_v23 = vpop.eup %5657  ;;  %v609_v24 = vadd.f32 %v4193_v19, %v595_v20  ;;  %v582_v25 = vmul.f32 %v5656_v21, %v6516_v44 }
 0x1dc   : > { %5667 = vrsqrt.f32 %v572_v22  ;;  %v583_v26 = vmul.f32 %v5658_v23, %v6510_v37 }
 0x1dd   : > { %730 = vmatmul.mubr.f32.vlgmr.msra.gmra.mrb[0].mxu0 %v609_v24  ;;  %4709 = vmatprep.mubr.f32.mxu1 %v609_v24  ;;  %v596_v36 = vmul.f32 %v4192_v15, %v582_v25 }
 0x1de   : > { %v5660_v27 = vpop.eup %5659  ;;  %735 = vmatprep.mubr.f32.mxu0 %v6178_v54  ;;  %v597_v28 = vmul.f32 %v4192_v15, %v583_v26 }
 0x1df   : > { %v5662_v29 = vpop.eup %5661  ;;  %v610_v30 = vadd.f32 %v4193_v19, %v596_v36  ;;  %v584_v31 = vmul.f32 %v5660_v27, %v6518_v45 }
 0x1e0   : > { %v611_v32 = vadd.f32 %v4193_v19, %v597_v28  ;;  %v585_v33 = vmul.f32 %v5662_v29, %v6525_v52 }
 0x1e1   : > { %736 = vmatmul.mubr.f32.gmra.mrb[2].mxu0 %v610_v30  ;;  %4710 = vmatmul.mubr.f32.vlgmr.msra.gmra.mrb[0].mxu1 %v610_v30  ;;  %v598_v44 = vmul.f32 %v4192_v15, %v584_v31 }
 0x1e2   : > { %v5664_v34 = vpop.eup %5663  ;;  %4712 = vmatprep.mubr.f32.mxu1 %v611_v32  ;;  %741 = vmatprep.mubr.f32.mxu0 %v6178_v54  ;;  %v599_v37 = vmul.f32 %v4192_v15, %v585_v33 }
 0x1e3   : > { %v5666_v35 = vpop.eup %5665  ;;  %v612_v38 = vadd.f32 %v4193_v19, %v598_v44  ;;  %v586_v39 = vmul.f32 %v5664_v34, %v6528_v53 }
 0x1e4   : > { %v613_v40 = vadd.f32 %v4193_v19, %v599_v37  ;;  %v587_v41 = vmul.f32 %v5666_v35, %v6535_v60  ;;  %v891_v37 = vlaneseq }
 0x1e5   : > { %742 = vmatmul.mubr.f32.gmra.mrb[4].mxu0 %v611_v32  ;;  %4713 = vmatmul.mubr.f32.gmra.mrb[2].mxu1 %v612_v38  ;;  %v600_v45 = vmul.f32 %v4192_v15, %v586_v39 }
 0x1e6   : > { %v5668_v42 = vpop.eup %5667  ;;  %4715 = vmatprep.mubr.f32.mxu1 %v613_v40  ;;  %747 = vmatprep.mubr.f32.mxu0 %v6178_v54  ;;  %v601_v52 = vmul.f32 %v4192_v15, %v587_v41  ;;  %v6636_v35 = vshrl.u32 %v891_v37, 7  ;;  %v901_v39 = vand.u32 127, %v891_v37 }
 0x1e7   : > { %v614_v43 = vadd.f32 %v4193_v19, %v600_v45  ;;  %v588_v46 = vmul.f32 %v5668_v42, %v6538_v61  ;;  %v6179_v45 = vmov -1e+30  }
 0x1e8   : > { %v615_v47 = vadd.f32 %v4193_v19, %v601_v52  ;;  %vm902_vm3 = vcmp.ge.s32.totalorder %v6636_v35, %v901_v39  ;;  %v894_v41 = vadd.s32 16, %v6636_v35 }
 0x1e9   : > { %748 = vmatmul.mubr.f32.gmra.mrb[6].mxu0 %v612_v38  ;;  %4716 = vmatmul.mubr.f32.gmra.mrb[4].mxu1 %v614_v43  ;;  %v602_v48 = vmul.f32 %v4192_v15, %v588_v46  ;;  %v893_v38 = vadd.s32 8, %v6636_v35  ;;  %v6644_v52 = vsel %vm902_vm3, 0.0, %v6179_v45 }
 0x1ea   : > { %4718 = vmatprep.mubr.f32.mxu1 %v615_v47  ;;  %753 = vmatprep.mubr.f32.mxu0 %v6178_v54  ;;  %vm904_vm6 = vcmp.ge.s32.totalorder %v894_v41, %v901_v39 }
 0x1eb   : > { %v616_v53 = vadd.f32 %v4193_v19, %v602_v48  ;;  %vm903_vm2 = vcmp.ge.s32.totalorder %v893_v38, %v901_v39 }
 0x1ec   : > { %v6642_v42 = vsel %vm903_vm2, 0.0, %v6179_v45 }
 0x1ed   : > { %754 = vmatmul.mubr.f32.gmra.mrb[8].mxu0 %v613_v40  ;;  %4719 = vmatmul.mubr.f32.gmra.mrb[6].mxu1 %v616_v53  ;;  %v895_v40 = vadd.s32 24, %v6636_v35 }
 0x1ee   : > { %759 = vmatprep.mubr.f32.mxu0 %v6178_v54 }
 0x1ef   : > { %vm905_vm4 = vcmp.ge.s32.totalorder %v895_v40, %v901_v39 }
 0x1f1   : > { %760 = vmatmul.mubr.f32.gmra.mrb[10].mxu0 %v614_v43  ;;  %v897_v43 = vadd.s32 40, %v6636_v35 }
 0x1f2   : > { %765 = vmatprep.mubr.f32.mxu0 %v6178_v54 }
 0x1f3   : > { %vm907_vm7 = vcmp.ge.s32.totalorder %v897_v43, %v901_v39 }
 0x1f5   : > { %766 = vmatmul.mubr.f32.gmra.mrb[12].mxu0 %v615_v47  ;;  %v896_v47 = vadd.s32 32, %v6636_v35 }
 0x1f6   : > { %771 = vmatprep.mubr.f32.mxu0 %v6178_v54 }
 0x1f7   : > { %vm906_vm8 = vcmp.ge.s32.totalorder %v896_v47, %v901_v39 }
 0x1f9   : > { %772 = vmatmul.mubr.f32.gmra.mrb[14].mxu0 %v616_v53 }
 0x2b0   : > { %v731_v60 = vpop.f32.mrb[0].mxu0 }
 0x2b1   : > { %v6566_v61 = vmul.f32 0.17677669, %v731_v60  ;;  %v733_v49 = vpop.f32.mrb[1].mxu0 }
 0x2b3   : > { %4737 = vmatprep.mubr.msk.f32.mxu0 %vm918_vm0, %v6566_v61 }
 0x2b4   : > { %v737_v50 = vpop.f32.mrb[2].mxu0  ;;  %v4711_v51 = vpop.f32.mrb[0].mxu1 }
 0x2b5   : > { %v739_v55 = vpop.f32.mrb[3].mxu0  ;;  %v844_v56 = vpop.f32.mrb[1].mxu1  ;;  %v6608_v29 = vmul.f32 0.17677669, %v737_v50 }
 0x2b6   : > { %v5089_v58 = vpack.c.bf16 %v739_v55, %v733_v49  ;;  %v6576_v59 = vpack.i.bf16 %v4711_v51, %v844_v56  ;;  %v5113_v62 = vpack.c.bf16 %v4711_v51, %v844_v56  ;;  %v6578_v63 = vpack.i.bf16 %v739_v55, %v733_v49 }
 0x2b7   : > { %v6650_v49 = vsel %vm905_vm4, 0.0, %v6179_v45  ;;  %v6653_v51 = vsel %vm904_vm6, 0.0, %v6179_v45  ;;  %v899_v55 = vadd.s32 56, %v6636_v35 }
 0x2b8   : > { %v743_v0 = vpop.f32.mrb[4].mxu0  ;;  %v4714_v1 = vpop.f32.mrb[2].mxu1  ;;  %5091 = vmatprep.subr.msk.bf16.mxu0 %vm6572_vm1, %v5089_v58  ;;  %5114 = vmatprep.subr.bf16.mxu1 %v5113_v62 }
 0x2b9   : > { %v745_v2 = vpop.f32.mrb[5].mxu0  ;;  %v854_v3 = vpop.f32.mrb[3].mxu1  ;;  %5094 = vmatpush3.bf16.xpose.msk.msra.mxu0 %vm6572_vm1, %v5089_v58  ;;  %5116 = vmatpush3.bf16.msra.mxu1 %v5113_v62  ;;  %v6610_v30 = vmul.f32 0.17677669, %v743_v0  ;;  %v898_v62 = vadd.s32 48, %v6636_v35  ;;  %vm909_vm9 = vcmp.ge.s32.totalorder %v899_v55, %v901_v39 }
 0x2ba   : > { %v6584_v4 = vpack.i.bf16 %v4714_v1, %v854_v3  ;;  %v5117_v5 = vpack.c.bf16 %v4714_v1, %v854_v3  ;;  %v6660_v3 = vsel %vm907_vm7, 0.0, %v6179_v45 }
 0x2bb   : > { %vm908_vm10 = vcmp.ge.s32.totalorder %v898_v62, %v901_v39 }
 0x2bc   : > { %v749_v8 = vpop.f32.mrb[6].mxu0  ;;  %v4717_v6 = vpop.f32.mrb[4].mxu1  ;;  %5118 = vmatprep.subr.bf16.mxu1 %v5117_v5 }
 0x2bd   : > { %v751_v9 = vpop.f32.mrb[7].mxu0  ;;  %v864_v7 = vpop.f32.mrb[5].mxu1  ;;  %5120 = vmatpush3.bf16.msra.mxu1 %v5117_v5  ;;  %v6616_v31 = vmul.f32 0.17677669, %v749_v8  ;;  %v6663_v8 = vsel %vm906_vm8, 0.0, %v6179_v45 }
 0x2be   : > { %v5095_v10 = vpack.c.bf16 %v751_v9, %v745_v2  ;;  %v6586_v11 = vpack.i.bf16 %v4717_v6, %v864_v7  ;;  %v5121_v12 = vpack.c.bf16 %v4717_v6, %v864_v7  ;;  %v6588_v13 = vpack.i.bf16 %v751_v9, %v745_v2 }
 0x2c0   : > { %v755_v14 = vpop.f32.mrb[8].mxu0  ;;  %v4720_v15 = vpop.f32.mrb[6].mxu1  ;;  %5097 = vmatprep.subr.msk.bf16.mxu0 %vm6572_vm1, %v5095_v10  ;;  %5122 = vmatprep.subr.bf16.mxu1 %v5121_v12 }
 0x2c1   : > { %v757_v16 = vpop.f32.mrb[9].mxu0  ;;  %v874_v17 = vpop.f32.mrb[7].mxu1  ;;  %5100 = vmatpush3.bf16.xpose.msk.msra.mxu0 %vm6572_vm1, %v5095_v10  ;;  %5124 = vmatpush3.bf16.msra.mxu1 %v5121_v12  ;;  %v6618_v32 = vmul.f32 0.17677669, %v755_v14  ;;  %v6668_v14 = vsel %vm909_vm9, 0.0, %v6179_v45 }
 0x2c2   : > { %v6594_v18 = vpack.i.bf16 %v4720_v15, %v874_v17  ;;  %v5125_v19 = vpack.c.bf16 %v4720_v15, %v874_v17 }
 0x2c4   : > { %v761_v20 = vpop.f32.mrb[10].mxu0  ;;  %5126 = vmatprep.subr.bf16.mxu1 %v5125_v19 }
 0x2c5   : > { %v763_v21 = vpop.f32.mrb[11].mxu0  ;;  %5128 = vmatpush3.bf16.msra.mxu1 %v5125_v19  ;;  %v6624_v33 = vmul.f32 0.17677669, %v761_v20 }
 0x2c6   : > { %v5101_v22 = vpack.c.bf16 %v763_v21, %v757_v16  ;;  %v6596_v23 = vpack.i.bf16 %v763_v21, %v757_v16  ;;  %v6671_v16 = vsel %vm908_vm10, 0.0, %v6179_v45 }
 0x2c8   : > { %v767_v24 = vpop.f32.mrb[12].mxu0  ;;  %5103 = vmatprep.subr.msk.bf16.mxu0 %vm6572_vm1, %v5101_v22 }
 0x2c9   : > { %v769_v25 = vpop.f32.mrb[13].mxu0  ;;  %5106 = vmatpush3.bf16.xpose.msk.msra.mxu0 %vm6572_vm1, %v5101_v22  ;;  %v6626_v44 = vmul.f32 0.17677669, %v767_v24 }
 0x2cc   : > { %v773_v26 = vpop.f32.mrb[14].mxu0 }
 0x2cd   : > { %v775_v36 = vpop.f32.mrb[15].mxu0  ;;  %v6632_v34 = vmul.f32 0.17677669, %v773_v26 }
 0x2ce   : > { %v5107_v27 = vpack.c.bf16 %v775_v36, %v769_v25  ;;  %v6602_v28 = vpack.i.bf16 %v775_v36, %v769_v25 }
 0x2d0   : > { %5109 = vmatprep.subr.msk.bf16.mxu0 %vm6572_vm1, %v5107_v27 }
 0x2d1   : > { %5112 = vmatpush3.bf16.xpose.msk.msra.mxu0 %vm6572_vm1, %v5107_v27 }
 0x2d8   : > { %4738 = vmatmul.mubr.msk.f32.vlgmr.msra.gmra.mrb[16].mxu0 %vm918_vm0, %v6608_v29 }
 0x2d9   : > { %4740 = vmatprep.mubr.msk.f32.mxu0 %vm918_vm0, %v6610_v30 }
 0x2dc   : > { %4741 = vmatmul.mubr.msk.f32.gmra.mrb[18].mxu0 %vm918_vm0, %v6616_v31 }
 0x2dd   : > { %4743 = vmatprep.mubr.msk.f32.mxu0 %vm918_vm0, %v6618_v32 }
 0x2e0   : > { %4744 = vmatmul.mubr.msk.f32.gmra.mrb[20].mxu0 %vm918_vm0, %v6624_v33 }
 0x2e1   : > { %4746 = vmatprep.mubr.msk.f32.mxu0 %vm918_vm0, %v6626_v44 }
 0x2e4   : > { %4747 = vmatmul.mubr.msk.f32.gmra.mrb[22].mxu0 %vm918_vm0, %v6632_v34 }
 0x3ab   : > { %v4739_v46 = vpop.f32.mrb[16].mxu0 }
 0x3ac   : > { %v1039_v48 = vadd.f32 %v4739_v46, %v6642_v42  ;;  %v1033_v53 = vpop.f32.mrb[17].mxu0 }
 0x3ad   : > { %v1034_v60 = vadd.f32 %v1033_v53, %v6644_v52 }
 0x3ae   : > { %v1076_v50 = vsel %vm1072_vm5, %v1039_v48, -inf }
 0x3af   : > { %1077 = vmax.xlane.f32.xlu1 %v1076_v50  ;;  %v4742_v56 = vpop.f32.mrb[18].mxu0  ;;  %v1073_v58 = vsel %vm1072_vm5, %v1034_v60, -inf }
 0x3b0   : > { %v1049_v0 = vadd.f32 %v4742_v56, %v6650_v49  ;;  %v1043_v1 = vpop.f32.mrb[19].mxu0  ;;  %1074 = vmax.xlane.f32.xlu0 %v1073_v58 }
 0x3b1   : > { %v1044_v2 = vadd.f32 %v1043_v1, %v6653_v51 }
 0x3b2   : > { %v1082_v5 = vsel %vm1072_vm5, %v1049_v0, -inf }
 0x3b3   : > { %1083 = vmax.xlane.f32.xlu1 %v1082_v5  ;;  %v4745_v6 = vpop.f32.mrb[20].mxu0  ;;  %v1079_v9 = vsel %vm1072_vm5, %v1044_v2, -inf }
 0x3b4   : > { %v1059_v7 = vadd.f32 %v4745_v6, %v6660_v3  ;;  %v1053_v10 = vpop.f32.mrb[21].mxu0  ;;  %1080 = vmax.xlane.f32.xlu0 %v1079_v9 }
 0x3b5   : > { %v1054_v12 = vadd.f32 %v1053_v10, %v6663_v8 }
 0x3b6   : > { %v1088_v15 = vsel %vm1072_vm5, %v1059_v7, -inf }
 0x3b7   : > { %1089 = vmax.xlane.f32.xlu1 %v1088_v15  ;;  %v4748_v17 = vpop.f32.mrb[22].mxu0  ;;  %v1085_v19 = vsel %vm1072_vm5, %v1054_v12, -inf }
 0x3b8   : > { %v1069_v20 = vadd.f32 %v4748_v17, %v6668_v14  ;;  %v1063_v21 = vpop.f32.mrb[23].mxu0  ;;  %1086 = vmax.xlane.f32.xlu0 %v1085_v19 }
 0x3b9   : > { %v1064_v22 = vadd.f32 %v1063_v21, %v6671_v16 }
 0x3ba   : > { %v1094_v24 = vsel %vm1072_vm5, %v1069_v20, -inf }
 0x3bb   : > { %1095 = vmax.xlane.f32.xlu1 %v1094_v24  ;;  %v1091_v25 = vsel %vm1072_vm5, %v1064_v22, -inf }
 0x3bc   : > { %1092 = vmax.xlane.f32.xlu0 %v1091_v25 }
 0x43c   : > { %v1078_v26 = vpop.xlane.xlu1 %1077 }
 0x43d   : > { %v1098_v36 = vsub.f32 %v1039_v48, %v1078_v26  ;;  %v1075_v27 = vpop.xlane.xlu0 %1074 }
 0x43e   : > { %v1097_v37 = vsub.f32 %v1034_v60, %v1075_v27 }
 0x43f   : > { %v1107_v38 = vmul.f32 1.442695, %v1098_v36 }
 0x440   : > { %v1105_v39 = vmul.f32 1.442695, %v1097_v37  ;;  %v1084_v46 = vpop.xlane.xlu1 %1083 }
 0x441   : > { %5669 = vpow2.f32 %v1107_v38  ;;  %v1081_v47 = vpop.xlane.xlu0 %1080  ;;  %v1100_v48 = vsub.f32 %v1049_v0, %v1084_v46 }
 0x442   : > { %5671 = vpow2.f32 %v1105_v39  ;;  %v1099_v53 = vsub.f32 %v1044_v2, %v1081_v47 }
 0x443   : > { %v1111_v55 = vmul.f32 1.442695, %v1100_v48 }
 0x444   : > { %v1090_v60 = vpop.xlane.xlu1 %1089  ;;  %v1109_v58 = vmul.f32 1.442695, %v1099_v53 }
 0x445   : > { %v1087_v50 = vpop.xlane.xlu0 %1086  ;;  %v1102_v56 = vsub.f32 %v1059_v7, %v1090_v60  ;;  %5673 = vpow2.f32 %v1111_v55 }
 0x446   : > { %v1101_v62 = vsub.f32 %v1054_v12, %v1087_v50  ;;  %5675 = vpow2.f32 %v1109_v58 }
 0x447   : > { %v1115_v1 = vmul.f32 1.442695, %v1102_v56 }
 0x448   : > { %v1113_v5 = vmul.f32 1.442695, %v1101_v62  ;;  %v1096_v17 = vpop.xlane.xlu1 %1095 }
 0x449   : > { %5677 = vpow2.f32 %v1115_v1  ;;  %v1104_v19 = vsub.f32 %v1069_v20, %v1096_v17  ;;  %v1093_v21 = vpop.xlane.xlu0 %1092 }
 0x44a   : > { %5679 = vpow2.f32 %v1113_v5  ;;  %v1103_v25 = vsub.f32 %v1064_v22, %v1093_v21 }
 0x44b   : > { %v6678_v40 = vpop.eup %5669  ;;  %v1119_v24 = vmul.f32 1.442695, %v1104_v19 }
 0x44c   : > { %v6680_v41 = vpop.eup %5671  ;;  %v1124_v45 = vsel %vm1072_vm5, %v6678_v40, 0.0  ;;  %v1117_v26 = vmul.f32 1.442695, %v1103_v25 }
 0x44d   : > { %1125 = vadd.xlane.f32.xlu1 %v1124_v45  ;;  %v1121_v43 = vsel %vm1072_vm5, %v6680_v41, 0.0  ;;  %5681 = vpow2.f32 %v1119_v24 }
 0x44e   : > { %1122 = vadd.xlane.f32.xlu0 %v1121_v43  ;;  %5683 = vpow2.f32 %v1117_v26 }
 0x44f   : > { %v6690_v6 = vpop.eup %5673 }
 0x450   : > { %v6692_v9 = vpop.eup %5675  ;;  %v1130_v0 = vsel %vm1072_vm5, %v6690_v6, 0.0 }
 0x451   : > { %v1127_v7 = vsel %vm1072_vm5, %v6692_v9, 0.0 }
 0x453   : > { %v6696_v2 = vpop.eup %5677 }
 0x454   : > { %v6700_v10 = vpop.eup %5679  ;;  %v1136_v12 = vsel %vm1072_vm5, %v6696_v2, 0.0 }
 0x455   : > { %v1133_v15 = vsel %vm1072_vm5, %v6700_v10, 0.0 }
 0x457   : > { %v6718_v36 = vpop.eup %5681 }
 0x458   : > { %v1142_v20 = vsel %vm1072_vm5, %v6718_v36, 0.0  ;;  %v6722_v27 = vpop.eup %5683 }
 0x459   : > { %v1139_v22 = vsel %vm1072_vm5, %v6722_v27, 0.0 }
 0x45e   : > { %5539 = vrot.lane.b32.xlu1 %v6588_v13, %s6180_s16 }
 0x464   : > { %5534 = vrot.lane.b32.xlu0 %v6578_v63, %s6180_s16 }
 0x482   : > { %1131 = vadd.xlane.f32.xlu1 %v1130_v0 }
 0x483   : > { %1128 = vadd.xlane.f32.xlu0 %v1127_v7 }
 0x486   : > { %1137 = vadd.xlane.f32.xlu1 %v1136_v12 }
 0x487   : > { %1134 = vadd.xlane.f32.xlu0 %v1133_v15 }
 0x497   : > { %5549 = vrot.lane.b32.xlu1 %v6602_v28, %s6180_s16 }
 0x49d   : > { %5544 = vrot.lane.b32.xlu0 %v6596_v23, %s6180_s16 }
 0x4a1   : > { %1294 = vrot.lane.b32.xlu0 %v6566_v61, %s6180_s16 }
 0x4a5   : > { %1298 = vrot.lane.b32.xlu0 %v6610_v30, %s6180_s16 }
 0x4a9   : > { %1302 = vrot.lane.b32.xlu0 %v6618_v32, %s6180_s16 }
 0x4ad   : > { %1306 = vrot.lane.b32.xlu0 %v6626_v44, %s6180_s16 }
 0x4bb   : > { %1143 = vadd.xlane.f32.xlu1 %v1142_v20 }
 0x4bf   : > { %1140 = vadd.xlane.f32.xlu1 %v1139_v22 }
 0x4d0   : > { %1296 = vrot.lane.b32.xlu1 %v6608_v29, %s6180_s16 }
 0x4d4   : > { %1300 = vrot.lane.b32.xlu1 %v6616_v31, %s6180_s16 }
 0x4d8   : > { %1304 = vrot.lane.b32.xlu1 %v6624_v33, %s6180_s16 }
 0x4da   : > { %v1126_v37 = vpop.xlane.xlu1 %1125 }
 0x4db   : > { %5685 = vrcp.f32 %v1126_v37  ;;  %v1123_v38 = vpop.xlane.xlu0 %1122 }
 0x4dc   : > { %5687 = vrcp.f32 %v1123_v38  ;;  %1308 = vrot.lane.b32.xlu1 %v6632_v34, %s6180_s16 }
 0x4de   : > { %v5540_v47 = vpop.permute.xlu1 %5539 }
 0x4df   : > { %v5535_v39 = vpop.permute.xlu0 %5534  ;;  %v5542_v60 = vunpack.i.h.bf16 %v5540_v47  ;;  %v5541_v50 = vunpack.i.l.bf16 %v5540_v47 }
 0x4e0   : > { %v5537_v45 = vunpack.i.h.bf16 %v5535_v39  ;;  %v5536_v43 = vunpack.i.l.bf16 %v5535_v39 }
 0x4e1   : > { %v5135_v58 = vpack.c.bf16 %v5542_v60, %v5541_v50 }
 0x4e2   : > { %v5129_v46 = vpack.c.bf16 %v5537_v45, %v5536_v43 }
 0x4e4   : > { %5131 = vmatprep.subr.msk.bf16.mxu1 %vm6572_vm1, %v5129_v46 }
 0x4e5   : > { %v5686_v48 = vpop.eup %5685 }
 0x4e6   : > { %v5688_v53 = vpop.eup %5687  ;;  %v1154_v56 = vmul.f32 %v5686_v48, %v6678_v40 }
 0x4e7   : > { %v1153_v55 = vmul.f32 %v5688_v53, %v6680_v41 }
 0x4e9   : > { %4765 = vmatprep.mubr.msk.f32.mxu1 %vm1072_vm5, %v1153_v55 }
 0x4ea   : > { %4766 = vmatmul.mubr.msk.f32.vlgmr.msra.gmra.mrb[8].mxu1 %vm1072_vm5, %v1154_v56 }
 0x4eb   : > { %5134 = vmatpush3.bf16.xpose.msk.msra.mxu1 %vm6572_vm1, %v5129_v46 }
 0x4ec   : > { %5137 = vmatprep.subr.msk.bf16.mxu1 %vm6572_vm1, %v5135_v58 }
 0x4f3   : > { %5140 = vmatpush3.bf16.xpose.msk.msra.mxu1 %vm6572_vm1, %v5135_v58 }
 0x50f   : > { %v1132_v62 = vpop.xlane.xlu1 %1131 }
 0x510   : > { %5689 = vrcp.f32 %v1132_v62  ;;  %v1129_v1 = vpop.xlane.xlu0 %1128 }
 0x511   : > { %5691 = vrcp.f32 %v1129_v1 }
 0x513   : > { %v1138_v41 = vpop.xlane.xlu1 %1137 }
 0x514   : > { %5693 = vrcp.f32 %v1138_v41  ;;  %v1135_v40 = vpop.xlane.xlu0 %1134 }
 0x515   : > { %5695 = vrcp.f32 %v1135_v40 }
 0x517   : > { %v5550_v5 = vpop.permute.xlu1 %5549 }
 0x518   : > { %v5545_v0 = vpop.permute.xlu0 %5544  ;;  %v5552_v7 = vunpack.i.h.bf16 %v5550_v5  ;;  %v5551_v12 = vunpack.i.l.bf16 %v5550_v5 }
 0x519   : > { %v5547_v15 = vunpack.i.h.bf16 %v5545_v0  ;;  %v5546_v17 = vunpack.i.l.bf16 %v5545_v0 }
 0x51a   : > { %v5690_v19 = vpop.eup %5689  ;;  %v5147_v26 = vpack.c.bf16 %v5552_v7, %v5551_v12 }
 0x51b   : > { %v5692_v21 = vpop.eup %5691  ;;  %v5141_v24 = vpack.c.bf16 %v5547_v15, %v5546_v17  ;;  %v1156_v20 = vmul.f32 %v5690_v19, %v6690_v6 }
 0x51c   : > { %v1155_v25 = vmul.f32 %v5692_v21, %v6692_v9  ;;  %v1295_v45 = vpop.permute.xlu0 %1294 }
 0x51d   : > { %5143 = vmatprep.subr.msk.bf16.mxu1 %vm6572_vm1, %v5141_v24 }
 0x51e   : > { %v5694_v22 = vpop.eup %5693  ;;  %4768 = vmatprep.mubr.msk.f32.mxu1 %vm1072_vm5, %v1155_v25  ;;  %5146 = vmatpush3.bf16.xpose.msk.msra.mxu1 %vm6572_vm1, %v5141_v24 }
 0x51f   : > { %v5696_v37 = vpop.eup %5695  ;;  %4769 = vmatmul.mubr.msk.f32.gmra.mrb[10].mxu1 %vm1072_vm5, %v1156_v20  ;;  %5149 = vmatprep.subr.msk.bf16.mxu1 %vm6572_vm1, %v5147_v26  ;;  %v1158_v38 = vmul.f32 %v5694_v22, %v6696_v2 }
 0x520   : > { %v1157_v9 = vmul.f32 %v5696_v37, %v6700_v10  ;;  %v1299_v2 = vpop.permute.xlu0 %1298 }
 0x522   : > { %4771 = vmatprep.mubr.msk.f32.mxu1 %vm1072_vm5, %v1157_v9 }
 0x523   : > { %4772 = vmatmul.mubr.msk.f32.gmra.mrb[12].mxu1 %vm1072_vm5, %v1158_v38 }
 0x524   : > { %v1303_v60 = vpop.permute.xlu0 %1302 }
 0x526   : > { %5152 = vmatpush3.bf16.xpose.msk.msra.mxu1 %vm6572_vm1, %v5147_v26 }
 0x548   : > { %v1144_v6 = vpop.xlane.xlu1 %1143 }
 0x549   : > { %5697 = vrcp.f32 %v1144_v6 }
 0x54c   : > { %v1141_v39 = vpop.xlane.xlu1 %1140 }
 0x54d   : > { %5699 = vrcp.f32 %v1141_v39 }
 0x550   : > { %v1297_v47 = vpop.permute.xlu1 %1296 }
 0x553   : > { %v5698_v43 = vpop.eup %5697 }
 0x554   : > { %v1160_v10 = vmul.f32 %v5698_v43, %v6718_v36  ;;  %v1301_v53 = vpop.permute.xlu1 %1300 }
 0x557   : > { %v5700_v46 = vpop.eup %5699 }
 0x558   : > { %v1159_v48 = vmul.f32 %v5700_v46, %v6722_v27  ;;  %v1305_v50 = vpop.permute.xlu1 %1304  ;;  %v1307_v27 = vpop.permute.xlu0 %1306 }
 0x55a   : > { %4774 = vmatprep.mubr.msk.f32.mxu1 %vm1072_vm5, %v1159_v48 }
 0x55b   : > { %4775 = vmatmul.mubr.msk.f32.gmra.mrb[14].mxu1 %vm1072_vm5, %v1160_v10 }
 0x55c   : > { %4793 = vmatprep.mubr.msk.f32.mxu1 %vm918_vm0, %v1295_v45  ;;  %v1309_v36 = vpop.permute.xlu1 %1308 }
 0x55f   : > { %4794 = vmatmul.mubr.msk.f32.vlgmr.msra.gmra.mrb[16].mxu1 %vm918_vm0, %v1297_v47 }
 0x560   : > { %4796 = vmatprep.mubr.msk.f32.mxu1 %vm918_vm0, %v1299_v2 }
 0x563   : > { %4797 = vmatmul.mubr.msk.f32.gmra.mrb[18].mxu1 %vm918_vm0, %v1301_v53 }
 0x564   : > { %4799 = vmatprep.mubr.msk.f32.mxu1 %vm918_vm0, %v1303_v60 }
 0x567   : > { %4800 = vmatmul.mubr.msk.f32.gmra.mrb[20].mxu1 %vm918_vm0, %v1305_v50 }
 0x568   : > { %4802 = vmatprep.mubr.msk.f32.mxu1 %vm918_vm0, %v1307_v27 }
 0x56b   : > { %4803 = vmatmul.mubr.msk.f32.gmra.mrb[22].mxu1 %vm918_vm0, %v1309_v36 }
 0x5bd   : > { %v6774_v55 = vpop.f32.mrb[8].mxu1 }
 0x5be   : > { %v6776_v56 = vpop.f32.mrb[9].mxu1 }
 0x5f2   : > { %v6778_v58 = vpop.f32.mrb[10].mxu1 }
 0x5f3   : > { %v6780_v62 = vpop.f32.mrb[11].mxu1 }
 0x5f6   : > { %v6782_v1 = vpop.f32.mrb[12].mxu1 }
 0x5f7   : > { %v6784_v41 = vpop.f32.mrb[13].mxu1 }
 0x62e   : > { %v6786_v40 = vpop.f32.mrb[14].mxu1 }
 0x62f   : > { %v6788_v5 = vpop.f32.mrb[15].mxu1 }
 0x632   : > { %v4795_v0 = vpop.f32.mrb[16].mxu1 }
 0x633   : > { %v1430_v7 = vadd.f32 %v4795_v0, %v6642_v42  ;;  %v1424_v12 = vpop.f32.mrb[17].mxu1 }
 0x634   : > { %v1425_v15 = vadd.f32 %v1424_v12, %v6644_v52 }
 0x635   : > { %v1466_v17 = vsel %vm1072_vm5, %v1430_v7, -inf }
 0x636   : > { %1467 = vmax.xlane.f32.xlu1 %v1466_v17  ;;  %v4798_v19 = vpop.f32.mrb[18].mxu1  ;;  %v1463_v21 = vsel %vm1072_vm5, %v1425_v15, -inf }
 0x637   : > { %v1440_v24 = vadd.f32 %v4798_v19, %v6650_v49  ;;  %v1434_v25 = vpop.f32.mrb[19].mxu1  ;;  %1464 = vmax.xlane.f32.xlu0 %v1463_v21 }
 0x638   : > { %v1435_v20 = vadd.f32 %v1434_v25, %v6653_v51 }
 0x639   : > { %v1472_v26 = vsel %vm1072_vm5, %v1440_v24, -inf }
 0x63a   : > { %v4801_v22 = vpop.f32.mrb[20].mxu1  ;;  %v1469_v45 = vsel %vm1072_vm5, %v1435_v20, -inf }
 0x63b   : > { %v1450_v37 = vadd.f32 %v4801_v22, %v6660_v3  ;;  %v1444_v9 = vpop.f32.mrb[21].mxu1  ;;  %1473 = vmax.xlane.f32.xlu0 %v1472_v26 }
 0x63c   : > { %v1445_v6 = vadd.f32 %v1444_v9, %v6663_v8 }
 0x63d   : > { %v1478_v38 = vsel %vm1072_vm5, %v1450_v37, -inf }
 0x63e   : > { %1479 = vmax.xlane.f32.xlu1 %v1478_v38  ;;  %v4804_v39 = vpop.f32.mrb[22].mxu1  ;;  %v1475_v10 = vsel %vm1072_vm5, %v1445_v6, -inf }
 0x63f   : > { %v6802_v43 = vadd.f32 %v4804_v39, %v6668_v14  ;;  %v1454_v46 = vpop.f32.mrb[23].mxu1  ;;  %1470 = vmax.xlane.f32.xlu0 %v1469_v45 }
 0x640   : > { %v6807_v48 = vadd.f32 %v1454_v46, %v6671_v16 }
 0x641   : > { %v1484_v47 = vsel %vm1072_vm5, %v6802_v43, -inf }
 0x642   : > { %1485 = vmax.xlane.f32.xlu1 %v1484_v47  ;;  %v1481_v2 = vsel %vm1072_vm5, %v6807_v48, -inf }
 0x643   : > { %1476 = vmax.xlane.f32.xlu0 %v1475_v10 }
 0x647   : > { %1482 = vmax.xlane.f32.xlu0 %v1481_v2 }
 0x653   : > { %5559 = vrot.lane.b32.xlu1 %v6584_v4, %s6180_s16 }
 0x657   : > { %5564 = vrot.lane.b32.xlu1 %v6586_v11, %s6180_s16 }
 0x65b   : > { %5569 = vrot.lane.b32.xlu1 %v6594_v18, %s6180_s16 }
 0x65d   : > { %5554 = vrot.lane.b32.xlu0 %v6576_v59, %s6180_s16 }
 0x65f   : > { %5579 = vrot.lane.b32.xlu1 %v6588_v13, %s6181_s3 }
 0x661   : > { %5574 = vrot.lane.b32.xlu0 %v6578_v63, %s6181_s3 }
 0x6c3   : > { %v1468_v53 = vpop.xlane.xlu1 %1467 }
 0x6c4   : > { %v1488_v60 = vsub.f32 %v1430_v7, %v1468_v53  ;;  %v1465_v50 = vpop.xlane.xlu0 %1464 }
 0x6c5   : > { %v1487_v27 = vsub.f32 %v1425_v15, %v1465_v50 }
 0x6c6   : > { %v1497_v36 = vmul.f32 1.442695, %v1488_v60 }
 0x6c7   : > { %v1495_v0 = vmul.f32 1.442695, %v1487_v27 }
 0x6c8   : > { %5701 = vpow2.f32 %v1497_v36  ;;  %v1474_v12 = vpop.xlane.xlu0 %1473 }
 0x6c9   : > { %5703 = vpow2.f32 %v1495_v0  ;;  %v1490_v17 = vsub.f32 %v1440_v24, %v1474_v12 }
 0x6cb   : > { %v1501_v19 = vmul.f32 1.442695, %v1490_v17  ;;  %v1480_v21 = vpop.xlane.xlu1 %1479 }
 0x6cc   : > { %v1492_v25 = vsub.f32 %v1450_v37, %v1480_v21  ;;  %v1471_v26 = vpop.xlane.xlu0 %1470 }
 0x6cd   : > { %5705 = vpow2.f32 %v1501_v19  ;;  %v1489_v22 = vsub.f32 %v1435_v20, %v1471_v26 }
 0x6ce   : > { %v1505_v9 = vmul.f32 1.442695, %v1492_v25 }
 0x6cf   : > { %v1499_v38 = vmul.f32 1.442695, %v1489_v22  ;;  %v1486_v39 = vpop.xlane.xlu1 %1485 }
 0x6d0   : > { %v1477_v45 = vpop.xlane.xlu0 %1476 }
 0x6d1   : > { %5707 = vpow2.f32 %v1499_v38  ;;  %v1491_v7 = vsub.f32 %v1445_v6, %v1477_v45 }
 0x6d2   : > { %v6824_v46 = vpop.eup %5701  ;;  %5709 = vpow2.f32 %v1505_v9 }
 0x6d3   : > { %v6826_v15 = vpop.eup %5703  ;;  %v1503_v47 = vmul.f32 1.442695, %v1491_v7  ;;  %v5560_v10 = vpop.permute.xlu1 %5559  ;;  %v1514_v24 = vsel %vm1072_vm5, %v6824_v46, 0.0 }
 0x6d4   : > { %1515 = vadd.xlane.f32.xlu1 %v1514_v24  ;;  %v1483_v37 = vpop.xlane.xlu0 %1482  ;;  %v1511_v20 = vsel %vm1072_vm5, %v6826_v15, 0.0  ;;  %v5562_v50 = vunpack.i.h.bf16 %v5560_v10  ;;  %v5561_v27 = vunpack.i.l.bf16 %v5560_v10 }
 0x6d5   : > { %1512 = vadd.xlane.f32.xlu0 %v1511_v20  ;;  %5711 = vpow2.f32 %v1503_v47 }
 0x6d6   : > { %v5157_v25 = vpack.c.bf16 %v5562_v50, %v5561_v27  ;;  %v1494_v27 = vsub.f32 %v6802_v43, %v1486_v39 }
 0x6d7   : > { %v6832_v2 = vpop.eup %5705  ;;  %v5565_v6 = vpop.permute.xlu1 %5564 }
 0x6d8   : > { %v5555_v53 = vpop.permute.xlu0 %5554  ;;  %v1520_v60 = vsel %vm1072_vm5, %v6832_v2, 0.0  ;;  %v5567_v26 = vunpack.i.h.bf16 %v5565_v6  ;;  %v5566_v22 = vunpack.i.l.bf16 %v5565_v6 }
 0x6d9   : > { %v5557_v36 = vunpack.i.h.bf16 %v5555_v53  ;;  %v5556_v0 = vunpack.i.l.bf16 %v5555_v53  ;;  %1521 = vadd.xlane.f32.xlu1 %v1520_v60 }
 0x6da   : > { %v5161_v7 = vpack.c.bf16 %v5567_v26, %v5566_v22 }
 0x6db   : > { %v6836_v12 = vpop.eup %5707  ;;  %v5153_v17 = vpack.c.bf16 %v5557_v36, %v5556_v0  ;;  %v5570_v9 = vpop.permute.xlu1 %5569  ;;  %v1509_v36 = vmul.f32 1.442695, %v1494_v27  ;;  %v1493_v0 = vsub.f32 %v6807_v48, %v1483_v37 }
 0x6dc   : > { %v1517_v19 = vsel %vm1072_vm5, %v6836_v12, 0.0  ;;  %v6840_v21 = vpop.eup %5709  ;;  %v5572_v47 = vunpack.i.h.bf16 %v5570_v9  ;;  %v5571_v10 = vunpack.i.l.bf16 %v5570_v9  ;;  %v5575_v24 = vpop.permute.xlu0 %5574 }
 0x6dd   : > { %1518 = vadd.xlane.f32.xlu0 %v1517_v19  ;;  %5154 = vmatprep.subr.bf16.mxu1 %v5153_v17  ;;  %v1526_v38 = vsel %vm1072_vm5, %v6840_v21, 0.0  ;;  %v5577_v53 = vunpack.i.h.bf16 %v5575_v24  ;;  %v5576_v60 = vunpack.i.l.bf16 %v5575_v24  ;;  %5713 = vpow2.f32 %v1509_v36 }
 0x6de   : > { %5156 = vmatpush3.bf16.msra.mxu1 %v5153_v17  ;;  %v5165_v6 = vpack.c.bf16 %v5572_v47, %v5571_v10  ;;  %v1507_v17 = vmul.f32 1.442695, %v1493_v0 }
 0x6df   : > { %5158 = vmatprep.subr.bf16.mxu1 %v5157_v25  ;;  %v6844_v45 = vpop.eup %5711  ;;  %v6848_v50 = vpack.c.bf16 %v5577_v53, %v5576_v60 }
 0x6e0   : > { %v1523_v20 = vsel %vm1072_vm5, %v6844_v45, 0.0  ;;  %5715 = vpow2.f32 %v1507_v17 }
 0x6e1   : > { %1527 = vadd.xlane.f32.xlu0 %v1526_v38 }
 0x6e2   : > { %5160 = vmatpush3.bf16.msra.mxu1 %v5157_v25 }
 0x6e3   : > { %5162 = vmatprep.subr.bf16.mxu1 %v5161_v7 }
 0x6e5   : > { %1524 = vadd.xlane.f32.xlu0 %v1523_v20 }
 0x6e6   : > { %5164 = vmatpush3.bf16.msra.mxu1 %v5161_v7 }
 0x6e7   : > { %5166 = vmatprep.subr.bf16.mxu1 %v5165_v6  ;;  %v6869_v19 = vpop.eup %5713 }
 0x6e8   : > { %v1532_v43 = vsel %vm1072_vm5, %v6869_v19, 0.0 }
 0x6ea   : > { %5589 = vrot.lane.b32.xlu1 %v6602_v28, %s6181_s3  ;;  %5168 = vmatpush3.bf16.msra.mxu1 %v5165_v6  ;;  %v6875_v48 = vpop.eup %5715 }
 0x6eb   : > { %5187 = vmatprep.subr.msk.bf16.mxu1 %vm6572_vm1, %v6848_v50  ;;  %v1529_v39 = vsel %vm1072_vm5, %v6875_v48, 0.0 }
 0x6ee   : > { %1976 = vrot.lane.b32.xlu1 %v6608_v29, %s6181_s3 }
 0x6fb   : > { %5584 = vrot.lane.b32.xlu0 %v6596_v23, %s6181_s3 }
 0x6ff   : > { %1974 = vrot.lane.b32.xlu0 %v6566_v61, %s6181_s3 }
 0x703   : > { %1978 = vrot.lane.b32.xlu0 %v6610_v30, %s6181_s3 }
 0x707   : > { %1982 = vrot.lane.b32.xlu0 %v6618_v32, %s6181_s3 }
 0x70b   : > { %1986 = vrot.lane.b32.xlu0 %v6626_v44, %s6181_s3 }
 0x70f   : > { %5594 = vrot.lane.b32.xlu0 %v6578_v63, %s6182_s14 }
 0x712   : > { %1533 = vadd.xlane.f32.xlu1 %v1532_v43 }
 0x713   : > { %5604 = vrot.lane.b32.xlu0 %v6596_v23, %s6182_s14 }
 0x716   : > { %1530 = vadd.xlane.f32.xlu1 %v1529_v39 }
 0x717   : > { %2525 = vrot.lane.b32.xlu0 %v6566_v61, %s6182_s14  ;;  %v5580_v61 = vpop.permute.xlu1 %5579 }
 0x718   : > { %v5582_v25 = vunpack.i.h.bf16 %v5580_v61  ;;  %v5581_v26 = vunpack.i.l.bf16 %v5580_v61 }
 0x71a   : > { %v5191_v7 = vpack.c.bf16 %v5582_v25, %v5581_v26 }
 0x71b   : > { %2529 = vrot.lane.b32.xlu0 %v6610_v30, %s6182_s14  ;;  %v1713_v30 = vld [vmem:[#allocation7 + $0x28] sm:$0xff] }
 0x71f   : > { %2533 = vrot.lane.b32.xlu0 %v6618_v32, %s6182_s14  ;;  %v1714_v32 = vld [vmem:[#allocation7 + $0x30] sm:$0xff] }
 0x723   : > { %2537 = vrot.lane.b32.xlu0 %v6626_v44, %s6182_s14  ;;  %v1715_v44 = vld [vmem:[#allocation7 + $0x38] sm:$0xff] }
 0x727   : > { %1980 = vrot.lane.b32.xlu1 %v6616_v31, %s6181_s3 }
 0x72b   : > { %1984 = vrot.lane.b32.xlu1 %v6624_v33, %s6181_s3 }
 0x72f   : > { %1988 = vrot.lane.b32.xlu1 %v6632_v34, %s6181_s3 }
 0x733   : > { %5599 = vrot.lane.b32.xlu1 %v6588_v13, %s6182_s14  ;;  %v1712_v13 = vld [vmem:[#allocation7 + $0x20] sm:$0xff] }
 0x737   : > { %5609 = vrot.lane.b32.xlu1 %v6602_v28, %s6182_s14  ;;  %v5169_v28 = vpack.c.bf16 %v1713_v30, %v1712_v13 }
 0x739   : > { %5170 = vmatprep.subr.bf16.mxu0 %v5169_v28 }
 0x73a   : > { %5172 = vmatpush3.bf16.msra.mxu0 %v5169_v28 }
 0x73b   : > { %2527 = vrot.lane.b32.xlu1 %v6608_v29, %s6182_s14  ;;  %v5173_v29 = vpack.c.bf16 %v1715_v44, %v1714_v32 }
 0x73d   : > { %5174 = vmatprep.subr.bf16.mxu0 %v5173_v29 }
 0x73e   : > { %5176 = vmatpush3.bf16.msra.mxu0 %v5173_v29 }
 0x73f   : > { %2531 = vrot.lane.b32.xlu1 %v6616_v31, %s6182_s14 }
 0x743   : > { %2535 = vrot.lane.b32.xlu1 %v6624_v33, %s6182_s14 }
 0x747   : > { %2539 = vrot.lane.b32.xlu1 %v6632_v34, %s6182_s14 }
 0x761   : > { %v1516_v63 = vpop.xlane.xlu1 %1515 }
 0x762   : > { %5717 = vrcp.f32 %v1516_v63  ;;  %v1513_v23 = vpop.xlane.xlu0 %1512 }
 0x763   : > { %5719 = vrcp.f32 %v1513_v23 }
 0x766   : > { %v1522_v31 = vpop.xlane.xlu1 %1521 }
 0x767   : > { %5721 = vrcp.f32 %v1522_v31 }
 0x76a   : > { %v1519_v33 = vpop.xlane.xlu0 %1518 }
 0x76b   : > { %5723 = vrcp.f32 %v1519_v33 }
 0x76c   : > { %v5718_v34 = vpop.eup %5717 }
 0x76d   : > { %v5720_v37 = vpop.eup %5719  ;;  %v1544_v38 = vmul.f32 %v5718_v34, %v6824_v46 }
 0x76e   : > { %v1528_v22 = vpop.xlane.xlu0 %1527  ;;  %v1543_v9 = vmul.f32 %v5720_v37, %v6826_v15 }
 0x76f   : > { %5725 = vrcp.f32 %v1528_v22 }
 0x770   : > { %4821 = vmatprep.mubr.msk.f32.mxu1 %vm1072_vm5, %v1543_v9 }
 0x771   : > { %4822 = vmatmul.mubr.msk.f32.vlgmr.msra.gmra.mrb[24].mxu1 %vm1072_vm5, %v1544_v38  ;;  %v5722_v10 = vpop.eup %5721 }
 0x772   : > { %5190 = vmatpush3.bf16.xpose.msk.msra.mxu1 %vm6572_vm1, %v6848_v50  ;;  %v1525_v47 = vpop.xlane.xlu0 %1524  ;;  %v1546_v53 = vmul.f32 %v5722_v10, %v6832_v2  ;;  %v5590_v50 = vpop.permute.xlu1 %5589 }
 0x773   : > { %5727 = vrcp.f32 %v1525_v47  ;;  %5193 = vmatprep.subr.msk.bf16.mxu1 %vm6572_vm1, %v5191_v7  ;;  %v5591_v17 = vunpack.i.l.bf16 %v5590_v50 }
 0x775   : > { %v5724_v24 = vpop.eup %5723 }
 0x776   : > { %v5585_v15 = vpop.permute.xlu0 %5584  ;;  %v1545_v46 = vmul.f32 %v5724_v24, %v6836_v12  ;;  %v5592_v12 = vunpack.i.h.bf16 %v5590_v50  ;;  %v1977_v32 = vpop.permute.xlu1 %1976 }
 0x777   : > { %v5587_v20 = vunpack.i.h.bf16 %v5585_v15  ;;  %v5586_v6 = vunpack.i.l.bf16 %v5585_v15 }
 0x778   : > { %4824 = vmatprep.mubr.msk.f32.mxu1 %vm1072_vm5, %v1545_v46  ;;  %v5203_v61 = vpack.c.bf16 %v5592_v12, %v5591_v17 }
 0x779   : > { %v5197_v60 = vpack.c.bf16 %v5587_v20, %v5586_v6  ;;  %4825 = vmatmul.mubr.msk.f32.gmra.mrb[26].mxu1 %vm1072_vm5, %v1546_v53  ;;  %v5726_v36 = vpop.eup %5725 }
 0x77a   : > { %5196 = vmatpush3.bf16.xpose.msk.msra.mxu1 %vm6572_vm1, %v5191_v7  ;;  %v1975_v27 = vpop.permute.xlu0 %1974  ;;  %v1548_v39 = vmul.f32 %v5726_v36, %v6840_v21  ;;  %v1291_v36 = vld [vmem:[#allocation7 + $0x8] sm:$0xff] }
 0x77b   : > { %5199 = vmatprep.subr.msk.bf16.mxu1 %vm6572_vm1, %v5197_v60 }
 0x77d   : > { %v5728_v0 = vpop.eup %5727 }
 0x77e   : > { %v1979_v43 = vpop.permute.xlu0 %1978  ;;  %v1547_v2 = vmul.f32 %v5728_v0, %v6844_v45 }
 0x780   : > { %4827 = vmatprep.mubr.msk.f32.mxu1 %vm1072_vm5, %v1547_v2  ;;  %v1292_v2 = vld [vmem:[#allocation7 + $0x10] sm:$0xff] }
 0x781   : > { %4828 = vmatmul.mubr.msk.f32.gmra.mrb[28].mxu1 %vm1072_vm5, %v1548_v39  ;;  %v1293_v39 = vld [vmem:[#allocation7 + $0x18] sm:$0xff] }
 0x782   : > { %5202 = vmatpush3.bf16.xpose.msk.msra.mxu1 %vm6572_vm1, %v5197_v60  ;;  %v1983_v63 = vpop.permute.xlu0 %1982 }
 0x783   : > { %5205 = vmatprep.subr.msk.bf16.mxu1 %vm6572_vm1, %v5203_v61 }
 0x786   : > { %v1987_v23 = vpop.permute.xlu0 %1986 }
 0x78a   : > { %5208 = vmatpush3.bf16.xpose.msk.msra.mxu1 %vm6572_vm1, %v5203_v61  ;;  %v5595_v13 = vpop.permute.xlu0 %5594 }
 0x78b   : > { %v5597_v45 = vunpack.i.h.bf16 %v5595_v13  ;;  %v5596_v30 = vunpack.i.l.bf16 %v5595_v13 }
 0x78d   : > { %v5233_v21 = vpack.c.bf16 %v5597_v45, %v5596_v30 }
 0x78e   : > { %v5605_v47 = vpop.permute.xlu0 %5604 }
 0x78f   : > { %5235 = vmatprep.subr.msk.bf16.mxu1 %vm6572_vm1, %v5233_v21 }
 0x792   : > { %v2526_v15 = vpop.permute.xlu0 %2525 }
 0x796   : > { %v2530_v60 = vpop.permute.xlu0 %2529 }
 0x79a   : > { %v2534_v0 = vpop.permute.xlu0 %2533 }
 0x79f   : > { %v1534_v28 = vpop.xlane.xlu1 %1533 }
 0x7a0   : > { %5729 = vrcp.f32 %v1534_v28 }
 0x7a3   : > { %v1531_v44 = vpop.xlane.xlu1 %1530 }
 0x7a4   : > { %5731 = vrcp.f32 %v1531_v44 }
 0x7a7   : > { %v1981_v29 = vpop.permute.xlu1 %1980 }
 0x7aa   : > { %v5730_v33 = vpop.eup %5729 }
 0x7ab   : > { %v1985_v31 = vpop.permute.xlu1 %1984  ;;  %v1550_v26 = vmul.f32 %v5730_v33, %v6869_v19  ;;  %v5607_v19 = vunpack.i.h.bf16 %v5605_v47 }
 0x7ae   : > { %v5732_v34 = vpop.eup %5731 }
 0x7af   : > { %v1989_v37 = vpop.permute.xlu1 %1988  ;;  %v1549_v25 = vmul.f32 %v5732_v34, %v6875_v48  ;;  %v5606_v48 = vunpack.i.l.bf16 %v5605_v47 }
 0x7b1   : > { %4830 = vmatprep.mubr.msk.f32.mxu1 %vm1072_vm5, %v1549_v25  ;;  %v5245_v10 = vpack.c.bf16 %v5607_v19, %v5606_v48 }
 0x7b2   : > { %4831 = vmatmul.mubr.msk.f32.gmra.mrb[30].mxu1 %vm1072_vm5, %v1550_v26 }
 0x7b3   : > { %v5600_v22 = vpop.permute.xlu1 %5599  ;;  %4889 = vmatprep.mubr.msk.f32.mxu1 %vm918_vm0, %v1975_v27  ;;  %v1290_v27 = vld [vmem:[#allocation7] sm:$0xff] }
 0x7b4   : > { %v5602_v9 = vunpack.i.h.bf16 %v5600_v22  ;;  %v5601_v38 = vunpack.i.l.bf16 %v5600_v22  ;;  %v5177_v12 = vpack.c.bf16 %v1291_v36, %v1290_v27 }
 0x7b6   : > { %v5239_v7 = vpack.c.bf16 %v5602_v9, %v5601_v38  ;;  %4890 = vmatmul.mubr.msk.f32.vlgmr.msra.gmra.mrb[32].mxu1 %vm918_vm0, %v1977_v32  ;;  %5178 = vmatprep.subr.bf16.mxu0 %v5177_v12 }
 0x7b7   : > { %5238 = vmatpush3.bf16.xpose.msk.msra.mxu1 %vm6572_vm1, %v5233_v21  ;;  %4892 = vmatprep.mubr.msk.f32.mxu1 %vm918_vm0, %v1979_v43  ;;  %v5610_v24 = vpop.permute.xlu1 %5609  ;;  %v2538_v43 = vpop.permute.xlu0 %2537 }
 0x7b8   : > { %5241 = vmatprep.subr.msk.bf16.mxu1 %vm6572_vm1, %v5239_v7  ;;  %v5612_v46 = vunpack.i.h.bf16 %v5610_v24  ;;  %v5611_v20 = vunpack.i.l.bf16 %v5610_v24 }
 0x7ba   : > { %4893 = vmatmul.mubr.msk.f32.gmra.mrb[34].mxu1 %vm918_vm0, %v1981_v29  ;;  %v5251_v6 = vpack.c.bf16 %v5612_v46, %v5611_v20 }
 0x7bb   : > { %4895 = vmatprep.mubr.msk.f32.mxu1 %vm918_vm0, %v1983_v63  ;;  %v2528_v53 = vpop.permute.xlu1 %2527 }
 0x7be   : > { %4896 = vmatmul.mubr.msk.f32.gmra.mrb[36].mxu1 %vm918_vm0, %v1985_v31 }
 0x7bf   : > { %5244 = vmatpush3.bf16.xpose.msk.msra.mxu1 %vm6572_vm1, %v5239_v7  ;;  %4898 = vmatprep.mubr.msk.f32.mxu1 %vm918_vm0, %v1987_v23  ;;  %v2532_v50 = vpop.permute.xlu1 %2531  ;;  %v5181_v23 = vpack.c.bf16 %v1293_v39, %v1292_v2 }
 0x7c0   : > { %5247 = vmatprep.subr.msk.bf16.mxu1 %vm6572_vm1, %v5245_v10 }
 0x7c2   : > { %4899 = vmatmul.mubr.msk.f32.gmra.mrb[38].mxu1 %vm918_vm0, %v1989_v37 }
 0x7c3   : > { %4965 = vmatprep.mubr.msk.f32.mxu1 %vm918_vm0, %v2526_v15  ;;  %v2536_v17 = vpop.permute.xlu1 %2535 }
 0x7c7   : > { %5250 = vmatpush3.bf16.xpose.msk.msra.mxu1 %vm6572_vm1, %v5245_v10  ;;  %v2540_v57 = vpop.permute.xlu1 %2539 }
 0x7c8   : > { %5253 = vmatprep.subr.msk.bf16.mxu1 %vm6572_vm1, %v5251_v6 }
 0x7cf   : > { %5256 = vmatpush3.bf16.xpose.msk.msra.mxu1 %vm6572_vm1, %v5251_v6 }
 0x7d6   : > { %4966 = vmatmul.mubr.msk.f32.vlgmr.msra.gmra.mrb[40].mxu1 %vm918_vm0, %v2528_v53 }
 0x7d7   : > { %4968 = vmatprep.mubr.msk.f32.mxu1 %vm918_vm0, %v2530_v60 }
 0x7da   : > { %4969 = vmatmul.mubr.msk.f32.gmra.mrb[42].mxu1 %vm918_vm0, %v2532_v50 }
 0x7db   : > { %4971 = vmatprep.mubr.msk.f32.mxu1 %vm918_vm0, %v2534_v0 }
 0x7de   : > { %4972 = vmatmul.mubr.msk.f32.gmra.mrb[44].mxu1 %vm918_vm0, %v2536_v17 }
 0x7df   : > { %4974 = vmatprep.mubr.msk.f32.mxu1 %vm918_vm0, %v2538_v43 }
 0x7e2   : > { %4975 = vmatmul.mubr.msk.f32.gmra.mrb[46].mxu1 %vm918_vm0, %v2540_v57 }
 0x7e3   : > { %3367 = vmatprep.mubr.f32.mxu1 %v6178_v54 }
 0x844   : > { %v4823_v61 = vpop.f32.mrb[24].mxu1 }
 0x845   : > { %v1673_v63 = vpop.f32.mrb[25].mxu1 }
 0x846   : > { %4841 = vmatprep.mubr.msk.f32.mxu0 %vm918_vm0, %v1673_v63 }
 0x847   : > { %4842 = vmatmul.mubr.msk.f32.vlgmr.msra.gmra.mrb[24].mxu0 %vm918_vm0, %v4823_v61 }
 0x848   : > { %5180 = vmatpush3.bf16.msra.mxu0 %v5177_v12 }
 0x849   : > { %5182 = vmatprep.subr.bf16.mxu0 %v5181_v23 }
 0x84c   : > { %v4826_v13 = vpop.f32.mrb[26].mxu1  ;;  %5184 = vmatpush3.bf16.msra.mxu0 %v5181_v23 }
 0x84d   : > { %v1683_v45 = vpop.f32.mrb[27].mxu1 }
 0x84e   : > { %4844 = vmatprep.mubr.msk.f32.mxu0 %vm918_vm0, %v1683_v45 }
 0x84f   : > { %4845 = vmatmul.mubr.msk.f32.gmra.mrb[26].mxu0 %vm918_vm0, %v4826_v13 }
 0x854   : > { %v4829_v30 = vpop.f32.mrb[28].mxu1 }
 0x855   : > { %v1693_v21 = vpop.f32.mrb[29].mxu1 }
 0x856   : > { %4847 = vmatprep.mubr.msk.f32.mxu0 %vm918_vm0, %v1693_v21 }
 0x857   : > { %4848 = vmatmul.mubr.msk.f32.gmra.mrb[28].mxu0 %vm918_vm0, %v4829_v30 }
 0x885   : > { %v4832_v32 = vpop.f32.mrb[30].mxu1 }
 0x886   : > { %v1703_v28 = vpop.f32.mrb[31].mxu1 }
 0x887   : > { %4850 = vmatprep.mubr.msk.f32.mxu0 %vm918_vm0, %v1703_v28 }
 0x888   : > { %4851 = vmatmul.mubr.msk.f32.gmra.mrb[30].mxu0 %vm918_vm0, %v4832_v32 }
 0x889   : > { %4861 = vmatprep.mubr.msk.f32.mxu0 %vm918_vm0, %v6776_v56  ;;  %v4891_v44 = vpop.f32.mrb[32].mxu1 }
 0x88a   : > { %v2110_v29 = vadd.f32 %v4891_v44, %v6642_v42  ;;  %v2104_v31 = vpop.f32.mrb[33].mxu1 }
 0x88b   : > { %v2105_v33 = vadd.f32 %v2104_v31, %v6644_v52 }
 0x88c   : > { %4862 = vmatmul.mubr.msk.f32.vlgmr.msra.gmra.mrb[24].mxu0 %vm918_vm0, %v6774_v55  ;;  %v2146_v34 = vsel %vm1072_vm5, %v2110_v29, -inf }
 0x88d   : > { %2147 = vmax.xlane.f32.xlu1 %v2146_v34  ;;  %4864 = vmatprep.mubr.msk.f32.mxu0 %vm918_vm0, %v6780_v62  ;;  %v4894_v37 = vpop.f32.mrb[34].mxu1  ;;  %v2143_v25 = vsel %vm1072_vm5, %v2105_v33, -inf }
 0x88e   : > { %v2120_v56 = vadd.f32 %v4894_v37, %v6650_v49  ;;  %v2114_v26 = vpop.f32.mrb[35].mxu1  ;;  %2144 = vmax.xlane.f32.xlu0 %v2143_v25 }
 0x88f   : > { %v2115_v55 = vadd.f32 %v2114_v26, %v6653_v51 }
 0x890   : > { %4865 = vmatmul.mubr.msk.f32.gmra.mrb[26].mxu0 %vm918_vm0, %v6778_v58  ;;  %v2152_v22 = vsel %vm1072_vm5, %v2120_v56, -inf }
 0x891   : > { %4867 = vmatprep.mubr.msk.f32.mxu0 %vm918_vm0, %v6784_v41  ;;  %v4897_v9 = vpop.f32.mrb[36].mxu1  ;;  %v2149_v19 = vsel %vm1072_vm5, %v2115_v55, -inf }
 0x892   : > { %v2130_v62 = vadd.f32 %v4897_v9, %v6660_v3  ;;  %v2124_v38 = vpop.f32.mrb[37].mxu1  ;;  %2153 = vmax.xlane.f32.xlu0 %v2152_v22 }
 0x893   : > { %v2125_v47 = vadd.f32 %v2124_v38, %v6663_v8 }
 0x894   : > { %4868 = vmatmul.mubr.msk.f32.gmra.mrb[28].mxu0 %vm918_vm0, %v6782_v1  ;;  %v2158_v7 = vsel %vm1072_vm5, %v2130_v62, -inf }
 0x895   : > { %2159 = vmax.xlane.f32.xlu1 %v2158_v7  ;;  %4870 = vmatprep.mubr.msk.f32.mxu0 %vm918_vm0, %v6788_v5  ;;  %v4900_v58 = vpop.f32.mrb[38].mxu1  ;;  %v2155_v24 = vsel %vm1072_vm5, %v2125_v47, -inf }
 0x896   : > { %v2140_v41 = vadd.f32 %v4900_v58, %v6668_v14  ;;  %v2134_v48 = vpop.f32.mrb[39].mxu1  ;;  %2150 = vmax.xlane.f32.xlu0 %v2149_v19 }
 0x897   : > { %v2135_v10 = vadd.f32 %v2134_v48, %v6671_v16 }
 0x898   : > { %4871 = vmatmul.mubr.msk.f32.gmra.mrb[30].mxu0 %vm918_vm0, %v6786_v40  ;;  %v2164_v1 = vsel %vm1072_vm5, %v2140_v41, -inf }
 0x899   : > { %2165 = vmax.xlane.f32.xlu1 %v2164_v1  ;;  %v2161_v5 = vsel %vm1072_vm5, %v2135_v10, -inf }
 0x89a   : > { %2156 = vmax.xlane.f32.xlu0 %v2155_v24 }
 0x89e   : > { %2162 = vmax.xlane.f32.xlu0 %v2161_v5 }
 0x8a9   : > { %v7011_v15 = vpop.f32.mrb[40].mxu1 }
 0x8aa   : > { %v7013_v46 = vpop.f32.mrb[41].mxu1  ;;  %5619 = vrot.lane.b32.xlu1 %v6584_v4, %s6181_s3 }
 0x8ad   : > { %v7017_v20 = vpop.f32.mrb[42].mxu1 }
 0x8ae   : > { %v7019_v40 = vpop.f32.mrb[43].mxu1 }
 0x8b1   : > { %v7021_v6 = vpop.f32.mrb[44].mxu1 }
 0x8b2   : > { %v7023_v53 = vpop.f32.mrb[45].mxu1 }
 0x8b4   : > { %5614 = vrot.lane.b32.xlu0 %v6576_v59, %s6181_s3 }
 0x8b5   : > { %v7027_v60 = vpop.f32.mrb[46].mxu1 }
 0x8b6   : > { %v7029_v50 = vpop.f32.mrb[47].mxu1 }
 0x91a   : > { %v2148_v27 = vpop.xlane.xlu1 %2147 }
 0x91b   : > { %v2168_v36 = vsub.f32 %v2110_v29, %v2148_v27  ;;  %v2145_v0 = vpop.xlane.xlu0 %2144 }
 0x91c   : > { %v2167_v12 = vsub.f32 %v2105_v33, %v2145_v0 }
 0x91d   : > { %v2177_v17 = vmul.f32 1.442695, %v2168_v36 }
 0x91e   : > { %v2175_v43 = vmul.f32 1.442695, %v2167_v12 }
 0x91f   : > { %5733 = vpow2.f32 %v2177_v17  ;;  %v2154_v57 = vpop.xlane.xlu0 %2153 }
 0x920   : > { %5735 = vpow2.f32 %v2175_v43  ;;  %v2170_v2 = vsub.f32 %v2120_v56, %v2154_v57  ;;  %v7069_v57 = vadd.f32 %v7013_v46, %v6644_v52  ;;  %v7087_v52 = vadd.f32 %v7021_v6, %v6660_v3 }
 0x922   : > { %v2181_v39 = vmul.f32 1.442695, %v2170_v2  ;;  %v2160_v61 = vpop.xlane.xlu1 %2159  ;;  %v7073_v2 = vadd.f32 %v7011_v15, %v6642_v42  ;;  %v2709_v46 = vsel %vm1072_vm5, %v7087_v52, -inf }
 0x923   : > { %v2172_v63 = vsub.f32 %v2130_v62, %v2160_v61  ;;  %v2151_v23 = vpop.xlane.xlu0 %2150  ;;  %v2694_v61 = vsel %vm1072_vm5, %v7069_v57, -inf }
 0x924   : > { %5737 = vpow2.f32 %v2181_v39  ;;  %v2169_v13 = vsub.f32 %v2115_v55, %v2151_v23  ;;  %v7077_v39 = vadd.f32 %v7019_v40, %v6653_v51  ;;  %v2697_v15 = vsel %vm1072_vm5, %v7073_v2, -inf }
 0x925   : > { %v2185_v45 = vmul.f32 1.442695, %v2172_v63  ;;  %v7083_v63 = vadd.f32 %v7017_v20, %v6650_v49  ;;  %v7095_v51 = vadd.f32 %v7023_v53, %v6663_v8  ;;  %v7099_v49 = vadd.f32 %v7027_v60, %v6668_v14 }
 0x926   : > { %v2179_v30 = vmul.f32 1.442695, %v2169_v13  ;;  %v2166_v21 = vpop.xlane.xlu1 %2165  ;;  %v2700_v42 = vsel %vm1072_vm5, %v7077_v39, -inf  ;;  %v7107_v20 = vadd.f32 %v7029_v50, %v6671_v16 }
 0x927   : > { %5739 = vpow2.f32 %v2185_v45  ;;  %v2174_v32 = vsub.f32 %v2140_v41, %v2166_v21  ;;  %v2157_v28 = vpop.xlane.xlu0 %2156  ;;  %v2703_v3 = vsel %vm1072_vm5, %v7083_v63, -inf  ;;  %v2706_v8 = vsel %vm1072_vm5, %v7095_v51, -inf }
 0x928   : > { %5741 = vpow2.f32 %v2179_v30  ;;  %v2171_v44 = vsub.f32 %v2125_v47, %v2157_v28  ;;  %v2715_v40 = vsel %vm1072_vm5, %v7099_v49, -inf  ;;  %v2712_v14 = vsel %vm1072_vm5, %v7107_v20, -inf }
 0x929   : > { %v7031_v29 = vpop.eup %5733  ;;  %v2189_v31 = vmul.f32 1.442695, %v2174_v32 }
 0x92a   : > { %v7033_v33 = vpop.eup %5735  ;;  %v2183_v34 = vmul.f32 1.442695, %v2171_v44  ;;  %v2194_v37 = vsel %vm1072_vm5, %v7031_v29, 0.0  ;;  %v5620_v55 = vpop.permute.xlu1 %5619 }
 0x92b   : > { %5743 = vpow2.f32 %v2189_v31  ;;  %2195 = vadd.xlane.f32.xlu1 %v2194_v37  ;;  %v2163_v25 = vpop.xlane.xlu0 %2162  ;;  %v2191_v56 = vsel %vm1072_vm5, %v7033_v33, 0.0  ;;  %v5622_v19 = vunpack.i.h.bf16 %v5620_v55  ;;  %v5621_v41 = vunpack.i.l.bf16 %v5620_v55  ;;  %v2384_v31 = vld [vmem:[#allocation7 + $0x40] sm:$0xff]  ;;  %v2386_v55 = vld [vmem:[#allocation7 + $0x50] sm:$0xff] }
 0x92c   : > { %5745 = vpow2.f32 %v2183_v34  ;;  %v2173_v26 = vsub.f32 %v2135_v10, %v2163_v25  ;;  %2192 = vadd.xlane.f32.xlu0 %v2191_v56  ;;  %v2385_v34 = vld [vmem:[#allocation7 + $0x48] sm:$0xff] }
 0x92d   : > { %v5213_v27 = vpack.c.bf16 %v5622_v19, %v5621_v41  ;;  %v5225_v56 = vpack.c.bf16 %v2385_v34, %v2384_v31 }
 0x92e   : > { %v7039_v22 = vpop.eup %5737  ;;  %v2187_v9 = vmul.f32 1.442695, %v2173_v26 }
 0x92f   : > { %v5615_v62 = vpop.permute.xlu0 %5614  ;;  %v2200_v38 = vsel %vm1072_vm5, %v7039_v22, 0.0 }
 0x930   : > { %5747 = vpow2.f32 %v2187_v9  ;;  %v5617_v7 = vunpack.i.h.bf16 %v5615_v62  ;;  %v5616_v47 = vunpack.i.l.bf16 %v5615_v62  ;;  %2201 = vadd.xlane.f32.xlu1 %v2200_v38  ;;  %v2387_v9 = vld [vmem:[#allocation7 + $0x58] sm:$0xff] }
 0x931   : > { %v7043_v58 = vpop.eup %5739 }
 0x932   : > { %v7045_v48 = vpop.eup %5741  ;;  %v5209_v1 = vpack.c.bf16 %v5617_v7, %v5616_v47  ;;  %v2206_v10 = vsel %vm1072_vm5, %v7043_v58, 0.0  ;;  %v5229_v7 = vpack.c.bf16 %v2387_v9, %v2386_v55 }
 0x933   : > { %v2197_v24 = vsel %vm1072_vm5, %v7045_v48, 0.0 }
 0x934   : > { %2207 = vadd.xlane.f32.xlu1 %v2206_v10  ;;  %2198 = vadd.xlane.f32.xlu0 %v2197_v24 }
 0x935   : > { %v7051_v5 = vpop.eup %5743  ;;  %5210 = vmatprep.subr.bf16.mxu0 %v5209_v1 }
 0x936   : > { %v7053_v36 = vpop.eup %5745  ;;  %5212 = vmatpush3.bf16.msra.mxu0 %v5209_v1  ;;  %v2212_v0 = vsel %vm1072_vm5, %v7051_v5, 0.0 }
 0x937   : > { %5214 = vmatprep.subr.bf16.mxu0 %v5213_v27  ;;  %v2203_v12 = vsel %vm1072_vm5, %v7053_v36, 0.0 }
 0x938   : > { %2213 = vadd.xlane.f32.xlu1 %v2212_v0  ;;  %2204 = vadd.xlane.f32.xlu0 %v2203_v12 }
 0x93a   : > { %v7059_v17 = vpop.eup %5747  ;;  %5216 = vmatpush3.bf16.msra.mxu0 %v5213_v27 }
 0x93b   : > { %v2209_v43 = vsel %vm1072_vm5, %v7059_v17, 0.0 }
 0x93c   : > { %2210 = vadd.xlane.f32.xlu1 %v2209_v43 }
 0x94d   : > { %5629 = vrot.lane.b32.xlu1 %v6594_v18, %s6181_s3 }
 0x94e   : > { %5624 = vrot.lane.b32.xlu0 %v6586_v11, %s6181_s3  ;;  %s7637_s3 = sld [smem:[#allocation20_spill]] }
 0x96d   : > { %2695 = vmax.xlane.f32.xlu0 %v2694_v61 }
 0x971   : > { %2701 = vmax.xlane.f32.xlu0 %v2700_v42  ;;  %2698 = vmax.xlane.f32.xlu1 %v2697_v15 }
 0x975   : > { %2704 = vmax.xlane.f32.xlu0 %v2703_v3  ;;  %2710 = vmax.xlane.f32.xlu1 %v2709_v46 }
 0x979   : > { %2707 = vmax.xlane.f32.xlu0 %v2706_v8  ;;  %2716 = vmax.xlane.f32.xlu1 %v2715_v40 }
 0x97d   : > { %2713 = vmax.xlane.f32.xlu0 %v2712_v14 }
 0x98a   : > { %5639 = vrot.lane.b32.xlu1 %v6584_v4, %s6182_s14 }
 0x993   : > { %5634 = vrot.lane.b32.xlu0 %v6576_v59, %s6182_s14 }
 0x9b8   : > { %v2196_v16 = vpop.xlane.xlu1 %2195 }
 0x9b9   : > { %v2193_v6 = vpop.xlane.xlu0 %2192 }
 0x9ba   : > { %5749 = vrcp.f32 %v2193_v6 }
 0x9bb   : > { %5751 = vrcp.f32 %v2196_v16 }
 0x9bd   : > { %v2202_v53 = vpop.xlane.xlu1 %2201 }
 0x9c1   : > { %v2208_v60 = vpop.xlane.xlu1 %2207  ;;  %v2199_v50 = vpop.xlane.xlu0 %2198 }
 0x9c2   : > { %5753 = vrcp.f32 %v2199_v50 }
 0x9c3   : > { %5755 = vrcp.f32 %v2202_v53 }
 0x9c4   : > { %v5750_v23 = vpop.eup %5749 }
 0x9c5   : > { %v2214_v13 = vpop.xlane.xlu1 %2213  ;;  %v2205_v45 = vpop.xlane.xlu0 %2204  ;;  %v2223_v30 = vmul.f32 %v5750_v23, %v7033_v33 }
 0x9c6   : > { %5757 = vrcp.f32 %v2205_v45  ;;  %v5752_v26 = vpop.eup %5751 }
 0x9c7   : > { %4917 = vmatprep.mubr.msk.f32.mxu0 %vm1072_vm5, %v2223_v30  ;;  %5759 = vrcp.f32 %v2208_v60  ;;  %v2224_v38 = vmul.f32 %v5752_v26, %v7031_v29 }
 0x9c9   : > { %v2211_v21 = vpop.xlane.xlu1 %2210  ;;  %v5625_v4 = vpop.permute.xlu0 %5624 }
 0x9ca   : > { %v5627_v32 = vunpack.i.h.bf16 %v5625_v4  ;;  %v5626_v28 = vunpack.i.l.bf16 %v5625_v4  ;;  %5761 = vrcp.f32 %v2211_v21 }
 0x9cb   : > { %5763 = vrcp.f32 %v2214_v13 }
 0x9cc   : > { %v5217_v59 = vpack.c.bf16 %v5627_v32, %v5626_v28  ;;  %v5754_v62 = vpop.eup %5753 }
 0x9cd   : > { %v5630_v44 = vpop.permute.xlu1 %5629  ;;  %v5756_v47 = vpop.eup %5755  ;;  %v2225_v19 = vmul.f32 %v5754_v62, %v7045_v48 }
 0x9ce   : > { %v5632_v37 = vunpack.i.h.bf16 %v5630_v44  ;;  %v5631_v25 = vunpack.i.l.bf16 %v5630_v44  ;;  %5218 = vmatprep.subr.bf16.mxu0 %v5217_v59  ;;  %v2226_v1 = vmul.f32 %v5756_v47, %v7039_v22 }
 0x9cf   : > { %5220 = vmatpush3.bf16.msra.mxu0 %v5217_v59 }
 0x9d0   : > { %v5221_v33 = vpack.c.bf16 %v5632_v37, %v5631_v25  ;;  %v5758_v41 = vpop.eup %5757 }
 0x9d1   : > { %v5760_v10 = vpop.eup %5759  ;;  %v2227_v24 = vmul.f32 %v5758_v41, %v7053_v36 }
 0x9d2   : > { %5222 = vmatprep.subr.bf16.mxu0 %v5221_v33  ;;  %v2228_v29 = vmul.f32 %v5760_v10, %v7043_v58 }
 0x9d3   : > { %5224 = vmatpush3.bf16.msra.mxu0 %v5221_v33 }
 0x9d4   : > { %5226 = vmatprep.subr.bf16.mxu0 %v5225_v56  ;;  %v5762_v27 = vpop.eup %5761 }
 0x9d5   : > { %v5764_v48 = vpop.eup %5763  ;;  %v2229_v0 = vmul.f32 %v5762_v27, %v7059_v17 }
 0x9d6   : > { %4918 = vmatmul.mubr.msk.f32.vlgmr.msra.gmra.mrb[32].mxu0 %vm1072_vm5, %v2224_v38  ;;  %v2230_v22 = vmul.f32 %v5764_v48, %v7051_v5 }
 0x9d7   : > { %4920 = vmatprep.mubr.msk.f32.mxu0 %vm1072_vm5, %v2225_v19  ;;  %5228 = vmatpush3.bf16.msra.mxu0 %v5225_v56 }
 0x9d8   : > { %5230 = vmatprep.subr.bf16.mxu0 %v5229_v7 }
 0x9da   : > { %4921 = vmatmul.mubr.msk.f32.gmra.mrb[34].mxu0 %vm1072_vm5, %v2226_v1 }
 0x9db   : > { %4923 = vmatprep.mubr.msk.f32.mxu0 %vm1072_vm5, %v2227_v24  ;;  %5232 = vmatpush3.bf16.msra.mxu0 %v5229_v7 }
 0x9de   : > { %4924 = vmatmul.mubr.msk.f32.gmra.mrb[36].mxu0 %vm1072_vm5, %v2228_v29 }
 0x9df   : > { %4926 = vmatprep.mubr.msk.f32.mxu0 %vm1072_vm5, %v2229_v0 }
 0x9e2   : > { %4927 = vmatmul.mubr.msk.f32.gmra.mrb[38].mxu0 %vm1072_vm5, %v2230_v22 }
 0x9fa   : > { %v2696_v36 = vpop.xlane.xlu0 %2695 }
 0x9fb   : > { %v2718_v12 = vsub.f32 %v7069_v57, %v2696_v36 }
 0x9fd   : > { %v2726_v43 = vmul.f32 1.442695, %v2718_v12 }
 0x9fe   : > { %v2699_v61 = vpop.xlane.xlu1 %2698  ;;  %v2702_v42 = vpop.xlane.xlu0 %2701 }
 0x9ff   : > { %5765 = vpow2.f32 %v2726_v43  ;;  %v2719_v58 = vsub.f32 %v7073_v2, %v2699_v61  ;;  %v2720_v15 = vsub.f32 %v7077_v39, %v2702_v42 }
 0xa01   : > { %v2728_v17 = vmul.f32 1.442695, %v2719_v58  ;;  %v2730_v3 = vmul.f32 1.442695, %v2720_v15  ;;  %v2935_v58 = vld [vmem:[#allocation7 + $0x60] sm:$0xff]  ;;  %v2936_v15 = vld [vmem:[#allocation7 + $0x68] sm:$0xff] }
 0xa02   : > { %v2711_v46 = vpop.xlane.xlu1 %2710  ;;  %v2705_v8 = vpop.xlane.xlu0 %2704 }
 0xa03   : > { %5767 = vpow2.f32 %v2728_v17  ;;  %v2723_v5 = vsub.f32 %v7087_v52, %v2711_v46  ;;  %v2721_v40 = vsub.f32 %v7083_v63, %v2705_v8 }
 0xa04   : > { %5769 = vpow2.f32 %v2730_v3 }
 0xa05   : > { %v2736_v14 = vmul.f32 1.442695, %v2723_v5  ;;  %v2732_v57 = vmul.f32 1.442695, %v2721_v40  ;;  %v5273_v5 = vpack.c.bf16 %v2936_v15, %v2935_v58 }
 0xa06   : > { %v2708_v16 = vpop.xlane.xlu0 %2707  ;;  %v2717_v31 = vpop.xlane.xlu1 %2716 }
 0xa07   : > { %5771 = vpow2.f32 %v2736_v14  ;;  %v2722_v6 = vsub.f32 %v7095_v51, %v2708_v16  ;;  %v2725_v34 = vsub.f32 %v7099_v49, %v2717_v31  ;;  %v2938_v16 = vld [vmem:[#allocation7 + $0x78] sm:$0xff] }
 0xa08   : > { %5773 = vpow2.f32 %v2732_v57  ;;  %v2937_v57 = vld [vmem:[#allocation7 + $0x70] sm:$0xff] }
 0xa09   : > { %v7141_v2 = vpop.eup %5765  ;;  %v2734_v39 = vmul.f32 1.442695, %v2722_v6  ;;  %v2740_v37 = vmul.f32 1.442695, %v2725_v34 }
 0xa0a   : > { %v2714_v53 = vpop.xlane.xlu0 %2713  ;;  %v2742_v60 = vsel %vm1072_vm5, %v7141_v2, 0.0 }
 0xa0b   : > { %2743 = vadd.xlane.f32.xlu0 %v2742_v60  ;;  %5775 = vpow2.f32 %v2734_v39  ;;  %v2724_v25 = vsub.f32 %v7107_v20, %v2714_v53  ;;  %v5277_v53 = vpack.c.bf16 %v2938_v16, %v2937_v57  ;;  %v3224_v16 = vld [vmem:[#allocation8 + $0x38] sm:$0xff] }
 0xa0c   : > { %5777 = vpow2.f32 %v2740_v37 }
 0xa0d   : > { %v7145_v52 = vpop.eup %5767  ;;  %v2738_v33 = vmul.f32 1.442695, %v2724_v25 }
 0xa0e   : > { %v7147_v63 = vpop.eup %5769  ;;  %v5635_v50 = vpop.permute.xlu0 %5634  ;;  %v2745_v23 = vsel %vm1072_vm5, %v7145_v52, 0.0 }
 0xa0f   : > { %v5637_v13 = vunpack.i.h.bf16 %v5635_v50  ;;  %v5636_v51 = vunpack.i.l.bf16 %v5635_v50  ;;  %2746 = vadd.xlane.f32.xlu1 %v2745_v23  ;;  %v2748_v45 = vsel %vm1072_vm5, %v7147_v63, 0.0  ;;  %5779 = vpow2.f32 %v2738_v33 }
 0xa10   : > { %2749 = vadd.xlane.f32.xlu0 %v2748_v45 }
 0xa11   : > { %v7153_v30 = vpop.eup %5771  ;;  %v5257_v21 = vpack.c.bf16 %v5637_v13, %v5636_v51 }
 0xa12   : > { %v7155_v4 = vpop.eup %5773  ;;  %v2757_v32 = vsel %vm1072_vm5, %v7153_v30, 0.0 }
 0xa13   : > { %v2751_v28 = vsel %vm1072_vm5, %v7155_v4, 0.0  ;;  %5258 = vmatprep.subr.bf16.mxu0 %v5257_v21 }
 0xa14   : > { %2758 = vadd.xlane.f32.xlu0 %v2757_v32  ;;  %2752 = vadd.xlane.f32.xlu1 %v2751_v28 }
 0xa15   : > { %v7161_v59 = vpop.eup %5775 }
 0xa16   : > { %v2754_v44 = vsel %vm1072_vm5, %v7161_v59, 0.0  ;;  %v7171_v56 = vpop.eup %5777 }
 0xa17   : > { %v2763_v26 = vsel %vm1072_vm5, %v7171_v56, 0.0 }
 0xa18   : > { %2755 = vadd.xlane.f32.xlu1 %v2754_v44 }
 0xa19   : > { %v7175_v55 = vpop.eup %5779 }
 0xa29   : > { %5649 = vrot.lane.b32.xlu1 %v6594_v18, %s6182_s14  ;;  %v5640_v18 = vpop.permute.xlu1 %5639 }
 0xa2a   : > { %5644 = vrot.lane.b32.xlu0 %v6586_v11, %s6182_s14  ;;  %v2760_v11 = vsel %vm1072_vm5, %v7175_v55, 0.0  ;;  %v5642_v47 = vunpack.i.h.bf16 %v5640_v18  ;;  %v5641_v19 = vunpack.i.l.bf16 %v5640_v18  ;;  %s7520_s14 = scalar_lea.vmem [#allocation11], %s4186_s17  ;;  %s4364_s17 = sshll.u32 %s6272_s25, 10 }
 0xa2b   : > { %s4064_s26 = sshll.u32 %s7520_s14, 4  ;;  %s7546_s28 = scalar_lea.hbm %s7638_s13, %s4364_s17  ;;  %s7548_s26 = int_to_ptr.vmem [resolvable:$true] %s4064_s26 }
 0xa2c   : > { %v5261_v24 = vpack.c.bf16 %v5642_v47, %v5641_v19  ;;  %s6091_s27 = scalar_lea.vmem %s7548_s26, 1024  ;;  %s6183_s25 = smov [#allocation11]  }
 0xa2d   : > { %p6092_p3 = scmp.ne.s32.totalorder %s7548_s26, %s6091_s27  ;;  %s6095_s29 = sshll.u32 %s6183_s25, 4  ;;  %s6096_s29 = int_to_ptr.vmem [resolvable:$false] %s6095_s29 }
 0xa2e   : > { %p6098_p12 = scmp.lt.s32.totalorder %s7548_s26, %s6096_s29 }
 0xa2f   : > { %p6093_p5 = pnand %p6092_p3, %p6413_p10 }
 0xa31   : > { %p6094_p7 = pneg %p6093_p5 }
 0xa49   : > { %2764 = vadd.xlane.f32.xlu0 %v2763_v26 }
 0xa4d   : > { %2761 = vadd.xlane.f32.xlu1 %v2760_v11 }
 0xa98   : > { %v2744_v49 = vpop.xlane.xlu0 %2743 }
 0xa99   : > { %5781 = vrcp.f32 %v2744_v49  ;;  %v5941_v49 = vld [vmem:[%s6474_s12 + $0x8] sm:$0xff] }
 0xa9c   : > { %v2747_v9 = vpop.xlane.xlu1 %2746 }
 0xa9d   : > { %v2750_v62 = vpop.xlane.xlu0 %2749  ;;  %5783 = vrcp.f32 %v2747_v9 }
 0xa9e   : > { %5785 = vrcp.f32 %v2750_v62  ;;  %v5942_v62 = vld [vmem:[%s6474_s12] sm:$0xff] }
 0xaa1   : > { %v2753_v20 = vpop.xlane.xlu1 %2752  ;;  %v2759_v38 = vpop.xlane.xlu0 %2758 }
 0xaa2   : > { %5787 = vrcp.f32 %v2753_v20 }
 0xaa3   : > { %v5782_v17 = vpop.eup %5781 }
 0xaa4   : > { %v2774_v14 = vmul.f32 %v5782_v17, %v7141_v2  ;;  %v5947_v17 = vld [vmem:[%s6474_s12 + $0x38] sm:$0xff] }
 0xaa5   : > { %v2756_v7 = vpop.xlane.xlu1 %2755  ;;  %v5645_v41 = vpop.permute.xlu0 %5644 }
 0xaa6   : > { %v5647_v27 = vunpack.i.h.bf16 %v5645_v41  ;;  %v5646_v29 = vunpack.i.l.bf16 %v5645_v41  ;;  %5789 = vrcp.f32 %v2756_v7  ;;  %v5943_v41 = vld [vmem:[%s6474_s12 + $0x18] sm:$0xff] }
 0xaa7   : > { %5791 = vrcp.f32 %v2759_v38  ;;  %v5784_v40 = vpop.eup %5783 }
 0xaa8   : > { %v5265_v36 = vpack.c.bf16 %v5647_v27, %v5646_v29  ;;  %v5786_v6 = vpop.eup %5785  ;;  %v2775_v39 = vmul.f32 %v5784_v40, %v7145_v52  ;;  %v3222_v40 = vld [vmem:[#allocation8 + $0x28] sm:$0xff] }
 0xaa9   : > { %v4919_v1 = vpop.f32.mrb[32].mxu0  ;;  %v5650_v48 = vpop.permute.xlu1 %5649  ;;  %v2776_v50 = vmul.f32 %v5786_v6, %v7147_v63  ;;  %v3217_v6 = vld [vmem:[#allocation8] sm:$0xff] }
 0xaaa   : > { %v2345_v10 = vpop.f32.mrb[33].mxu0  ;;  %v5652_v12 = vunpack.i.h.bf16 %v5650_v48  ;;  %v5651_v43 = vunpack.i.l.bf16 %v5650_v48 }
 0xaab   : > { %4937 = vmatprep.mubr.msk.f32.mxu0 %vm918_vm0, %v2345_v10  ;;  %v5944_v10 = vld [vmem:[%s6474_s12 + $0x10] sm:$0xff] }
 0xaac   : > { %4938 = vmatmul.mubr.msk.f32.vlgmr.msra.gmra.mrb[24].mxu0 %vm918_vm0, %v4919_v1  ;;  %v5269_v3 = vpack.c.bf16 %v5652_v12, %v5651_v43  ;;  %v5788_v60 = vpop.eup %5787  ;;  %v5946_v12 = vld [vmem:[%s6474_s12 + $0x20] sm:$0xff] }
 0xaad   : > { %5260 = vmatpush3.bf16.msra.mxu0 %v5257_v21  ;;  %v4922_v0 = vpop.f32.mrb[34].mxu0  ;;  %v2777_v2 = vmul.f32 %v5788_v60, %v7155_v4 }
 0xaae   : > { %5262 = vmatprep.subr.bf16.mxu0 %v5261_v24  ;;  %v2355_v22 = vpop.f32.mrb[35].mxu0 }
 0xaaf   : > { %4940 = vmatprep.mubr.msk.f32.mxu0 %vm918_vm0, %v2355_v22  ;;  %v5945_v22 = vld [vmem:[%s6474_s12 + $0x28] sm:$0xff] }
 0xab0   : > { %4941 = vmatmul.mubr.msk.f32.gmra.mrb[26].mxu0 %vm918_vm0, %v4922_v0  ;;  %v5790_v23 = vpop.eup %5789 }
 0xab1   : > { %5264 = vmatpush3.bf16.msra.mxu0 %v5261_v24  ;;  %v4925_v61 = vpop.f32.mrb[36].mxu0  ;;  %v5792_v13 = vpop.eup %5791  ;;  %v2778_v51 = vmul.f32 %v5790_v23, %v7161_v59  ;;  %v3223_v23 = vld [vmem:[#allocation8 + $0x30] sm:$0xff] }
 0xab2   : > { %5266 = vmatprep.subr.bf16.mxu0 %v5265_v36  ;;  %v2365_v42 = vpop.f32.mrb[37].mxu0  ;;  %v2779_v52 = vmul.f32 %v5792_v13, %v7153_v30 }
 0xab3   : > { %4943 = vmatprep.mubr.msk.f32.mxu0 %vm918_vm0, %v2365_v42 }
 0xab4   : > { %4944 = vmatmul.mubr.msk.f32.gmra.mrb[28].mxu0 %vm918_vm0, %v4925_v61 }
 0xab5   : > { %5268 = vmatpush3.bf16.msra.mxu0 %v5265_v36  ;;  %v4928_v46 = vpop.f32.mrb[38].mxu0 }
 0xab6   : > { %5270 = vmatprep.subr.bf16.mxu0 %v5269_v3  ;;  %v2375_v8 = vpop.f32.mrb[39].mxu0 }
 0xab7   : > { %4946 = vmatprep.mubr.msk.f32.mxu0 %vm918_vm0, %v2375_v8 }
 0xab8   : > { %4947 = vmatmul.mubr.msk.f32.gmra.mrb[30].mxu0 %vm918_vm0, %v4928_v46  ;;  %v5948_v46 = vld [vmem:[%s6474_s12 + $0x30] sm:$0xff]  ;;  %s4051_s12 = scalar_lea.sflag [#allocation4], %s6468_s21 }
 0xab9   : > { %5272 = vmatpush3.bf16.msra.mxu0 %v5269_v3  ;;  %4993 = vmatprep.mubr.msk.f32.mxu0 %vm1072_vm5, %v2774_v14  ;;  %v3220_v14 = vld [vmem:[#allocation8 + $0x18] sm:$0xff] }
 0xaba   : > { %5274 = vmatprep.subr.bf16.mxu0 %v5273_v5 }
 0xabc   : > { %4994 = vmatmul.mubr.msk.f32.vlgmr.msra.gmra.mrb[40].mxu0 %vm1072_vm5, %v2775_v39  ;;  %v3221_v39 = vld [vmem:[#allocation8 + $0x20] sm:$0xff] }
 0xabd   : > { %4996 = vmatprep.mubr.msk.f32.mxu0 %vm1072_vm5, %v2776_v50  ;;  %5276 = vmatpush3.bf16.msra.mxu0 %v5273_v5  ;;  %v3218_v5 = vld [vmem:[#allocation8 + $0x8] sm:$0xff]  ;;  %v5283_v60 = vpack.c.bf16 %v3221_v39, %v3217_v6  ;;  %v3219_v50 = vld [vmem:[#allocation8 + $0x10] sm:$0xff] }
 0xabe   : > { %5278 = vmatprep.subr.bf16.mxu0 %v5277_v53  ;;  %v5281_v57 = vpack.c.bf16 %v3222_v40, %v3218_v5  ;;  %v5315_v13 = vpack.c.bf16 %v3223_v23, %v3219_v50  ;;  %v3242_v39 = vld [vmem:[#allocation8 + $0xc8] sm:$0xff]  ;;  %v3248_v23 = vld [vmem:[#allocation8 + $0xf8] sm:$0xff] }
 0xac0   : > { %4997 = vmatmul.mubr.msk.f32.gmra.mrb[42].mxu0 %vm1072_vm5, %v2777_v2  ;;  %v3226_v2 = vld [vmem:[#allocation8 + $0x48] sm:$0xff]  ;;  %5282 = vmatprep.subr.bf16.mxu1 %v5281_v57 }
 0xac1   : > { %4999 = vmatprep.mubr.msk.f32.mxu0 %vm1072_vm5, %v2778_v51  ;;  %5280 = vmatpush3.bf16.msra.mxu0 %v5277_v53  ;;  %v5313_v53 = vpack.c.bf16 %v3224_v16, %v3220_v14  ;;  %v3230_v51 = vld [vmem:[#allocation8 + $0x68] sm:$0xff] }
 0xac2   : > { %5284 = vmatpush1.bf16.msra.mxu1 %v5283_v60  ;;  %v3244_v60 = vld [vmem:[#allocation8 + $0xd8] sm:$0xff] }
 0xac3   : > { %5314 = vmatprep.subr.bf16.mxu0 %v5313_v53  ;;  %v3246_v53 = vld [vmem:[#allocation8 + $0xe8] sm:$0xff] }
 0xac4   : > { %5000 = vmatmul.mubr.msk.f32.gmra.mrb[44].mxu0 %vm1072_vm5, %v2779_v52  ;;  %v3228_v52 = vld [vmem:[#allocation8 + $0x58] sm:$0xff]  ;;  %v5293_v50 = vpack.c.bf16 %v3246_v53, %v3242_v39  ;;  %v3274_v39 = vld [vmem:[#allocation8 + $0x1c8] sm:$0xff] }
 0xac5   : > { %v3278_v53 = vld [vmem:[#allocation8 + $0x1e8] sm:$0xff] }
 0xad6   : > { %v2765_v63 = vpop.xlane.xlu0 %2764 }
 0xad7   : > { %5793 = vrcp.f32 %v2765_v63  ;;  %v3232_v63 = vld [vmem:[#allocation8 + $0x78] sm:$0xff] }
 0xada   : > { %v2762_v45 = vpop.xlane.xlu1 %2761 }
 0xadb   : > { %5795 = vrcp.f32 %v2762_v45  ;;  %v5285_v45 = vpack.c.bf16 %v3230_v51, %v3226_v2  ;;  %v3241_v2 = vld [vmem:[#allocation8 + $0xc0] sm:$0xff]  ;;  %v5325_v51 = vpack.c.bf16 %v3248_v23, %v3244_v60  ;;  %v3276_v60 = vld [vmem:[#allocation8 + $0x1d8] sm:$0xff] }
 0xadc   : > { %v3280_v23 = vld [vmem:[#allocation8 + $0x1f8] sm:$0xff] }
 0xadd   : > { %5286 = vmatprep.subr.bf16.mxu1 %v5285_v45  ;;  %v3247_v45 = vld [vmem:[#allocation8 + $0xf0] sm:$0xff] }
 0xae1   : > { %v5794_v21 = vpop.eup %5793 }
 0xae2   : > { %v2781_v28 = vmul.f32 %v5794_v21, %v7171_v56  ;;  %v4322_v56 = vld [vmem:[%s7599_s5] ss:$0 sm:$0xff]  ;;  %v5317_v21 = vpack.c.bf16 %v3232_v63, %v3228_v52  ;;  %v3243_v63 = vld [vmem:[#allocation8 + $0xd0] sm:$0xff] }
 0xae5   : > { %v5796_v32 = vpop.eup %5795 }
 0xae6   : > { %v2780_v4 = vmul.f32 %v5796_v32, %v7175_v55  ;;  %v3225_v32 = vld [vmem:[#allocation8 + $0x40] sm:$0xff] }
 0xae8   : > { %5002 = vmatprep.mubr.msk.f32.mxu0 %vm1072_vm5, %v2780_v4  ;;  %v3229_v4 = vld [vmem:[#allocation8 + $0x60] sm:$0xff] }
 0xae9   : > { %5003 = vmatmul.mubr.msk.f32.gmra.mrb[46].mxu0 %vm1072_vm5, %v2781_v28  ;;  %v3227_v28 = vld [vmem:[#allocation8 + $0x50] sm:$0xff] }
 0xb8f   : > { %v4995_v59 = vpop.f32.mrb[40].mxu0 }
 0xb90   : > { %v2896_v44 = vpop.f32.mrb[41].mxu0 }
 0xb91   : > { %5013 = vmatprep.mubr.msk.f32.mxu0 %vm918_vm0, %v2896_v44  ;;  %v3231_v44 = vld [vmem:[#allocation8 + $0x70] sm:$0xff] }
 0xb92   : > { %5014 = vmatmul.mubr.msk.f32.vlgmr.msra.gmra.mrb[24].mxu0 %vm918_vm0, %v4995_v59  ;;  %v5287_v59 = vpack.c.bf16 %v3229_v4, %v3225_v32  ;;  %v3250_v32 = vld [vmem:[#allocation8 + $0x108] sm:$0xff] }
 0xb93   : > { %v4998_v30 = vpop.f32.mrb[42].mxu0  ;;  %5316 = vmatpush1.bf16.msra.mxu0 %v5315_v13  ;;  %v3245_v13 = vld [vmem:[#allocation8 + $0xe0] sm:$0xff]  ;;  %v3254_v4 = vld [vmem:[#allocation8 + $0x128] sm:$0xff] }
 0xb94   : > { %v2906_v31 = vpop.f32.mrb[43].mxu0  ;;  %5318 = vmatprep.subr.bf16.mxu0 %v5317_v21  ;;  %5288 = vmatpush1.bf16.msra.mxu1 %v5287_v59  ;;  %v5295_v52 = vpack.c.bf16 %v3245_v13, %v3241_v2  ;;  %v5327_v21 = vpack.c.bf16 %v3247_v45, %v3243_v63  ;;  %v5297_v59 = vpack.c.bf16 %v3254_v4, %v3250_v32  ;;  %v3273_v2 = vld [vmem:[#allocation8 + $0x1c0] sm:$0xff]  ;;  %v3275_v63 = vld [vmem:[#allocation8 + $0x1d0] sm:$0xff] }
 0xb95   : > { %5016 = vmatprep.mubr.msk.f32.mxu0 %vm918_vm0, %v2906_v31  ;;  %v3238_v31 = vld [vmem:[#allocation8 + $0xa8] sm:$0xff]  ;;  %v3277_v13 = vld [vmem:[#allocation8 + $0x1e0] sm:$0xff]  ;;  %v3279_v45 = vld [vmem:[#allocation8 + $0x1f0] sm:$0xff] }
 0xb96   : > { %5017 = vmatmul.mubr.msk.f32.gmra.mrb[26].mxu0 %vm918_vm0, %v4998_v30  ;;  %v3234_v30 = vld [vmem:[#allocation8 + $0x88] sm:$0xff] }
 0xb97   : > { %v5001_v34 = vpop.f32.mrb[44].mxu0 }
 0xb98   : > { %v2916_v37 = vpop.f32.mrb[45].mxu0 }
 0xb99   : > { %5019 = vmatprep.mubr.msk.f32.mxu0 %vm918_vm0, %v2916_v37  ;;  %v5289_v37 = vpack.c.bf16 %v3238_v31, %v3234_v30  ;;  %v3249_v30 = vld [vmem:[#allocation8 + $0x100] sm:$0xff] }
 0xb9a   : > { %5020 = vmatmul.mubr.msk.f32.gmra.mrb[28].mxu0 %vm918_vm0, %v5001_v34  ;;  %v5319_v34 = vpack.c.bf16 %v3231_v44, %v3227_v28  ;;  %v3252_v28 = vld [vmem:[#allocation8 + $0x118] sm:$0xff]  ;;  %v3253_v31 = vld [vmem:[#allocation8 + $0x120] sm:$0xff] }
 0xb9b   : > { %5290 = vmatprep.subr.bf16.mxu1 %v5289_v37  ;;  %v3256_v44 = vld [vmem:[#allocation8 + $0x138] sm:$0xff]  ;;  %v5299_v37 = vpack.c.bf16 %v3253_v31, %v3249_v30 }
 0xb9c   : > { %5320 = vmatpush1.bf16.msra.mxu0 %v5319_v34  ;;  %v5329_v34 = vpack.c.bf16 %v3256_v44, %v3252_v28 }
 0xbbc   : > { %v5004_v25 = vpop.f32.mrb[46].mxu0 }
 0xbbd   : > { %v2926_v33 = vpop.f32.mrb[47].mxu0 }
 0xbbe   : > { %5022 = vmatprep.mubr.msk.f32.mxu0 %vm918_vm0, %v2926_v33  ;;  %v3240_v33 = vld [vmem:[#allocation8 + $0xb8] sm:$0xff] }
 0xbbf   : > { %5023 = vmatmul.mubr.msk.f32.gmra.mrb[30].mxu0 %vm918_vm0, %v5004_v25  ;;  %v3236_v25 = vld [vmem:[#allocation8 + $0x98] sm:$0xff] }
 0xbc0   : > { %3480 = vmatprep.mubr.f32.mxu0 %v6178_v54 }
 0xc65   : > { %v5015_v26 = vpop.f32.mrb[24].mxu0 }
 0xc66   : > { %v3084_v55 = vadd.f32 %v5015_v26, %v4322_v56  ;;  %v3029_v11 = vpop.f32.mrb[25].mxu0  ;;  %v5321_v26 = vpack.c.bf16 %v3240_v33, %v3236_v25  ;;  %v3251_v25 = vld [vmem:[#allocation8 + $0x110] sm:$0xff] }
 0xc67   : > { %v3083_v18 = vadd.f32 %v4322_v56, %v3029_v11  ;;  %v3235_v11 = vld [vmem:[#allocation8 + $0x90] sm:$0xff] }
 0xc68   : > { %v7216_v9 = vadd.f32 %v5941_v49, %v3084_v55  ;;  %v3237_v55 = vld [vmem:[#allocation8 + $0xa0] sm:$0xff]  ;;  %5322 = vmatprep.subr.bf16.mxu0 %v5321_v26  ;;  %v3255_v33 = vld [vmem:[#allocation8 + $0x130] sm:$0xff]  ;;  %v3258_v26 = vld [vmem:[#allocation8 + $0x148] sm:$0xff] }
 0xc69   : > { %v7219_v20 = vadd.f32 %v5942_v62, %v3083_v18  ;;  %v5018_v38 = vpop.f32.mrb[26].mxu0  ;;  %v3239_v18 = vld [vmem:[#allocation8 + $0xb0] sm:$0xff] }
 0xc6a   : > { %v3086_v7 = vadd.f32 %v5018_v38, %v4322_v56  ;;  %3103 = vadd.xlane.f32.xlu1 %v7216_v9  ;;  %v3039_v47 = vpop.f32.mrb[27].mxu0  ;;  %v5323_v62 = vpack.c.bf16 %v3239_v18, %v3235_v11  ;;  %v3260_v11 = vld [vmem:[#allocation8 + $0x158] sm:$0xff] }
 0xc6b   : > { %v3085_v19 = vadd.f32 %v4322_v56, %v3039_v47  ;;  %3101 = vadd.xlane.f32.xlu0 %v7219_v20 }
 0xc6c   : > { %v7224_v1 = vadd.f32 %v5943_v41, %v3086_v7  ;;  %5324 = vmatpush1.bf16.msra.mxu0 %v5323_v62  ;;  %v3257_v62 = vld [vmem:[#allocation8 + $0x140] sm:$0xff] }
 0xc6d   : > { %v7227_v24 = vadd.f32 %v5944_v10, %v3085_v19  ;;  %v5021_v27 = vpop.f32.mrb[28].mxu0  ;;  %5326 = vmatprep.subr.bf16.mxu0 %v5325_v51  ;;  %v5341_v51 = vpack.c.bf16 %v3280_v23, %v3276_v60 }
 0xc6e   : > { %v3088_v29 = vadd.f32 %v5021_v27, %v4322_v56  ;;  %3107 = vadd.xlane.f32.xlu1 %v7224_v1  ;;  %v3049_v48 = vpop.f32.mrb[29].mxu0 }
 0xc6f   : > { %v3087_v0 = vadd.f32 %v4322_v56, %v3049_v48  ;;  %3105 = vadd.xlane.f32.xlu0 %v7227_v24 }
 0xc70   : > { %v7232_v36 = vadd.f32 %v5945_v22, %v3088_v29  ;;  %5328 = vmatpush1.bf16.msra.mxu0 %v5327_v21  ;;  %v5343_v21 = vpack.c.bf16 %v3279_v45, %v3275_v63 }
 0xc71   : > { %v7235_v43 = vadd.f32 %v5946_v12, %v3087_v0  ;;  %5330 = vmatprep.subr.bf16.mxu0 %v5329_v34 }
 0xc72   : > { %3111 = vadd.xlane.f32.xlu1 %v7232_v36 }
 0xc73   : > { %3109 = vadd.xlane.f32.xlu0 %v7235_v43 }
 0xc92   : > { %v5024_v61 = vpop.f32.mrb[30].mxu0 }
 0xc93   : > { %v3090_v42 = vadd.f32 %v5024_v61, %v4322_v56  ;;  %v3059_v58 = vpop.f32.mrb[31].mxu0 }
 0xc94   : > { %v3089_v15 = vadd.f32 %v4322_v56, %v3059_v58  ;;  %v3233_v56 = vld [vmem:[#allocation8 + $0x80] sm:$0xff] }
 0xc95   : > { %v7240_v3 = vadd.f32 %v5947_v17, %v3090_v42  ;;  %v5291_v49 = vpack.c.bf16 %v3237_v55, %v3233_v56  ;;  %v5331_v56 = vpack.c.bf16 %v3255_v33, %v3251_v25  ;;  %v3262_v55 = vld [vmem:[#allocation8 + $0x168] sm:$0xff] }
 0xc96   : > { %v7243_v8 = vadd.f32 %v5948_v46, %v3089_v15  ;;  %v5301_v18 = vpack.c.bf16 %v3262_v55, %v3258_v26 }
 0xc97   : > { %3115 = vadd.xlane.f32.xlu1 %v7240_v3  ;;  %5292 = vmatpush1.bf16.msra.mxu1 %v5291_v49  ;;  %v3264_v49 = vld [vmem:[#allocation8 + $0x178] sm:$0xff] }
 0xc98   : > { %3113 = vadd.xlane.f32.xlu0 %v7243_v8  ;;  %5294 = vmatprep.subr.bf16.mxu1 %v5293_v50  ;;  %v5309_v50 = vpack.c.bf16 %v3278_v53, %v3274_v39 }
 0xc99   : > { %5332 = vmatpush1.bf16.msra.mxu0 %v5331_v56 }
 0xc9b   : > { %5296 = vmatpush1.bf16.msra.mxu1 %v5295_v52  ;;  %v5311_v52 = vpack.c.bf16 %v3277_v13, %v3273_v2 }
 0xc9c   : > { %5298 = vmatprep.subr.bf16.mxu1 %v5297_v59 }
 0xc9f   : > { %5300 = vmatpush1.bf16.msra.mxu1 %v5299_v37 }
 0xca0   : > { %5302 = vmatprep.subr.bf16.mxu1 %v5301_v18 }
 0xcf7   : > { %v3104_v38 = vpop.xlane.xlu1 %3103 }
 0xcf8   : > { %v3118_v7 = vmul.f32 0.0078125, %v3104_v38  ;;  %v3102_v47 = vpop.xlane.xlu0 %3101  ;;  %v3261_v38 = vld [vmem:[#allocation8 + $0x160] sm:$0xff] }
 0xcf9   : > { %v3117_v19 = vmul.f32 0.0078125, %v3102_v47  ;;  %v5303_v47 = vpack.c.bf16 %v3261_v38, %v3257_v62 }
 0xcfa   : > { %v7248_v41 = vsub.f32 %v7216_v9, %v3118_v7  ;;  %v5333_v7 = vpack.c.bf16 %v3264_v49, %v3260_v11 }
 0xcfb   : > { %v7251_v10 = vsub.f32 %v7219_v20, %v3117_v19  ;;  %v3108_v27 = vpop.xlane.xlu1 %3107  ;;  %v3259_v19 = vld [vmem:[#allocation8 + $0x150] sm:$0xff]  ;;  %5304 = vmatpush1.bf16.msra.mxu1 %v5303_v47 }
 0xcfc   : > { %v3120_v29 = vmul.f32 0.0078125, %v3108_v27  ;;  %v3106_v48 = vpop.xlane.xlu0 %3105  ;;  %v3134_v0 = vmul.f32 %v7248_v41, %v7248_v41  ;;  %v3263_v27 = vld [vmem:[#allocation8 + $0x170] sm:$0xff]  ;;  %5334 = vmatprep.subr.bf16.mxu0 %v5333_v7 }
 0xcfd   : > { %v3119_v22 = vmul.f32 0.0078125, %v3106_v48  ;;  %v3133_v12 = vmul.f32 %v7251_v10, %v7251_v10  ;;  %v3266_v48 = vld [vmem:[#allocation8 + $0x188] sm:$0xff] }
 0xcfe   : > { %v7258_v61 = vsub.f32 %v7224_v1, %v3120_v29  ;;  %3143 = vadd.xlane.f32.xlu1 %v3134_v0  ;;  %v5335_v29 = vpack.c.bf16 %v3263_v27, %v3259_v19  ;;  %v3270_v0 = vld [vmem:[#allocation8 + $0x1a8] sm:$0xff] }
 0xcff   : > { %v7261_v42 = vsub.f32 %v7227_v24, %v3119_v22  ;;  %v3112_v58 = vpop.xlane.xlu1 %3111  ;;  %3141 = vadd.xlane.f32.xlu0 %v3133_v12  ;;  %v3268_v22 = vld [vmem:[#allocation8 + $0x198] sm:$0xff]  ;;  %v5305_v12 = vpack.c.bf16 %v3270_v0, %v3266_v48 }
 0xd00   : > { %v3122_v15 = vmul.f32 0.0078125, %v3112_v58  ;;  %v3110_v17 = vpop.xlane.xlu0 %3109  ;;  %v3136_v46 = vmul.f32 %v7258_v61, %v7258_v61  ;;  %5336 = vmatpush1.bf16.msra.mxu0 %v5335_v29  ;;  %v3272_v58 = vld [vmem:[#allocation8 + $0x1b8] sm:$0xff] }
 0xd01   : > { %v3121_v5 = vmul.f32 0.0078125, %v3110_v17  ;;  %v3135_v40 = vmul.f32 %v7261_v42, %v7261_v42  ;;  %v3269_v17 = vld [vmem:[#allocation8 + $0x1a0] sm:$0xff]  ;;  %5306 = vmatprep.subr.bf16.mxu1 %v5305_v12 }
 0xd02   : > { %v7268_v14 = vsub.f32 %v7232_v36, %v3122_v15  ;;  %3147 = vadd.xlane.f32.xlu1 %v3136_v46  ;;  %v3265_v15 = vld [vmem:[#allocation8 + $0x180] sm:$0xff]  ;;  %v5337_v46 = vpack.c.bf16 %v3272_v58, %v3268_v22 }
 0xd03   : > { %v7271_v57 = vsub.f32 %v7235_v43, %v3121_v5  ;;  %3145 = vadd.xlane.f32.xlu0 %v3135_v40  ;;  %v5307_v5 = vpack.c.bf16 %v3269_v17, %v3265_v15  ;;  %v3267_v40 = vld [vmem:[#allocation8 + $0x190] sm:$0xff]  ;;  %v7290_v58 = vld [vmem:[%s7600_s6] ss:$0 sm:$0xff] }
 0xd04   : > { %v3138_v16 = vmul.f32 %v7268_v14, %v7268_v14  ;;  %5338 = vmatprep.subr.bf16.mxu0 %v5337_v46  ;;  %v7297_v46 = vld [vmem:[%s7601_s7] ss:$0 sm:$0xff] }
 0xd05   : > { %v3137_v6 = vmul.f32 %v7271_v57, %v7271_v57  ;;  %5308 = vmatpush1.bf16.msra.mxu1 %v5307_v5 }
 0xd06   : > { %3151 = vadd.xlane.f32.xlu1 %v3138_v16  ;;  %v3271_v16 = vld [vmem:[#allocation8 + $0x1b0] sm:$0xff]  ;;  %5310 = vmatprep.subr.bf16.mxu1 %v5309_v50 }
 0xd07   : > { %3149 = vadd.xlane.f32.xlu0 %v3137_v6  ;;  %v5339_v6 = vpack.c.bf16 %v3271_v16, %v3267_v40 }
 0xd09   : > { %5340 = vmatpush1.bf16.msra.mxu0 %v5339_v6  ;;  %5312 = vmatpush1.bf16.msra.mxu1 %v5311_v52 }
 0xd0a   : > { %5342 = vmatprep.subr.bf16.mxu0 %v5341_v51 }
 0xd0d   : > { %5344 = vmatpush1.bf16.msra.mxu0 %v5343_v21 }
 0xd24   : > { %v3116_v32 = vpop.xlane.xlu1 %3115 }
 0xd25   : > { %v3124_v4 = vmul.f32 0.0078125, %v3116_v32  ;;  %v3114_v28 = vpop.xlane.xlu0 %3113 }
 0xd26   : > { %v3123_v59 = vmul.f32 0.0078125, %v3114_v28 }
 0xd27   : > { %v7278_v44 = vsub.f32 %v7240_v3, %v3124_v4 }
 0xd28   : > { %v7281_v30 = vsub.f32 %v7243_v8, %v3123_v59 }
 0xd29   : > { %v3140_v31 = vmul.f32 %v7278_v44, %v7278_v44 }
 0xd2a   : > { %v3139_v34 = vmul.f32 %v7281_v30, %v7281_v30 }
 0xd2b   : > { %3155 = vadd.xlane.f32.xlu1 %v3140_v31 }
 0xd2c   : > { %3153 = vadd.xlane.f32.xlu0 %v3139_v34 }
 0xd8b   : > { %v3144_v37 = vpop.xlane.xlu1 %3143 }
 0xd8c   : > { %v3158_v25 = vmul.f32 0.0078125, %v3144_v37  ;;  %v3142_v33 = vpop.xlane.xlu0 %3141 }
 0xd8d   : > { %v3157_v56 = vmul.f32 0.0078125, %v3142_v33 }
 0xd8e   : > { %v3166_v26 = vadd.f32 1e-05, %v3158_v25 }
 0xd8f   : > { %v3165_v55 = vadd.f32 1e-05, %v3157_v56  ;;  %v3148_v11 = vpop.xlane.xlu1 %3147 }
 0xd90   : > { %5797 = vrsqrt.f32 %v3166_v26  ;;  %v3160_v18 = vmul.f32 0.0078125, %v3148_v11  ;;  %v3146_v49 = vpop.xlane.xlu0 %3145  ;;  %v3769_v11 = vld [vmem:[#allocation10 + $0x80] sm:$0xff] }
 0xd91   : > { %5799 = vrsqrt.f32 %v3165_v55  ;;  %v3159_v62 = vmul.f32 0.0078125, %v3146_v49  ;;  %v3802_v49 = vld [vmem:[#allocation10 + $0x188] sm:$0xff] }
 0xd92   : > { %v3168_v38 = vadd.f32 1e-05, %v3160_v18  ;;  %v3801_v18 = vld [vmem:[#allocation10 + $0x180] sm:$0xff] }
 0xd93   : > { %v3167_v7 = vadd.f32 1e-05, %v3159_v62  ;;  %v3152_v47 = vpop.xlane.xlu1 %3151  ;;  %v3753_v62 = vld [vmem:[#allocation10] sm:$0xff] }
 0xd94   : > { %v3150_v19 = vpop.xlane.xlu0 %3149  ;;  %v3162_v29 = vmul.f32 0.0078125, %v3152_v47 }
 0xd95   : > { %5801 = vrsqrt.f32 %v3167_v7  ;;  %v3161_v27 = vmul.f32 0.0078125, %v3150_v19  ;;  %v5377_v7 = vpack.c.bf16 %v3802_v49, %v3801_v18  ;;  %v3785_v19 = vld [vmem:[#allocation10 + $0x100] sm:$0xff] }
 0xd96   : > { %5803 = vrsqrt.f32 %v3168_v38  ;;  %v3170_v12 = vadd.f32 1e-05, %v3162_v29  ;;  %v3754_v38 = vld [vmem:[#allocation10 + $0x8] sm:$0xff]  ;;  %v3793_v18 = vld [vmem:[#allocation10 + $0x140] sm:$0xff] }
 0xd97   : > { %v3169_v48 = vadd.f32 1e-05, %v3161_v27  ;;  %v5347_v47 = vpack.c.bf16 %v3754_v38, %v3753_v62  ;;  %v3786_v27 = vld [vmem:[#allocation10 + $0x108] sm:$0xff]  ;;  %5378 = vmatprep.subr.bf16.mxu0 %v5377_v7  ;;  %v3779_v62 = vld [vmem:[#allocation10 + $0xd0] sm:$0xff]  ;;  %v3780_v38 = vld [vmem:[#allocation10 + $0xd8] sm:$0xff] }
 0xd98   : > { %v5379_v29 = vpack.c.bf16 %v3786_v27, %v3785_v19  ;;  %v3811_v7 = vld [vmem:[#allocation10 + $0x1d0] sm:$0xff]  ;;  %v3812_v19 = vld [vmem:[#allocation10 + $0x1d8] sm:$0xff] }
 0xd99   : > { %5805 = vrsqrt.f32 %v3169_v48  ;;  %v3772_v48 = vld [vmem:[#allocation10 + $0x98] sm:$0xff]  ;;  %v3763_v27 = vld [vmem:[#allocation10 + $0x50] sm:$0xff] }
 0xd9a   : > { %v5798_v0 = vpop.eup %5797  ;;  %5807 = vrsqrt.f32 %v3170_v12  ;;  %v3804_v12 = vld [vmem:[#allocation10 + $0x198] sm:$0xff] }
 0xd9b   : > { %v5800_v22 = vpop.eup %5799  ;;  %v3182_v17 = vmul.f32 %v5798_v0, %v7248_v41  ;;  %v3803_v0 = vld [vmem:[#allocation10 + $0x190] sm:$0xff] }
 0xd9c   : > { %v3181_v15 = vmul.f32 %v5800_v22, %v7251_v10 }
 0xd9d   : > { %v3196_v6 = vmul.f32 %v7290_v58, %v3182_v17  ;;  %v5381_v17 = vpack.c.bf16 %v3804_v12, %v3803_v0  ;;  %v3795_v0 = vld [vmem:[#allocation10 + $0x150] sm:$0xff] }
 0xd9e   : > { %v3195_v5 = vmul.f32 %v7290_v58, %v3181_v15  ;;  %v3756_v15 = vld [vmem:[#allocation10 + $0x18] sm:$0xff] }
 0xd9f   : > { %v5802_v40 = vpop.eup %5801  ;;  %v3210_v41 = vadd.f32 %v7297_v46, %v3196_v6  ;;  %v3773_v6 = vld [vmem:[#allocation10 + $0xa0] sm:$0xff] }
 0xda0   : > { %v3209_v16 = vadd.f32 %v7297_v46, %v3195_v5  ;;  %v3183_v39 = vmul.f32 %v5802_v40, %v7261_v42  ;;  %v5804_v53 = vpop.eup %5803  ;;  %v3787_v5 = vld [vmem:[#allocation10 + $0x110] sm:$0xff]  ;;  %v3788_v40 = vld [vmem:[#allocation10 + $0x118] sm:$0xff] }
 0xda1   : > { %v3184_v60 = vmul.f32 %v5804_v53, %v7258_v61  ;;  %v3805_v53 = vld [vmem:[#allocation10 + $0x1a0] sm:$0xff] }
 0xda2   : > { %3368 = vmatmul.mubr.f32.vlgmr.msra.gmra.mrb[48].mxu1 %v3209_v16  ;;  %3481 = vmatmul.mubr.f32.vlgmr.msra.gmra.mrb[48].mxu0 %v3209_v16  ;;  %v3197_v10 = vmul.f32 %v7290_v58, %v3183_v39  ;;  %v5383_v16 = vpack.c.bf16 %v3788_v40, %v3787_v5  ;;  %v3774_v39 = vld [vmem:[#allocation10 + $0xa8] sm:$0xff]  ;;  %v3765_v40 = vld [vmem:[#allocation10 + $0x60] sm:$0xff] }
 0xda3   : > { %3373 = vmatprep.mubr.f32.mxu1 %v6178_v54  ;;  %3486 = vmatprep.mubr.f32.mxu0 %v6178_v54  ;;  %v5806_v50 = vpop.eup %5805  ;;  %v3198_v23 = vmul.f32 %v7290_v58, %v3184_v60  ;;  %v3757_v60 = vld [vmem:[#allocation10 + $0x20] sm:$0xff]  ;;  %v3814_v5 = vld [vmem:[#allocation10 + $0x1e8] sm:$0xff] }
 0xda4   : > { %v3211_v42 = vadd.f32 %v7297_v46, %v3197_v10  ;;  %v3185_v2 = vmul.f32 %v5806_v50, %v7271_v57  ;;  %v5808_v13 = vpop.eup %5807  ;;  %5380 = vmatpush3.bf16.msra.mxu0 %v5379_v29  ;;  %v3806_v10 = vld [vmem:[#allocation10 + $0x1a8] sm:$0xff]  ;;  %v3764_v29 = vld [vmem:[#allocation10 + $0x58] sm:$0xff] }
 0xda5   : > { %v3212_v61 = vadd.f32 %v7297_v46, %v3198_v23  ;;  %v3186_v52 = vmul.f32 %v5808_v13, %v7268_v14  ;;  %5382 = vmatprep.subr.bf16.mxu0 %v5381_v17  ;;  %v3758_v50 = vld [vmem:[#allocation10 + $0x28] sm:$0xff]  ;;  %v3813_v17 = vld [vmem:[#allocation10 + $0x1e0] sm:$0xff] }
 0xda6   : > { %3374 = vmatmul.mubr.f32.gmra.mrb[50].mxu1 %v3210_v41  ;;  %3487 = vmatmul.mubr.f32.gmra.mrb[50].mxu0 %v3210_v41  ;;  %v3199_v51 = vmul.f32 %v7290_v58, %v3185_v2  ;;  %v5353_v41 = vpack.c.bf16 %v3774_v39, %v3773_v6  ;;  %v5355_v23 = vpack.c.bf16 %v3758_v50, %v3757_v60  ;;  %v3789_v2 = vld [vmem:[#allocation10 + $0x120] sm:$0xff]  ;;  %v3790_v13 = vld [vmem:[#allocation10 + $0x128] sm:$0xff]  ;;  %v3783_v60 = vld [vmem:[#allocation10 + $0xf0] sm:$0xff] }
 0xda7   : > { %3379 = vmatprep.mubr.f32.mxu1 %v6178_v54  ;;  %3492 = vmatprep.mubr.f32.mxu0 %v6178_v54  ;;  %v3200_v63 = vmul.f32 %v7290_v58, %v3186_v52  ;;  %v3776_v52 = vld [vmem:[#allocation10 + $0xb8] sm:$0xff]  ;;  %v5401_v6 = vpack.c.bf16 %v3814_v5, %v3813_v17 }
 0xda8   : > { %v3213_v57 = vadd.f32 %v7297_v46, %v3199_v51  ;;  %5384 = vmatpush3.bf16.msra.mxu0 %v5383_v16  ;;  %v3775_v51 = vld [vmem:[#allocation10 + $0xb0] sm:$0xff]  ;;  %v3766_v16 = vld [vmem:[#allocation10 + $0x68] sm:$0xff]  ;;  %v3784_v50 = vld [vmem:[#allocation10 + $0xf8] sm:$0xff] }
 0xda9   : > { %v3214_v45 = vadd.f32 %v7297_v46, %v3200_v63  ;;  %v5357_v63 = vpack.c.bf16 %v3776_v52, %v3775_v51  ;;  %v5371_v39 = vpack.c.bf16 %v3766_v16, %v3765_v40 }
 0xdaa   : > { %3380 = vmatmul.mubr.f32.gmra.mrb[52].mxu1 %v3211_v42  ;;  %3493 = vmatmul.mubr.f32.gmra.mrb[52].mxu0 %v3211_v42  ;;  %v5385_v42 = vpack.c.bf16 %v3806_v10, %v3805_v53  ;;  %v3797_v53 = vld [vmem:[#allocation10 + $0x160] sm:$0xff] }
 0xdab   : > { %3385 = vmatprep.mubr.f32.mxu1 %v6178_v54  ;;  %3498 = vmatprep.mubr.f32.mxu0 %v6178_v54 }
 0xdac   : > { %5386 = vmatprep.subr.bf16.mxu0 %v5385_v42  ;;  %v3815_v42 = vld [vmem:[#allocation10 + $0x1f0] sm:$0xff] }
 0xdae   : > { %3386 = vmatmul.mubr.f32.gmra.mrb[54].mxu1 %v3212_v61  ;;  %3499 = vmatmul.mubr.f32.gmra.mrb[54].mxu0 %v3212_v61  ;;  %v5387_v61 = vpack.c.bf16 %v3790_v13, %v3789_v2  ;;  %v3816_v2 = vld [vmem:[#allocation10 + $0x1f8] sm:$0xff]  ;;  %v3767_v13 = vld [vmem:[#allocation10 + $0x70] sm:$0xff] }
 0xdaf   : > { %3391 = vmatprep.mubr.f32.mxu1 %v6178_v54  ;;  %3504 = vmatprep.mubr.f32.mxu0 %v6178_v54  ;;  %v5405_v51 = vpack.c.bf16 %v3816_v2, %v3815_v42 }
 0xdb0   : > { %5388 = vmatpush3.bf16.msra.mxu0 %v5387_v61  ;;  %v3768_v61 = vld [vmem:[#allocation10 + $0x78] sm:$0xff] }
 0xdb1   : > { %v5375_v52 = vpack.c.bf16 %v3768_v61, %v3767_v13 }
 0xdb2   : > { %3392 = vmatmul.mubr.f32.gmra.mrb[56].mxu1 %v3213_v57  ;;  %3505 = vmatmul.mubr.f32.gmra.mrb[56].mxu0 %v3213_v57  ;;  %v3807_v57 = vld [vmem:[#allocation10 + $0x1b0] sm:$0xff] }
 0xdb3   : > { %3397 = vmatprep.mubr.f32.mxu1 %v6178_v54  ;;  %3510 = vmatprep.mubr.f32.mxu0 %v6178_v54 }
 0xdb6   : > { %3398 = vmatmul.mubr.f32.gmra.mrb[58].mxu1 %v3214_v45  ;;  %3511 = vmatmul.mubr.f32.gmra.mrb[58].mxu0 %v3214_v45  ;;  %v3808_v45 = vld [vmem:[#allocation10 + $0x1b8] sm:$0xff] }
 0xdb7   : > { %3403 = vmatprep.mubr.f32.mxu1 %v6178_v54  ;;  %3516 = vmatprep.mubr.f32.mxu0 %v6178_v54 }
 0xdb8   : > { %v3156_v14 = vpop.xlane.xlu1 %3155 }
 0xdb9   : > { %v3164_v21 = vmul.f32 0.0078125, %v3156_v14  ;;  %v3154_v32 = vpop.xlane.xlu0 %3153  ;;  %v3759_v14 = vld [vmem:[#allocation10 + $0x30] sm:$0xff] }
 0xdba   : > { %v3163_v4 = vmul.f32 0.0078125, %v3154_v32  ;;  %v5389_v32 = vpack.c.bf16 %v3808_v45, %v3807_v57  ;;  %v3799_v57 = vld [vmem:[#allocation10 + $0x170] sm:$0xff] }
 0xdbb   : > { %v3172_v28 = vadd.f32 1e-05, %v3164_v21  ;;  %v3760_v21 = vld [vmem:[#allocation10 + $0x38] sm:$0xff] }
 0xdbc   : > { %v3171_v59 = vadd.f32 1e-05, %v3163_v4  ;;  %v5359_v4 = vpack.c.bf16 %v3760_v21, %v3759_v14  ;;  %5390 = vmatprep.subr.bf16.mxu0 %v5389_v32  ;;  %v3285_v14 = vsub.s32 0, %v6636_v35  ;;  %v3293_v21 = vsub.s32 2, %v6636_v35  ;;  %v3281_v32 = vld [vmem:[%s7636_s11] sm:$0xf] }
 0xdbd   : > { %5809 = vrsqrt.f32 %v3172_v28  ;;  %v3791_v28 = vld [vmem:[#allocation10 + $0x130] sm:$0xff]  ;;  %s6097_s11 = scalar_lea.vmem %s6096_s29, 2048 }
 0xdbe   : > { %5811 = vrsqrt.f32 %v3171_v59  ;;  %v3792_v59 = vld [vmem:[#allocation10 + $0x138] sm:$0xff]  ;;  %p6099_p2 = scmp.lt.s32.totalorder %s6097_s11, %s6091_s27 }
 0xdc0   : > { %p6100_p1 = por %p6099_p2, %p6098_p12 }
 0xdc2   : > { %p6101_p13 = pnand %p6100_p1, %p6094_p7 }
 0xdc7   : > { %v5810_v31 = vpop.eup %5809 }
 0xdc8   : > { %v5812_v34 = vpop.eup %5811  ;;  %v3188_v25 = vmul.f32 %v5810_v31, %v7278_v44  ;;  %v5391_v31 = vpack.c.bf16 %v3792_v59, %v3791_v28  ;;  %v3297_v28 = vsub.s32 3, %v6636_v35  ;;  %v7342_v59 = vrot.slane %v3281_v32, %v3285_v14 }
 0xdc9   : > { %v3187_v37 = vmul.f32 %v5812_v34, %v7281_v30  ;;  %v3770_v30 = vld [vmem:[#allocation10 + $0x88] sm:$0xff]  ;;  %v3777_v34 = vld [vmem:[#allocation10 + $0xc0] sm:$0xff] }
 0xdca   : > { %v3202_v26 = vmul.f32 %v7290_v58, %v3188_v25  ;;  %v5345_v44 = vpack.c.bf16 %v3770_v30, %v3769_v11  ;;  %v3809_v25 = vld [vmem:[#allocation10 + $0x1c0] sm:$0xff]  ;;  %5392 = vmatpush3.bf16.msra.mxu0 %v5391_v31  ;;  %v7344_v31 = vrot.slane %v3281_v32, %v3293_v21 }
 0xdcb   : > { %v3201_v33 = vmul.f32 %v7290_v58, %v3187_v37  ;;  %v3755_v58 = vld [vmem:[#allocation10 + $0x10] sm:$0xff]  ;;  %v3778_v37 = vld [vmem:[#allocation10 + $0xc8] sm:$0xff] }
 0xdcc   : > { %v3216_v55 = vadd.f32 %v7297_v46, %v3202_v26  ;;  %5346 = vmatprep.subr.bf16.mxu1 %v5345_v44  ;;  %v3761_v26 = vld [vmem:[#allocation10 + $0x40] sm:$0xff]  ;;  %v3794_v44 = vld [vmem:[#allocation10 + $0x148] sm:$0xff] }
 0xdcd   : > { %v3215_v56 = vadd.f32 %v7297_v46, %v3201_v33  ;;  %5348 = vmatpush3.bf16.msra.mxu1 %v5347_v47  ;;  %v5351_v46 = vpack.c.bf16 %v3756_v15, %v3755_v58  ;;  %v5361_v33 = vpack.c.bf16 %v3778_v37, %v3777_v34  ;;  %v5395_v49 = vpack.c.bf16 %v3794_v44, %v3793_v18  ;;  %v3781_v58 = vld [vmem:[#allocation10 + $0xe0] sm:$0xff]  ;;  %v3782_v15 = vld [vmem:[#allocation10 + $0xe8] sm:$0xff] }
 0xdce   : > { %v5365_v47 = vpack.c.bf16 %v3780_v38, %v3779_v62  ;;  %v7348_v37 = vrot.slane %v3281_v32, %v3297_v28 }
 0xdcf   : > { %3404 = vmatmul.mubr.f32.gmra.mrb[60].mxu1 %v3215_v56  ;;  %3517 = vmatmul.mubr.f32.gmra.mrb[60].mxu0 %v3215_v56  ;;  %v3810_v56 = vld [vmem:[#allocation10 + $0x1c8] sm:$0xff] }
 0xdd0   : > { %3409 = vmatprep.mubr.f32.mxu1 %v6178_v54  ;;  %3522 = vmatprep.mubr.f32.mxu0 %v6178_v54  ;;  %v3771_v54 = vld [vmem:[#allocation10 + $0x90] sm:$0xff]  ;;  %v5393_v11 = vpack.c.bf16 %v3810_v56, %v3809_v25 }
 0xdd1   : > { %v5349_v22 = vpack.c.bf16 %v3772_v48, %v3771_v54  ;;  %v5397_v54 = vpack.c.bf16 %v3812_v19, %v3811_v7  ;;  %v5367_v48 = vpack.c.bf16 %v3764_v29, %v3763_v27 }
 0xdd2   : > { %5394 = vmatprep.subr.bf16.mxu0 %v5393_v11 }
 0xdd3   : > { %3410 = vmatmul.mubr.f32.gmra.mrb[62].mxu1 %v3216_v55  ;;  %3523 = vmatmul.mubr.f32.gmra.mrb[62].mxu0 %v3216_v55  ;;  %v3762_v55 = vld [vmem:[#allocation10 + $0x48] sm:$0xff] }
 0xdd4   : > { %5350 = vmatprep.subr.bf16.mxu1 %v5349_v22  ;;  %v5363_v30 = vpack.c.bf16 %v3762_v55, %v3761_v26  ;;  %5396 = vmatpush3.bf16.msra.mxu0 %v5395_v49  ;;  %v3796_v22 = vld [vmem:[#allocation10 + $0x158] sm:$0xff] }
 0xdd5   : > { %5352 = vmatpush3.bf16.msra.mxu1 %v5351_v46  ;;  %v5399_v12 = vpack.c.bf16 %v3796_v22, %v3795_v0  ;;  %5398 = vmatprep.subr.bf16.mxu0 %v5397_v54  ;;  %v5369_v46 = vpack.c.bf16 %v3782_v15, %v3781_v58 }
 0xdd6   : > { %5354 = vmatprep.subr.bf16.mxu1 %v5353_v41  ;;  %v3798_v41 = vld [vmem:[#allocation10 + $0x168] sm:$0xff] }
 0xdd7   : > { %v5403_v10 = vpack.c.bf16 %v3798_v41, %v3797_v53 }
 0xdd8   : > { %5400 = vmatpush3.bf16.msra.mxu0 %v5399_v12 }
 0xdd9   : > { %5356 = vmatpush3.bf16.msra.mxu1 %v5355_v23  ;;  %5402 = vmatprep.subr.bf16.mxu0 %v5401_v6  ;;  %v5373_v23 = vpack.c.bf16 %v3784_v50, %v3783_v60 }
 0xdda   : > { %5358 = vmatprep.subr.bf16.mxu1 %v5357_v63  ;;  %v3800_v63 = vld [vmem:[#allocation10 + $0x178] sm:$0xff] }
 0xddb   : > { %v5407_v45 = vpack.c.bf16 %v3800_v63, %v3799_v57 }
 0xddc   : > { %5404 = vmatpush3.bf16.msra.mxu0 %v5403_v10 }
 0xddd   : > { %5360 = vmatpush3.bf16.msra.mxu1 %v5359_v4  ;;  %5406 = vmatprep.subr.bf16.mxu0 %v5405_v51  ;;  %v3289_v4 = vsub.s32 1, %v6636_v35 }
 0xdde   : > { %5362 = vmatprep.subr.bf16.mxu1 %v5361_v33 }
 0xddf   : > { %v7346_v34 = vrot.slane %v3281_v32, %v3289_v4 }
 0xde0   : > { %5408 = vmatpush3.bf16.msra.mxu0 %v5407_v45 }
 0xde1   : > { %5364 = vmatpush3.bf16.msra.mxu1 %v5363_v30 }
 0xde2   : > { %5366 = vmatprep.subr.bf16.mxu1 %v5365_v47 }
 0xde5   : > { %5368 = vmatpush3.bf16.msra.mxu1 %v5367_v48 }
 0xde6   : > { %5370 = vmatprep.subr.bf16.mxu1 %v5369_v46 }
 0xde9   : > { %5372 = vmatpush3.bf16.msra.mxu1 %v5371_v39 }
 0xdea   : > { %5374 = vmatprep.subr.bf16.mxu1 %v5373_v23 }
 0xded   : > { %5376 = vmatpush3.bf16.msra.mxu1 %v5375_v52 }
 0xe75   : > { %v3369_v25 = vpop.f32.mrb[48].mxu1  ;;  %v3482_v33 = vpop.f32.mrb[48].mxu0 }
 0xe76   : > { %v7351_v56 = vadd.f32 %v3369_v25, %v7342_v59  ;;  %v7354_v26 = vadd.f32 %v3482_v33, %v7344_v31  ;;  %v3371_v55 = vpop.f32.mrb[49].mxu1  ;;  %v3484_v11 = vpop.f32.mrb[49].mxu0 }
 0xe77   : > { %v7357_v35 = vadd.f32 %v3371_v55, %v7346_v34  ;;  %v7360_v30 = vadd.f32 %v3484_v11, %v7348_v37 }
 0xe78   : > { %v4325_v18 = vmul.f32 -1.442695, %v7351_v56  ;;  %v4327_v44 = vmul.f32 -1.442695, %v7354_v26 }
 0xe79   : > { %v4326_v49 = vmul.f32 -1.442695, %v7357_v35  ;;  %v4328_v62 = vmul.f32 -1.442695, %v7360_v30  ;;  %v3375_v38 = vpop.f32.mrb[50].mxu1  ;;  %v3488_v7 = vpop.f32.mrb[50].mxu0 }
 0xe7a   : > { %5813 = vpow2.f32 %v4325_v18  ;;  %v7367_v47 = vadd.f32 %v3375_v38, %v7342_v59  ;;  %v7370_v19 = vadd.f32 %v3488_v7, %v7344_v31  ;;  %v3377_v27 = vpop.f32.mrb[51].mxu1  ;;  %v3490_v29 = vpop.f32.mrb[51].mxu0 }
 0xe7b   : > { %5815 = vpow2.f32 %v4327_v44  ;;  %v7373_v54 = vadd.f32 %v3377_v27, %v7346_v34  ;;  %v7376_v48 = vadd.f32 %v3490_v29, %v7348_v37 }
 0xe7c   : > { %5817 = vpow2.f32 %v4326_v49  ;;  %v4329_v0 = vmul.f32 -1.442695, %v7367_v47  ;;  %v4331_v22 = vmul.f32 -1.442695, %v7370_v19 }
 0xe7d   : > { %5819 = vpow2.f32 %v4328_v62  ;;  %v4330_v12 = vmul.f32 -1.442695, %v7373_v54  ;;  %v4332_v58 = vmul.f32 -1.442695, %v7376_v48  ;;  %v3381_v15 = vpop.f32.mrb[52].mxu1  ;;  %v3494_v17 = vpop.f32.mrb[52].mxu0 }
 0xe7e   : > { %5821 = vpow2.f32 %v4329_v0  ;;  %v7383_v46 = vadd.f32 %v3381_v15, %v7342_v59  ;;  %v7386_v5 = vadd.f32 %v3494_v17, %v7344_v31  ;;  %v3383_v40 = vpop.f32.mrb[53].mxu1  ;;  %v3496_v16 = vpop.f32.mrb[53].mxu0 }
 0xe7f   : > { %5823 = vpow2.f32 %v4331_v22  ;;  %v7389_v6 = vadd.f32 %v3383_v40, %v7346_v34  ;;  %v7392_v39 = vadd.f32 %v3496_v16, %v7348_v37 }
 0xe80   : > { %5825 = vpow2.f32 %v4330_v12  ;;  %v4333_v53 = vmul.f32 -1.442695, %v7383_v46  ;;  %v4335_v41 = vmul.f32 -1.442695, %v7386_v5 }
 0xe81   : > { %5827 = vpow2.f32 %v4332_v58  ;;  %v4334_v10 = vmul.f32 -1.442695, %v7389_v6  ;;  %v4336_v60 = vmul.f32 -1.442695, %v7392_v39  ;;  %v3387_v50 = vpop.f32.mrb[54].mxu1  ;;  %v3500_v42 = vpop.f32.mrb[54].mxu0 }
 0xe82   : > { %5829 = vpow2.f32 %v4333_v53  ;;  %v7399_v23 = vadd.f32 %v3387_v50, %v7342_v59  ;;  %v3389_v2 = vpop.f32.mrb[55].mxu1  ;;  %v3502_v13 = vpop.f32.mrb[55].mxu0  ;;  %v7403_v58 = vadd.f32 %v3500_v42, %v7344_v31 }
 0xe83   : > { %5831 = vpow2.f32 %v4335_v41  ;;  %v7406_v40 = vadd.f32 %v3389_v2, %v7346_v34  ;;  %v7409_v41 = vadd.f32 %v3502_v13, %v7348_v37 }
 0xe84   : > { %v5814_v61 = vpop.eup %5813  ;;  %5833 = vpow2.f32 %v4334_v10  ;;  %v4337_v51 = vmul.f32 -1.442695, %v7399_v23  ;;  %v4339_v2 = vmul.f32 -1.442695, %v7403_v58 }
 0xe85   : > { %v5816_v52 = vpop.eup %5815  ;;  %v3625_v57 = vadd.f32 1.0, %v5814_v61  ;;  %5835 = vpow2.f32 %v4336_v60  ;;  %v3393_v63 = vpop.f32.mrb[56].mxu1  ;;  %v4338_v13 = vmul.f32 -1.442695, %v7406_v40 }
 0xe86   : > { %v5818_v45 = vpop.eup %5817  ;;  %v3627_v14 = vadd.f32 1.0, %v5816_v52  ;;  %5837 = vpow2.f32 %v4337_v51  ;;  %v3506_v21 = vpop.f32.mrb[56].mxu0  ;;  %v7412_v50 = vadd.f32 %v3393_v63, %v7342_v59  ;;  %v4340_v63 = vmul.f32 -1.442695, %v7409_v41 }
 0xe87   : > { %v3395_v32 = vpop.f32.mrb[57].mxu1  ;;  %v5820_v4 = vpop.eup %5819  ;;  %5839 = vrcp.f32 %v3625_v57  ;;  %v3626_v28 = vadd.f32 1.0, %v5818_v45  ;;  %v7415_v42 = vadd.f32 %v3506_v21, %v7344_v31 }
 0xe88   : > { %v3508_v25 = vpop.f32.mrb[57].mxu0  ;;  %v5822_v33 = vpop.eup %5821  ;;  %5841 = vrcp.f32 %v3627_v14  ;;  %v3628_v55 = vadd.f32 1.0, %v5820_v4  ;;  %v7419_v52 = vadd.f32 %v3395_v32, %v7346_v34  ;;  %v4341_v4 = vmul.f32 -1.442695, %v7412_v50 }
 0xe89   : > { %v5824_v11 = vpop.eup %5823  ;;  %5843 = vrcp.f32 %v3626_v28  ;;  %v3629_v18 = vadd.f32 1.0, %v5822_v33  ;;  %v3399_v44 = vpop.f32.mrb[58].mxu1  ;;  %v7424_v14 = vadd.f32 %v3508_v25, %v7348_v37  ;;  %v4343_v28 = vmul.f32 -1.442695, %v7415_v42 }
 0xe8a   : > { %v5826_v49 = vpop.eup %5825  ;;  %5845 = vrcp.f32 %v3628_v55  ;;  %v3631_v62 = vadd.f32 1.0, %v5824_v11  ;;  %v3512_v38 = vpop.f32.mrb[58].mxu0  ;;  %v7429_v33 = vadd.f32 %v3399_v44, %v7342_v59  ;;  %v4342_v11 = vmul.f32 -1.442695, %v7419_v52 }
 0xe8b   : > { %v3401_v7 = vpop.f32.mrb[59].mxu1  ;;  %v5828_v27 = vpop.eup %5827  ;;  %5847 = vrcp.f32 %v3629_v18  ;;  %v3630_v29 = vadd.f32 1.0, %v5826_v49  ;;  %v7434_v18 = vadd.f32 %v3512_v38, %v7344_v31 }
 0xe8c   : > { %v3514_v0 = vpop.f32.mrb[59].mxu0  ;;  %v5830_v22 = vpop.eup %5829  ;;  %5849 = vrcp.f32 %v3631_v62  ;;  %v3632_v12 = vadd.f32 1.0, %v5828_v27  ;;  %v7439_v27 = vadd.f32 %v3401_v7, %v7346_v34 }
 0xe8d   : > { %v5832_v15 = vpop.eup %5831  ;;  %5851 = vrcp.f32 %v3630_v29  ;;  %v3633_v17 = vadd.f32 1.0, %v5830_v22  ;;  %v7444_v22 = vadd.f32 %v3514_v0, %v7348_v37 }
 0xe8e   : > { %v5834_v16 = vpop.eup %5833  ;;  %5853 = vrcp.f32 %v3632_v12  ;;  %v3635_v53 = vadd.f32 1.0, %v5832_v15  ;;  %v4347_v12 = vmul.f32 -1.442695, %v7434_v18 }
 0xe8f   : > { %v5836_v10 = vpop.eup %5835  ;;  %5855 = vrcp.f32 %v3633_v17  ;;  %v3634_v60 = vadd.f32 1.0, %v5834_v16  ;;  %v4346_v17 = vmul.f32 -1.442695, %v7439_v27 }
 0xe90   : > { %v5838_v61 = vpop.eup %5837  ;;  %5857 = vrcp.f32 %v3635_v53  ;;  %v3636_v51 = vadd.f32 1.0, %v5836_v10  ;;  %v4348_v10 = vmul.f32 -1.442695, %v7444_v22 }
 0xe91   : > { %v5840_v57 = vpop.eup %5839  ;;  %5859 = vrcp.f32 %v3634_v60 }
 0xe92   : > { %v5842_v45 = vpop.eup %5841  ;;  %5861 = vrcp.f32 %v3636_v51  ;;  %v3721_v25 = vmul.f32 %v5840_v57, %v7351_v56  ;;  %v4345_v56 = vmul.f32 -1.442695, %v7429_v33 }
 0xe93   : > { %v5844_v21 = vpop.eup %5843  ;;  %5863 = vpow2.f32 %v4339_v2  ;;  %v3723_v29 = vmul.f32 %v5842_v45, %v7354_v26 }
 0xe94   : > { %v5846_v32 = vpop.eup %5845  ;;  %v3722_v55 = vmul.f32 %v5844_v21, %v7357_v35  ;;  %5865 = vpow2.f32 %v4338_v13  ;;  %v4344_v35 = vmul.f32 -1.442695, %v7424_v14 }
 0xe95   : > { %v5848_v49 = vpop.eup %5847  ;;  %v3724_v62 = vmul.f32 %v5846_v32, %v7360_v30  ;;  %5867 = vpow2.f32 %v4340_v63 }
 0xe96   : > { %v5850_v44 = vpop.eup %5849  ;;  %3888 = vmatprep.mubr.f32.mxu1 %v3722_v55  ;;  %5869 = vpow2.f32 %v4341_v4  ;;  %v3725_v15 = vmul.f32 %v5848_v49, %v7367_v47  ;;  %v3637_v47 = vadd.f32 1.0, %v5838_v61 }
 0xe97   : > { %v5852_v38 = vpop.eup %5851  ;;  %3993 = vmatprep.mubr.f32.mxu0 %v3724_v62  ;;  %3889 = vmatmul.mubr.f32.vlgmr.msra.gmra.mrb[64].mxu1 %v3721_v25  ;;  %5871 = vpow2.f32 %v4343_v28  ;;  %v3727_v53 = vmul.f32 %v5850_v44, %v7370_v19 }
 0xe98   : > { %v5854_v30 = vpop.eup %5853  ;;  %v3726_v7 = vmul.f32 %v5852_v38, %v7373_v54  ;;  %3994 = vmatmul.mubr.f32.vlgmr.msra.gmra.mrb[64].mxu0 %v3723_v29  ;;  %5873 = vpow2.f32 %v4342_v11 }
 0xe99   : > { %v5856_v26 = vpop.eup %5855  ;;  %v3728_v0 = vmul.f32 %v5854_v30, %v7376_v48  ;;  %5875 = vpow2.f32 %v4344_v35 }
 0xe9a   : > { %v5858_v16 = vpop.eup %5857  ;;  %3893 = vmatprep.mubr.f32.mxu1 %v3726_v7  ;;  %5877 = vpow2.f32 %v4345_v56  ;;  %v3729_v48 = vmul.f32 %v5856_v26, %v7383_v46 }
 0xe9b   : > { %v5860_v54 = vpop.eup %5859  ;;  %3998 = vmatprep.mubr.f32.mxu0 %v3728_v0  ;;  %3894 = vmatmul.mubr.f32.gmra.mrb[66].mxu1 %v3725_v15  ;;  %5879 = vpow2.f32 %v4347_v12  ;;  %v3731_v57 = vmul.f32 %v5858_v16, %v7386_v5 }
 0xe9c   : > { %v5862_v60 = vpop.eup %5861  ;;  %v3730_v51 = vmul.f32 %v5860_v54, %v7389_v6  ;;  %3999 = vmatmul.mubr.f32.gmra.mrb[66].mxu0 %v3727_v53  ;;  %5881 = vpow2.f32 %v4346_v17 }
 0xe9d   : > { %v3732_v2 = vmul.f32 %v5862_v60, %v7392_v39  ;;  %v5864_v19 = vpop.eup %5863  ;;  %5883 = vpow2.f32 %v4348_v10 }
 0xe9e   : > { %3898 = vmatprep.mubr.f32.mxu1 %v3730_v51  ;;  %v5866_v13 = vpop.eup %5865  ;;  %v3639_v45 = vadd.f32 1.0, %v5864_v19  ;;  %5885 = vrcp.f32 %v3637_v47 }
 0xe9f   : > { %4003 = vmatprep.mubr.f32.mxu0 %v3732_v2  ;;  %3899 = vmatmul.mubr.f32.gmra.mrb[68].mxu1 %v3729_v48  ;;  %v5868_v63 = vpop.eup %5867  ;;  %v3638_v6 = vadd.f32 1.0, %v5866_v13 }
 0xea0   : > { %4004 = vmatmul.mubr.f32.gmra.mrb[68].mxu0 %v3731_v57  ;;  %v5870_v61 = vpop.eup %5869  ;;  %5887 = vrcp.f32 %v3639_v45  ;;  %v3640_v21 = vadd.f32 1.0, %v5868_v63 }
 0xea1   : > { %v5872_v46 = vpop.eup %5871  ;;  %5889 = vrcp.f32 %v3638_v6  ;;  %v3641_v39 = vadd.f32 1.0, %v5870_v61 }
 0xea2   : > { %v3405_v4 = vpop.f32.mrb[60].mxu1  ;;  %v3518_v28 = vpop.f32.mrb[60].mxu0  ;;  %5891 = vrcp.f32 %v3640_v21  ;;  %v3643_v5 = vadd.f32 1.0, %v5872_v46 }
 0xea3   : > { %v5874_v32 = vpop.eup %5873  ;;  %v3407_v55 = vpop.f32.mrb[61].mxu1  ;;  %5893 = vrcp.f32 %v3641_v39  ;;  %v7459_v62 = vadd.f32 %v3405_v4, %v7342_v59  ;;  %v7462_v35 = vadd.f32 %v3518_v28, %v7344_v31 }
 0xea4   : > { %v3520_v11 = vpop.f32.mrb[61].mxu0  ;;  %v5876_v49 = vpop.eup %5875  ;;  %v3642_v25 = vadd.f32 1.0, %v5874_v32  ;;  %5895 = vrcp.f32 %v3643_v5  ;;  %v7465_v30 = vadd.f32 %v3407_v55, %v7346_v34 }
 0xea5   : > { %v5878_v44 = vpop.eup %5877  ;;  %v3644_v29 = vadd.f32 1.0, %v5876_v49  ;;  %v7468_v15 = vadd.f32 %v3520_v11, %v7348_v37  ;;  %v4349_v10 = vmul.f32 -1.442695, %v7459_v62  ;;  %v4351_v47 = vmul.f32 -1.442695, %v7462_v35 }
 0xea6   : > { %v5880_v38 = vpop.eup %5879  ;;  %5897 = vrcp.f32 %v3642_v25  ;;  %v3645_v56 = vadd.f32 1.0, %v5878_v44  ;;  %v3411_v7 = vpop.f32.mrb[62].mxu1  ;;  %v4350_v19 = vmul.f32 -1.442695, %v7465_v30 }
 0xea7   : > { %v5882_v12 = vpop.eup %5881  ;;  %5899 = vrcp.f32 %v3644_v29  ;;  %v3647_v26 = vadd.f32 1.0, %v5880_v38  ;;  %v3524_v0 = vpop.f32.mrb[62].mxu0  ;;  %v7472_v54 = vadd.f32 %v3411_v7, %v7342_v59  ;;  %v4352_v59 = vmul.f32 -1.442695, %v7468_v15 }
 0xea8   : > { %v3413_v17 = vpop.f32.mrb[63].mxu1  ;;  %v5884_v16 = vpop.eup %5883  ;;  %5901 = vrcp.f32 %v3645_v56  ;;  %v3646_v53 = vadd.f32 1.0, %v5882_v12  ;;  %v7476_v48 = vadd.f32 %v3524_v0, %v7344_v31 }
 0xea9   : > { %v3526_v60 = vpop.f32.mrb[63].mxu0  ;;  %5903 = vrcp.f32 %v3647_v26  ;;  %v3648_v51 = vadd.f32 1.0, %v5884_v16  ;;  %v5886_v2 = vpop.eup %5885  ;;  %v7480_v57 = vadd.f32 %v3413_v17, %v7346_v34  ;;  %v4353_v6 = vmul.f32 -1.442695, %v7472_v54 }
 0xeaa   : > { %5905 = vrcp.f32 %v3646_v53  ;;  %v5888_v13 = vpop.eup %5887  ;;  %v7484_v45 = vadd.f32 %v3526_v60, %v7348_v37  ;;  %v4355_v21 = vmul.f32 -1.442695, %v7476_v48  ;;  %v3733_v34 = vmul.f32 %v5886_v2, %v7399_v23 }
 0xeab   : > { %5907 = vrcp.f32 %v3648_v51  ;;  %v5890_v63 = vpop.eup %5889  ;;  %v4354_v4 = vmul.f32 -1.442695, %v7480_v57  ;;  %v3735_v28 = vmul.f32 %v5888_v13, %v7403_v58 }
 0xeac   : > { %5909 = vpow2.f32 %v4349_v10  ;;  %v5892_v31 = vpop.eup %5891  ;;  %v3734_v61 = vmul.f32 %v5890_v63, %v7406_v40  ;;  %v4356_v32 = vmul.f32 -1.442695, %v7484_v45 }
 0xead   : > { %5911 = vpow2.f32 %v4351_v47  ;;  %v5894_v46 = vpop.eup %5893  ;;  %v3736_v39 = vmul.f32 %v5892_v31, %v7409_v41 }
 0xeae   : > { %5913 = vpow2.f32 %v4350_v19  ;;  %v5896_v37 = vpop.eup %5895  ;;  %3903 = vmatprep.mubr.f32.mxu1 %v3734_v61  ;;  %v3737_v41 = vmul.f32 %v5894_v46, %v7412_v50 }
 0xeaf   : > { %5915 = vpow2.f32 %v4352_v59  ;;  %4008 = vmatprep.mubr.f32.mxu0 %v3736_v39  ;;  %3904 = vmatmul.mubr.f32.gmra.mrb[70].mxu1 %v3733_v34  ;;  %v3739_v49 = vmul.f32 %v5896_v37, %v7415_v42 }
 0xeb0   : > { %v5898_v5 = vpop.eup %5897  ;;  %5917 = vpow2.f32 %v4353_v6  ;;  %4009 = vmatmul.mubr.f32.gmra.mrb[70].mxu0 %v3735_v28 }
 0xeb1   : > { %v5900_v40 = vpop.eup %5899  ;;  %v3738_v55 = vmul.f32 %v5898_v5, %v7419_v52  ;;  %5919 = vpow2.f32 %v4355_v21 }
 0xeb2   : > { %v5902_v23 = vpop.eup %5901  ;;  %v3740_v11 = vmul.f32 %v5900_v40, %v7424_v14  ;;  %5921 = vpow2.f32 %v4354_v4 }
 0xeb3   : > { %v5904_v58 = vpop.eup %5903  ;;  %3908 = vmatprep.mubr.f32.mxu1 %v3738_v55  ;;  %5923 = vpow2.f32 %v4356_v32  ;;  %v3741_v38 = vmul.f32 %v5902_v23, %v7429_v33 }
 0xeb4   : > { %v5906_v25 = vpop.eup %5905  ;;  %4013 = vmatprep.mubr.f32.mxu0 %v3740_v11  ;;  %3909 = vmatmul.mubr.f32.gmra.mrb[72].mxu1 %v3737_v41  ;;  %v3743_v14 = vmul.f32 %v5904_v58, %v7434_v18 }
 0xeb5   : > { %v5908_v44 = vpop.eup %5907  ;;  %v3742_v29 = vmul.f32 %v5906_v25, %v7439_v27  ;;  %4014 = vmatmul.mubr.f32.gmra.mrb[72].mxu0 %v3739_v49 }
 0xeb6   : > { %v5910_v52 = vpop.eup %5909  ;;  %v3744_v50 = vmul.f32 %v5908_v44, %v7444_v22 }
 0xeb7   : > { %v5912_v56 = vpop.eup %5911  ;;  %v3649_v7 = vadd.f32 1.0, %v5910_v52  ;;  %3913 = vmatprep.mubr.f32.mxu1 %v3742_v29 }
 0xeb8   : > { %v5914_v42 = vpop.eup %5913  ;;  %v3651_v12 = vadd.f32 1.0, %v5912_v56  ;;  %4018 = vmatprep.mubr.f32.mxu0 %v3744_v50  ;;  %3914 = vmatmul.mubr.f32.gmra.mrb[74].mxu1 %v3741_v38 }
 0xeb9   : > { %v5916_v26 = vpop.eup %5915  ;;  %5925 = vrcp.f32 %v3649_v7  ;;  %v3650_v0 = vadd.f32 1.0, %v5914_v42  ;;  %4019 = vmatmul.mubr.f32.gmra.mrb[74].mxu0 %v3743_v14 }
 0xeba   : > { %v5918_v27 = vpop.eup %5917  ;;  %5927 = vrcp.f32 %v3651_v12  ;;  %v3652_v17 = vadd.f32 1.0, %v5916_v26 }
 0xebb   : > { %v5920_v16 = vpop.eup %5919  ;;  %5929 = vrcp.f32 %v3650_v0  ;;  %v3653_v33 = vadd.f32 1.0, %v5918_v27 }
 0xebc   : > { %v5922_v22 = vpop.eup %5921  ;;  %5931 = vrcp.f32 %v3652_v17  ;;  %v3655_v53 = vadd.f32 1.0, %v5920_v16 }
 0xebd   : > { %v5924_v18 = vpop.eup %5923  ;;  %5933 = vrcp.f32 %v3653_v33  ;;  %v3654_v10 = vadd.f32 1.0, %v5922_v22 }
 0xebe   : > { %5935 = vrcp.f32 %v3655_v53  ;;  %v3656_v60 = vadd.f32 1.0, %v5924_v18 }
 0xebf   : > { %5937 = vrcp.f32 %v3654_v10 }
 0xec0   : > { %5939 = vrcp.f32 %v3656_v60 }
 0xec3   : > { %v5926_v51 = vpop.eup %5925 }
 0xec4   : > { %v5928_v47 = vpop.eup %5927  ;;  %v3745_v63 = vmul.f32 %v5926_v51, %v7459_v62 }
 0xec5   : > { %v5930_v2 = vpop.eup %5929  ;;  %v3747_v61 = vmul.f32 %v5928_v47, %v7462_v35 }
 0xec6   : > { %v5932_v19 = vpop.eup %5931  ;;  %v3746_v13 = vmul.f32 %v5930_v2, %v7465_v30 }
 0xec7   : > { %v5934_v59 = vpop.eup %5933  ;;  %v3748_v6 = vmul.f32 %v5932_v19, %v7468_v15  ;;  %v7513_v15 = vld [vmem:[%s7637_s3] ss:$0 sm:$0xff] }
 0xec8   : > { %v5936_v31 = vpop.eup %5935  ;;  %3918 = vmatprep.mubr.f32.mxu1 %v3746_v13  ;;  %v3749_v39 = vmul.f32 %v5934_v59, %v7472_v54 }
 0xec9   : > { %v5938_v21 = vpop.eup %5937  ;;  %4023 = vmatprep.mubr.f32.mxu0 %v3748_v6  ;;  %3919 = vmatmul.mubr.f32.gmra.mrb[76].mxu1 %v3745_v63  ;;  %v3751_v4 = vmul.f32 %v5936_v31, %v7476_v48 }
 0xeca   : > { %v5940_v46 = vpop.eup %5939  ;;  %v3750_v34 = vmul.f32 %v5938_v21, %v7480_v57  ;;  %4024 = vmatmul.mubr.f32.gmra.mrb[76].mxu0 %v3747_v61 }
 0xecb   : > { %v3752_v30 = vmul.f32 %v5940_v46, %v7484_v45 }
 0xecc   : > { %3923 = vmatprep.mubr.f32.mxu1 %v3750_v34 }
 0xecd   : > { %4028 = vmatprep.mubr.f32.mxu0 %v3752_v30  ;;  %3924 = vmatmul.mubr.f32.gmra.mrb[78].mxu1 %v3749_v39 }
 0xece   : > { %4029 = vmatmul.mubr.f32.gmra.mrb[78].mxu0 %v3751_v4 }
 0xf6a   : > { %v4597_v62 = vpop.f32.mrb[64].mxu1 }
 0xf6b   : > { %v4653_v35 = vpop.f32.mrb[64].mxu0  ;;  %v4598_v37 = vpop.f32.mrb[65].mxu1 }
 0xf6c   : > { %v4599_v57 = vadd.f32 %v4598_v37, %v4597_v62  ;;  %v4654_v28 = vpop.f32.mrb[65].mxu0 }
 0xf6d   : > { %v4655_v54 = vadd.f32 %v4654_v28, %v4653_v35 }
 0xf6e   : > { %v3891_v45 = vadd.f32 %v4599_v57, %v7513_v15  ;;  %v4600_v32 = vpop.f32.mrb[66].mxu1 }
 0xf6f   : > { %v4656_v48 = vpop.f32.mrb[66].mxu0  ;;  %v4601_v5 = vpop.f32.mrb[67].mxu1 }
 0xf70   : > { %v3996_v40 = vadd.f32 %v4655_v54, %v3891_v45  ;;  %v4602_v55 = vadd.f32 %v4601_v5, %v4600_v32  ;;  %v4657_v23 = vpop.f32.mrb[67].mxu0 }
 0xf71   : > { %v4658_v41 = vadd.f32 %v4657_v23, %v4656_v48 }
 0xf72   : > { %v4034_v11 = vadd.f32 %v3996_v40, %v7219_v20  ;;  %v3896_v58 = vadd.f32 %v4602_v55, %v7513_v15  ;;  %v4603_v49 = vpop.f32.mrb[68].mxu1 }
 0xf73   : > { %v4659_v25 = vpop.f32.mrb[68].mxu0  ;;  %v4604_v44 = vpop.f32.mrb[69].mxu1 }
 0xf74   : > { %4042 = vst [vmem:[%s7520_s14] sm:$0xff] %v4034_v11  ;;  %v4001_v29 = vadd.f32 %v4658_v41, %v3896_v58  ;;  %v4605_v52 = vadd.f32 %v4604_v44, %v4603_v49  ;;  %v4660_v38 = vpop.f32.mrb[69].mxu0 }
 0xf75   : > { %v4661_v50 = vadd.f32 %v4660_v38, %v4659_v25 }
 0xf76   : > { %v4035_v56 = vadd.f32 %v4001_v29, %v7216_v9  ;;  %v3901_v20 = vadd.f32 %v4605_v52, %v7513_v15 }
 0xf78   : > { %4043 = vst [vmem:[%s7520_s14 + $0x8] sm:$0xff] %v4035_v56  ;;  %v4006_v14 = vadd.f32 %v4661_v50, %v3901_v20 }
 0xf7a   : > { %v4036_v7 = vadd.f32 %v4006_v14, %v7227_v24 }
 0xf7c   : > { %4044 = vst [vmem:[%s7520_s14 + $0x10] sm:$0xff] %v4036_v7 }
 0xf82   : > { %v4606_v42 = vpop.f32.mrb[70].mxu1 }
 0xf83   : > { %v4662_v12 = vpop.f32.mrb[70].mxu0  ;;  %v4607_v26 = vpop.f32.mrb[71].mxu1 }
 0xf84   : > { %v4608_v0 = vadd.f32 %v4607_v26, %v4606_v42  ;;  %v4663_v27 = vpop.f32.mrb[71].mxu0 }
 0xf85   : > { %v4664_v17 = vadd.f32 %v4663_v27, %v4662_v12 }
 0xf86   : > { %v3906_v16 = vadd.f32 %v4608_v0, %v7513_v15 }
 0xf87   : > { %v4609_v33 = vpop.f32.mrb[72].mxu1 }
 0xf88   : > { %v4665_v22 = vpop.f32.mrb[72].mxu0  ;;  %v4610_v53 = vpop.f32.mrb[73].mxu1  ;;  %v4011_v9 = vadd.f32 %v4664_v17, %v3906_v16 }
 0xf89   : > { %v4611_v18 = vadd.f32 %v4610_v53, %v4609_v33  ;;  %v4666_v10 = vpop.f32.mrb[73].mxu0 }
 0xf8a   : > { %v4667_v60 = vadd.f32 %v4666_v10, %v4665_v22  ;;  %v4037_v24 = vadd.f32 %v4011_v9, %v7224_v1 }
 0xf8b   : > { %v3911_v51 = vadd.f32 %v4611_v18, %v7513_v15  ;;  %v4612_v47 = vpop.f32.mrb[74].mxu1 }
 0xf8c   : > { %v4668_v2 = vpop.f32.mrb[74].mxu0  ;;  %v4613_v19 = vpop.f32.mrb[75].mxu1  ;;  %4045 = vst [vmem:[%s7520_s14 + $0x18] sm:$0xff] %v4037_v24 }
 0xf8d   : > { %v4016_v13 = vadd.f32 %v4667_v60, %v3911_v51  ;;  %v4614_v59 = vadd.f32 %v4613_v19, %v4612_v47  ;;  %v4669_v63 = vpop.f32.mrb[75].mxu0 }
 0xf8e   : > { %v4670_v6 = vadd.f32 %v4669_v63, %v4668_v2 }
 0xf8f   : > { %v4038_v31 = vadd.f32 %v4016_v13, %v7235_v43  ;;  %v3916_v61 = vadd.f32 %v4614_v59, %v7513_v15 }
 0xf91   : > { %4046 = vst [vmem:[%s7520_s14 + $0x20] sm:$0xff] %v4038_v31  ;;  %v4021_v21 = vadd.f32 %v4670_v6, %v3916_v61 }
 0xf93   : > { %v4039_v46 = vadd.f32 %v4021_v21, %v7232_v36 }
 0xf95   : > { %4047 = vst [vmem:[%s7520_s14 + $0x28] sm:$0xff] %v4039_v46 }
 0xf9c   : > { %v4615_v1 = vpop.f32.mrb[76].mxu1 }
 0xf9d   : > { %v4671_v34 = vpop.f32.mrb[76].mxu0  ;;  %v4616_v39 = vpop.f32.mrb[77].mxu1 }
 0xf9e   : > { %v4617_v30 = vadd.f32 %v4616_v39, %v4615_v1  ;;  %v4672_v4 = vpop.f32.mrb[77].mxu0 }
 0xf9f   : > { %v4673_v62 = vadd.f32 %v4672_v4, %v4671_v34 }
 0xfa0   : > { %v3921_v35 = vadd.f32 %v4617_v30, %v7513_v15  ;;  %v4618_v37 = vpop.f32.mrb[78].mxu1 }
 0xfa1   : > { %v4674_v43 = vpop.f32.mrb[78].mxu0  ;;  %v4619_v57 = vpop.f32.mrb[79].mxu1 }
 0xfa2   : > { %v4026_v28 = vadd.f32 %v4673_v62, %v3921_v35  ;;  %v4620_v54 = vadd.f32 %v4619_v57, %v4618_v37  ;;  %v4675_v36 = vpop.f32.mrb[79].mxu0 }
 0xfa3   : > { %v4676_v45 = vadd.f32 %v4675_v36, %v4674_v43 }
 0xfa4   : > { %v4040_v32 = vadd.f32 %v4026_v28, %v7243_v8  ;;  %v3926_v48 = vadd.f32 %v4620_v54, %v7513_v15 }
 0xfa6   : > { %4048 = vst [vmem:[%s7520_s14 + $0x30] sm:$0xff] %v4040_v32  ;;  %v4031_v5 = vadd.f32 %v4676_v45, %v3926_v48 }
 0xfa8   : > { %v4041_v40 = vadd.f32 %v4031_v5, %v7240_v3 }
 0xfaa   : > { %4049 = vst [vmem:[%s7520_s14 + $0x38] sm:$0xff] %v4041_v40 }
 0xfab   : > { %6104 = shalt.err (!%p6101_p13)
}
 0xfac   : > { %s6105_s9 = scalar_lea.hbm %s7546_s28, 1024  ;;  %s6109_s14 = scalar_lea.hbm %s7638_s13, 2048 }
 0xfad   : > { %p6106_p9 = scmp.ne.s32.totalorder %s7546_s28, %s6105_s9  ;;  %p6110_p4 = scmp.lt.u32.totalorder %s7546_s28, %s7638_s13 }
 0xfae   : > { %p6111_p8 = scmp.lt.u32.totalorder %s6109_s14, %s6105_s9  ;;  %p6113_p3 = scmp.lt.u32.totalorder %s6105_s9, %s7546_s28 }
 0xfaf   : > { %p6107_p0 = pnand %p6106_p9, %p6413_p10 }
 0xfb0   : > { %p6112_p6 = por %p6111_p8, %p6110_p4 }
 0xfb1   : > { %p6108_p11 = pneg %p6107_p0 }
 0xfb2   : > { %p6114_p5 = por %p6113_p3, %p6112_p6 }
 0xfb4   : > { %p6115_p7 = pnand %p6114_p5, %p6108_p11 }
 0xfb6   : > { %6118 = shalt.err (!%p6115_p7)
}
 0xfb7   : > { %s6184_s18 = smov 128   ;;  %s6185_s27 = smov 8  }
 0xfb8   : > { %5451 = dma.vmem_to_hbm [thread:$0]  (%p6413_p10), %s7548_s26, 1024, %s7546_s28, %s4051_s12, %s6184_s18, %s6184_s18, %s6185_s27  }
 0xfb9 PF: > { %s7639_s25 = sld [smem:[#allocation16_spill]]  ;;  %s7640_s29 = sld [smem:[#allocation17_spill]] }
 0xfba   : > { %p7642_p2 = scmp.ge.s32.totalorder %s6165_s24, 2 }
 0xfbf   : > { %s4079_s11 = sand.u32 1, %s7639_s25   ;;  %p7641_p12 = scmp.ne.s32.totalorder %s7640_s29, 0 }
 0xfc0   : > { %s4080_s9 = scalar_lea.sflag [#allocation4], %s4079_s11 }
 0xfc1   : > { %p5471_p1 = pnand %p7642_p2, %p7641_p12 }
 0xfc3   : > { %6148 = dma.done.wait (!%p5471_p1), %s4080_s9, 1024  }
 0xfc4   : > { %6150 = vsyncadd (!%p5471_p1), %s4080_s9, 4294966272  ;;  %p27_p13 = scmp.ge.s32.totalorder %s6403_s30, 4   ;;  %s7643_s21 = smov %s6157_s22 }
 0xfc5   : > { %s7644_s22 = smov %s6161_s23  ;;  %s7645_s23 = smov %s6419_s20 }
 0xfc6   : > { %s7646_s24 = smov %s6403_s30  ;;  %29 = sbr.rel (!%p27_p13) target bundleno = 12 (0xc), region = 129 }
 0xfcd   :  { %4085 = vsyncpa [#allocation3], 1 }
 0xfce   :  { %4087 = vsyncpa [#allocation3 + $0x1], 1 }
 0xfcf   :  { %4088 = vsyncpa [#allocation6], 1 }
 0xfd0   :  { %4089 = vsyncpa [#allocation9], 1 }
 0xfd1   :  { %4090 = vsyncpa [#allocation4], 1 }
 0xfd2   :  { %4092 = vsyncpa [#allocation4 + $0x1], 1 }

</bundles_post_ra>
